<compile_context>
chip_gen: v7x
topology: tpu7x:2x2x1
jax: 0.10.0
libtpu: 0.0.40
codegen_flags: <defaults>
</compile_context>

<pallas_src>
import functools
import numpy as np
import jax
import jax.numpy as jnp
from jax.experimental import pallas as pl
from jax.experimental.pallas import tpu as pltpu

BN_EPS = 1e-5


# ----------------------------- Pallas kernel -------------------------------

def _conv_gemm_kernel(w_ref, p_ref, scale_ref, shift_ref, o_ref, *, alpha):
    """out = (W @ act(P)) * scale + shift.

    W: (Cout, K) bf16 (resident), P: (K, tm) bf16 patch tile,
    out: (Cout, tm) f32 -- lane-dense along the spatial/M axis.
    alpha: None (no activation), 0.0 (ReLU), 0.2 (LeakyReLU), fused prologue.
    """
    p = p_ref[...]
    if alpha is not None:
        if alpha == 0.0:
            p = jnp.maximum(p, jnp.zeros_like(p))
        else:
            p = jnp.where(p > 0, p, alpha * p)
    acc = jnp.dot(w_ref[...], p, preferred_element_type=jnp.float32)
    o_ref[...] = acc * scale_ref[...] + shift_ref[...]


def _choose_m_tile(m):
    """Lane-axis tile: multiple of 128 with >=2 programs when M allows."""
    if m < 256:
        return m, m                      # single full block (tiny deep layers)
    tm = 256 if m < 1024 else 512        # keep 512 (safe for v7x 64 MiB VMEM)
    m_pad = ((m + tm - 1) // tm) * tm
    return tm, m_pad


def conv_gemm(w_mat, patches_t, scale, shift, *, alpha=None):
    """(Cout, K) @ (K, M) with fused activation + (bias+BN) affine epilogue."""
    cout, k = w_mat.shape
    m = patches_t.shape[1]
    tm, m_pad = _choose_m_tile(m)
    p_t = patches_t.astype(jnp.bfloat16)
    if m_pad != m:
        p_t = jnp.pad(p_t, ((0, 0), (0, m_pad - m)))
    out = pl.pallas_call(
        functools.partial(_conv_gemm_kernel, alpha=alpha),
        out_shape=jax.ShapeDtypeStruct((cout, m_pad), jnp.float32),
        grid_spec=pltpu.PrefetchScalarGridSpec(
            num_scalar_prefetch=0,
            grid=(m_pad // tm,),
            in_specs=[
                pl.BlockSpec((cout, k), lambda i: (0, 0)),   # resident weights
                pl.BlockSpec((k, tm), lambda i: (0, i)),     # patch tile
                pl.BlockSpec((cout, 1), lambda i: (0, 0)),   # BN scale
                pl.BlockSpec((cout, 1), lambda i: (0, 0)),   # BN shift (+bias)
            ],
            out_specs=pl.BlockSpec((cout, tm), lambda i: (0, i)),
        ),
        compiler_params=pltpu.CompilerParams(
            dimension_semantics=("parallel",)),
    )(w_mat.astype(jnp.bfloat16), p_t,
      scale.reshape(cout, 1).astype(jnp.float32),
      shift.reshape(cout, 1).astype(jnp.float32))
    return out[:, :m] if m_pad != m else out


# ------------------------------- JAX glue ----------------------------------

def im2col_t(x, kh, kw, stride, pad):
    """CNHW input -> (K = C*kh*kw, M = N*Ho*Wo) patch matrix."""
    c, n, h, w = x.shape
    xp = jnp.pad(x, ((0, 0), (0, 0), (pad, pad), (pad, pad)))
    ho = (h + 2 * pad - kh) // stride + 1
    wo = (w + 2 * pad - kw) // stride + 1
    cols = []
    for a in range(kh):
        for b in range(kw):
            cols.append(xp[:, :, a:a + stride * ho:stride, b:b + stride * wo:stride])
    p = jnp.stack(cols, axis=0).reshape(kh, kw, c, n, ho, wo)
    p = p.transpose(2, 0, 1, 3, 4, 5)          # (C, kh, kw, N, Ho, Wo)
    return p.reshape(c * kh * kw, n * ho * wo), (n, ho, wo)


def conv_cnhw(x, w, scale, shift, *, stride, pad, alpha=None):
    out_c, in_c, kh, kw = w.shape
    p_t, (n, ho, wo) = im2col_t(x, kh, kw, stride, pad)
    y = conv_gemm(w.reshape(out_c, in_c * kh * kw), p_t, scale, shift, alpha=alpha)
    return y.reshape(out_c, n, ho, wo)         # free reshape: next layer's CNHW


def upsample2x_bilinear(x):
    # nn.Upsample(scale_factor=2, mode='bilinear', align_corners=False).
    # x is (C, N, H, W) -- spatial axes are the last two, same as NCHW code.
    def up_h(v):
        prev = jnp.concatenate([v[:, :, :1, :], v[:, :, :-1, :]], axis=2)
        nxt = jnp.concatenate([v[:, :, 1:, :], v[:, :, -1:, :]], axis=2)
        even = 0.75 * v + 0.25 * prev
        odd = 0.75 * v + 0.25 * nxt
        c, n, h, w = v.shape
        return jnp.stack([even, odd], axis=3).reshape(c, n, 2 * h, w)

    def up_w(v):
        prev = jnp.concatenate([v[:, :, :, :1], v[:, :, :, :-1]], axis=3)
        nxt = jnp.concatenate([v[:, :, :, 1:], v[:, :, :, -1:]], axis=3)
        even = 0.75 * v + 0.25 * prev
        odd = 0.75 * v + 0.25 * nxt
        c, n, h, w = v.shape
        return jnp.stack([even, odd], axis=4).reshape(c, n, h, 2 * w)

    return up_w(up_h(x))


def fold_affine(bn, bias, cout):
    """Fold conv bias + eval-mode BN into a single (scale, shift)."""
    if bn is None:
        return jnp.ones((cout,), jnp.float32), bias.astype(jnp.float32)
    scale = bn['gamma'] / jnp.sqrt(bn['var'] + BN_EPS)
    shift = bn['beta'] + (bias - bn['mean']) * scale
    return scale, shift


# ---------------------------- parameter setup ------------------------------

def init_conv(key, out_c, in_c, k):
    k1, k2 = jax.random.split(key)
    bound = 1.0 / np.sqrt(in_c * k * k)
    return {'w': jax.random.uniform(k1, (out_c, in_c, k, k), jnp.float32, -bound, bound),
            'b': jax.random.uniform(k2, (out_c,), jnp.float32, -bound, bound)}


def init_convT(key, in_c, out_c, k):
    # PyTorch ConvTranspose2d weight layout: (in_c, out_c, k, k)
    k1, k2 = jax.random.split(key)
    bound = 1.0 / np.sqrt(in_c * k * k)
    return {'w': jax.random.uniform(k1, (in_c, out_c, k, k), jnp.float32, -bound, bound),
            'b': jax.random.uniform(k2, (out_c,), jnp.float32, -bound, bound)}


def init_bn(key, c):
    k1, k2 = jax.random.split(key)
    return {'gamma': 1.0 + 0.1 * jax.random.normal(k1, (c,), jnp.float32),
            'beta': 0.1 * jax.random.normal(k2, (c,), jnp.float32),
            'mean': jnp.zeros((c,), jnp.float32),
            'var': jnp.ones((c,), jnp.float32)}


def init_turbnet_params(key, channel_exponent=2):
    ch = int(2 ** channel_exponent + 0.5)
    ki = iter(list(jax.random.split(key, 32)))

    def enc(in_c, out_c, size, bn):
        d = {'conv': init_conv(next(ki), out_c, in_c, size)}
        if bn:
            d['bn'] = init_bn(next(ki), out_c)
        return d

    def dec(in_c, out_c, size):
        # decoder block: Upsample + Conv(kernel = size-1, stride 1) + BN
        return {'conv': init_conv(next(ki), out_c, in_c, size - 1),
                'bn': init_bn(next(ki), out_c)}

    p = {}
    p['layer1'] = {'conv': init_conv(next(ki), ch, 3, 4)}
    p['layer2'] = enc(ch, ch * 2, 4, True)
    p['layer2b'] = enc(ch * 2, ch * 2, 4, True)
    p['layer3'] = enc(ch * 2, ch * 4, 4, True)
    p['layer4'] = enc(ch * 4, ch * 8, 4, True)
    p['layer5'] = enc(ch * 8, ch * 8, 2, True)
    p['layer6'] = enc(ch * 8, ch * 8, 2, False)
    p['dlayer6'] = dec(ch * 8, ch * 8, 2)
    p['dlayer5'] = dec(ch * 16, ch * 8, 2)
    p['dlayer4'] = dec(ch * 16, ch * 4, 4)
    p['dlayer3'] = dec(ch * 8, ch * 2, 4)
    p['dlayer2b'] = dec(ch * 4, ch * 2, 4)
    p['dlayer2'] = dec(ch * 4, ch, 4)
    p['dlayer1'] = {'tconv': init_convT(next(ki), ch * 2, 3, 4)}
    return p, ch


# ------------------------------- forward -----------------------------------

def turbnet_forward(params, x, ch):
    xc = jnp.transpose(x, (1, 0, 2, 3))              # NCHW -> CNHW (once)

    # layer1: Conv2d(3, ch, 4, 2, 1) only (no activation, no BN)
    c1 = params['layer1']['conv']
    out1 = conv_cnhw(xc, c1['w'], *fold_affine(None, c1['b'], ch),
                     stride=2, pad=1, alpha=None)

    def enc_block(xin, p, pad):
        scale, shift = fold_affine(p.get('bn'), p['conv']['b'],
                                   p['conv']['w'].shape[0])
        # LeakyReLU(0.2) fused into the GEMM prologue (directly precedes conv).
        return conv_cnhw(xin, p['conv']['w'], scale, shift,
                         stride=2, pad=pad, alpha=0.2)

    def dec_block(xin, p, pad):
        # ReLU precedes the bilinear upsample (does not commute) -> JAX-fused.
        h = upsample2x_bilinear(jnp.maximum(xin, 0.0))
        scale, shift = fold_affine(p['bn'], p['conv']['b'],
                                   p['conv']['w'].shape[0])
        return conv_cnhw(h, p['conv']['w'], scale, shift,
                         stride=1, pad=pad, alpha=None)

    out2 = enc_block(out1, params['layer2'], 1)
    out2b = enc_block(out2, params['layer2b'], 1)
    out3 = enc_block(out2b, params['layer3'], 1)
    out4 = enc_block(out3, params['layer4'], 1)
    out5 = enc_block(out4, params['layer5'], 0)
    out6 = enc_block(out5, params['layer6'], 0)

    dout6 = dec_block(out6, params['dlayer6'], 0)
    dout5 = dec_block(jnp.concatenate([dout6, out5], 0), params['dlayer5'], 0)
    dout4 = dec_block(jnp.concatenate([dout5, out4], 0), params['dlayer4'], 1)
    dout3 = dec_block(jnp.concatenate([dout4, out3], 0), params['dlayer3'], 1)
    dout2b = dec_block(jnp.concatenate([dout3, out2b], 0), params['dlayer2b'], 1)
    dout2 = dec_block(jnp.concatenate([dout2b, out2], 0), params['dlayer2'], 1)

    # dlayer1: ReLU -> ConvTranspose2d(2*ch, 3, 4, 2, 1); polyphase lowering:
    # one 2x2 stride-1 conv over all windows of the pad-1 input with the four
    # phase sub-kernels stacked along Cout (lane-dense, no zero-stuffed input).
    h = jnp.concatenate([dout2, out1], 0)            # (2*ch, N, 64, 64)
    wt = params['dlayer1']['tconv']['w']             # (in_c, 3, 4, 4)
    w_eq = jnp.flip(wt, axis=(2, 3)).transpose(1, 0, 2, 3)      # (3, in_c, 4, 4)
    w_all = jnp.concatenate(
        [w_eq[:, :, r::2, s::2] for r in (0, 1) for s in (0, 1)], axis=0)
    b_all = jnp.tile(params['dlayer1']['tconv']['b'], 4)        # (12,)
    y_all = conv_cnhw(h, w_all, jnp.ones((12,), jnp.float32), b_all,
                      stride=1, pad=1, alpha=0.0)    # ReLU fused; (12,N,H+1,W+1)
    _, n, hh, ww = h.shape
    p00 = y_all[0:3, :, 0:hh, 0:ww]
    p01 = y_all[3:6, :, 0:hh, 1:ww + 1]
    p10 = y_all[6:9, :, 1:hh + 1, 0:ww]
    p11 = y_all[9:12, :, 1:hh + 1, 1:ww + 1]
    stk = jnp.stack([p00, p01, p10, p11], axis=0).reshape(2, 2, 3, n, hh, ww)
    dout1 = stk.transpose(2, 3, 4, 0, 5, 1).reshape(3, n, 2 * hh, 2 * ww)
    return jnp.transpose(dout1, (1, 0, 2, 3))        # back to NCHW


# --------------------------------- main -------------------------------------

if __name__ == "__main__":
    key = jax.random.PRNGKey(0)
    pkey, xkey = jax.random.split(key)
    # channelExponent=2 -> channels=4 (small); spatial 128 is the minimum the
    # 7-level encoder supports (bottleneck reaches 1x1).
    params, ch = init_turbnet_params(pkey, channel_exponent=2)
    x = jax.random.normal(xkey, (2, 3, 128, 128), jnp.float32)

    fwd = jax.jit(functools.partial(turbnet_forward, ch=ch))
    y = fwd(params, x)
    y = jax.block_until_ready(y)

    assert y.shape == (2, 3, 128, 128), y.shape
    assert bool(jnp.all(jnp.isfinite(y)))
    print("KERNEL_OK")
</pallas_src>

<mosaic_0001>
module attributes {stable_mosaic.version = 11 : i64} {
  func.func @_conv_gemm_kernel(%arg0: i32, %arg1: memref<4x48xbf16, #tpu.memory_space<vmem>>, %arg2: memref<48x512xbf16, #tpu.memory_space<vmem>>, %arg3: memref<4x1xf32, #tpu.memory_space<vmem>>, %arg4: memref<4x1xf32, #tpu.memory_space<vmem>>, %arg5: memref<4x512xf32, #tpu.memory_space<vmem>>) attributes {dimension_semantics = [#tpu.dimension_semantics<parallel>], iteration_bounds = array<i64: 16>, scalar_prefetch = 0 : i64, scratch_operands = 0 : i64, tpu.core_type = #tpu.core_type<tc>, window_params = [{pipeline_mode = #tpu.pipeline_mode<synchronous>, transform_indices = @transform_0, window_bounds = array<i64: 4, 48>}, {transform_indices = @transform_1, window_bounds = array<i64: 48, 512>}, {pipeline_mode = #tpu.pipeline_mode<synchronous>, transform_indices = @transform_2, window_bounds = array<i64: 4, 1>}, {pipeline_mode = #tpu.pipeline_mode<synchronous>, transform_indices = @transform_3, window_bounds = array<i64: 4, 1>}, {transform_indices = @transform_4, window_bounds = array<i64: 4, 512>}]} {
    %c0 = arith.constant 0 : index
    %c0_0 = arith.constant 0 : index
    %0 = vector.load %arg2[%c0, %c0_0] : memref<48x512xbf16, #tpu.memory_space<vmem>>, vector<48x512xbf16>
    %c0_1 = arith.constant 0 : index
    %c0_2 = arith.constant 0 : index
    %1 = vector.load %arg1[%c0_1, %c0_2] : memref<4x48xbf16, #tpu.memory_space<vmem>>, vector<4x48xbf16>
    %cst = arith.constant dense<0.000000e+00> : vector<4x512xf32>
    %2 = tpu.matmul %1, %0, %cst {dimension_numbers = #tpu.dot_dimension_numbers<[1], [0], [0], [1], [0, 0, 1, 1], [], []>} : vector<4x48xbf16>, vector<48x512xbf16>, vector<4x512xf32> -> vector<4x512xf32>
    %c0_3 = arith.constant 0 : index
    %c0_4 = arith.constant 0 : index
    %3 = vector.load %arg3[%c0_3, %c0_4] : memref<4x1xf32, #tpu.memory_space<vmem>>, vector<4x1xf32>
    %4 = vector.broadcast %3 : vector<4x1xf32> to vector<4x512xf32>
    %5 = arith.mulf %2, %4 : vector<4x512xf32>
    %c0_5 = arith.constant 0 : index
    %c0_6 = arith.constant 0 : index
    %6 = vector.load %arg4[%c0_5, %c0_6] : memref<4x1xf32, #tpu.memory_space<vmem>>, vector<4x1xf32>
    %7 = vector.broadcast %6 : vector<4x1xf32> to vector<4x512xf32>
    %8 = arith.addf %5, %7 : vector<4x512xf32>
    %c0_7 = arith.constant 0 : index
    %c0_8 = arith.constant 0 : index
    %9 = vector.load %arg5[%c0_7, %c0_8] : memref<4x512xf32, #tpu.memory_space<vmem>>, vector<4x512xf32>
    tpu.vector_store %arg5[%c0_7, %c0_8], %8 {strides = array<i32>} : memref<4x512xf32, #tpu.memory_space<vmem>>, vector<4x512xf32>,
    return
  }
  func.func @transform_0(%arg0: i32) -> (i32, i32) {
    %c0_i32 = arith.constant 0 : i32
    %c0_i32_0 = arith.constant 0 : i32
    %c0_i32_1 = arith.constant 0 : i32
    return %c0_i32, %c0_i32_0 : i32, i32
  }
  func.func @transform_1(%arg0: i32) -> (i32, i32) {
    %c0_i32 = arith.constant 0 : i32
    %c0_i32_0 = arith.constant 0 : i32
    return %c0_i32, %arg0 : i32, i32
  }
  func.func @transform_2(%arg0: i32) -> (i32, i32) {
    %c0_i32 = arith.constant 0 : i32
    %c0_i32_0 = arith.constant 0 : i32
    %c0_i32_1 = arith.constant 0 : i32
    return %c0_i32, %c0_i32_0 : i32, i32
  }
  func.func @transform_3(%arg0: i32) -> (i32, i32) {
    %c0_i32 = arith.constant 0 : i32
    %c0_i32_0 = arith.constant 0 : i32
    %c0_i32_1 = arith.constant 0 : i32
    return %c0_i32, %c0_i32_0 : i32, i32
  }
  func.func @transform_4(%arg0: i32) -> (i32, i32) {
    %c0_i32 = arith.constant 0 : i32
    %c0_i32_0 = arith.constant 0 : i32
    return %c0_i32, %arg0 : i32, i32
  }
}

module attributes {stable_mosaic.version = 11 : i64} {
  func.func @_conv_gemm_kernel(%arg0: i32, %arg1: memref<8x64xbf16, #tpu.memory_space<vmem>>, %arg2: memref<64x512xbf16, #tpu.memory_space<vmem>>, %arg3: memref<8x1xf32, #tpu.memory_space<vmem>>, %arg4: memref<8x1xf32, #tpu.memory_space<vmem>>, %arg5: memref<8x512xf32, #tpu.memory_space<vmem>>) attributes {dimension_semantics = [#tpu.dimension_semantics<parallel>], iteration_bounds = array<i64: 4>, scalar_prefetch = 0 : i64, scratch_operands = 0 : i64, tpu.core_type = #tpu.core_type<tc>, window_params = [{pipeline_mode = #tpu.pipeline_mode<synchronous>, transform_indices = @transform_0, window_bounds = array<i64: 8, 64>}, {transform_indices = @transform_1, window_bounds = array<i64: 64, 512>}, {pipeline_mode = #tpu.pipeline_mode<synchronous>, transform_indices = @transform_2, window_bounds = array<i64: 8, 1>}, {pipeline_mode = #tpu.pipeline_mode<synchronous>, transform_indices = @transform_3, window_bounds = array<i64: 8, 1>}, {transform_indices = @transform_4, window_bounds = array<i64: 8, 512>}]} {
    %c0 = arith.constant 0 : index
    %c0_0 = arith.constant 0 : index
    %0 = vector.load %arg2[%c0, %c0_0] : memref<64x512xbf16, #tpu.memory_space<vmem>>, vector<64x512xbf16>
    %cst = arith.constant 0.000000e+00 : bf16
    %1 = vector.broadcast %cst : bf16 to vector<64x512xbf16>
    %2 = arith.cmpf ogt, %0, %1 : vector<64x512xbf16>
    %cst_1 = arith.constant 2.001950e-01 : bf16
    %3 = vector.broadcast %cst_1 : bf16 to vector<64x512xbf16>
    %4 = arith.mulf %3, %0 : vector<64x512xbf16>
    %5 = arith.select %2, %0, %4 : vector<64x512xi1>, vector<64x512xbf16>
    %c0_2 = arith.constant 0 : index
    %c0_3 = arith.constant 0 : index
    %6 = vector.load %arg1[%c0_2, %c0_3] : memref<8x64xbf16, #tpu.memory_space<vmem>>, vector<8x64xbf16>
    %cst_4 = arith.constant dense<0.000000e+00> : vector<8x512xf32>
    %7 = tpu.matmul %6, %5, %cst_4 {dimension_numbers = #tpu.dot_dimension_numbers<[1], [0], [0], [1], [0, 0, 1, 1], [], []>} : vector<8x64xbf16>, vector<64x512xbf16>, vector<8x512xf32> -> vector<8x512xf32>
    %c0_5 = arith.constant 0 : index
    %c0_6 = arith.constant 0 : index
    %8 = vector.load %arg3[%c0_5, %c0_6] : memref<8x1xf32, #tpu.memory_space<vmem>>, vector<8x1xf32>
    %9 = vector.broadcast %8 : vector<8x1xf32> to vector<8x512xf32>
    %10 = arith.mulf %7, %9 : vector<8x512xf32>
    %c0_7 = arith.constant 0 : index
    %c0_8 = arith.constant 0 : index
    %11 = vector.load %arg4[%c0_7, %c0_8] : memref<8x1xf32, #tpu.memory_space<vmem>>, vector<8x1xf32>
    %12 = vector.broadcast %11 : vector<8x1xf32> to vector<8x512xf32>
    %13 = arith.addf %10, %12 : vector<8x512xf32>
    %c0_9 = arith.constant 0 : index
    %c0_10 = arith.constant 0 : index
    %14 = vector.load %arg5[%c0_9, %c0_10] : memref<8x512xf32, #tpu.memory_space<vmem>>, vector<8x512xf32>
    tpu.vector_store %arg5[%c0_9, %c0_10], %13 {strides = array<i32>} : memref<8x512xf32, #tpu.memory_space<vmem>>, vector<8x512xf32>,
    return
  }
  func.func @transform_0(%arg0: i32) -> (i32, i32) {
    %c0_i32 = arith.constant 0 : i32
    %c0_i32_0 = arith.constant 0 : i32
    %c0_i32_1 = arith.constant 0 : i32
    return %c0_i32, %c0_i32_0 : i32, i32
  }
  func.func @transform_1(%arg0: i32) -> (i32, i32) {
    %c0_i32 = arith.constant 0 : i32
    %c0_i32_0 = arith.constant 0 : i32
    return %c0_i32, %arg0 : i32, i32
  }
  func.func @transform_2(%arg0: i32) -> (i32, i32) {
    %c0_i32 = arith.constant 0 : i32
    %c0_i32_0 = arith.constant 0 : i32
    %c0_i32_1 = arith.constant 0 : i32
    return %c0_i32, %c0_i32_0 : i32, i32
  }
  func.func @transform_3(%arg0: i32) -> (i32, i32) {
    %c0_i32 = arith.constant 0 : i32
    %c0_i32_0 = arith.constant 0 : i32
    %c0_i32_1 = arith.constant 0 : i32
    return %c0_i32, %c0_i32_0 : i32, i32
  }
  func.func @transform_4(%arg0: i32) -> (i32, i32) {
    %c0_i32 = arith.constant 0 : i32
    %c0_i32_0 = arith.constant 0 : i32
    return %c0_i32, %arg0 : i32, i32
  }
}

module attributes {stable_mosaic.version = 11 : i64} {
  func.func @_conv_gemm_kernel(%arg0: i32, %arg1: memref<8x128xbf16, #tpu.memory_space<vmem>>, %arg2: memref<128x256xbf16, #tpu.memory_space<vmem>>, %arg3: memref<8x1xf32, #tpu.memory_space<vmem>>, %arg4: memref<8x1xf32, #tpu.memory_space<vmem>>, %arg5: memref<8x256xf32, #tpu.memory_space<vmem>>) attributes {dimension_semantics = [#tpu.dimension_semantics<parallel>], iteration_bounds = array<i64: 2>, scalar_prefetch = 0 : i64, scratch_operands = 0 : i64, tpu.core_type = #tpu.core_type<tc>, window_params = [{pipeline_mode = #tpu.pipeline_mode<synchronous>, transform_indices = @transform_0, window_bounds = array<i64: 8, 128>}, {transform_indices = @transform_1, window_bounds = array<i64: 128, 256>}, {pipeline_mode = #tpu.pipeline_mode<synchronous>, transform_indices = @transform_2, window_bounds = array<i64: 8, 1>}, {pipeline_mode = #tpu.pipeline_mode<synchronous>, transform_indices = @transform_3, window_bounds = array<i64: 8, 1>}, {transform_indices = @transform_4, window_bounds = array<i64: 8, 256>}]} {
    %c0 = arith.constant 0 : index
    %c0_0 = arith.constant 0 : index
    %0 = vector.load %arg2[%c0, %c0_0] : memref<128x256xbf16, #tpu.memory_space<vmem>>, vector<128x256xbf16>
    %cst = arith.constant 0.000000e+00 : bf16
    %1 = vector.broadcast %cst : bf16 to vector<128x256xbf16>
    %2 = arith.cmpf ogt, %0, %1 : vector<128x256xbf16>
    %cst_1 = arith.constant 2.001950e-01 : bf16
    %3 = vector.broadcast %cst_1 : bf16 to vector<128x256xbf16>
    %4 = arith.mulf %3, %0 : vector<128x256xbf16>
    %5 = arith.select %2, %0, %4 : vector<128x256xi1>, vector<128x256xbf16>
    %c0_2 = arith.constant 0 : index
    %c0_3 = arith.constant 0 : index
    %6 = vector.load %arg1[%c0_2, %c0_3] : memref<8x128xbf16, #tpu.memory_space<vmem>>, vector<8x128xbf16>
    %cst_4 = arith.constant dense<0.000000e+00> : vector<8x256xf32>
    %7 = tpu.matmul %6, %5, %cst_4 {dimension_numbers = #tpu.dot_dimension_numbers<[1], [0], [0], [1], [0, 0, 1, 1], [], []>} : vector<8x128xbf16>, vector<128x256xbf16>, vector<8x256xf32> -> vector<8x256xf32>
    %c0_5 = arith.constant 0 : index
    %c0_6 = arith.constant 0 : index
    %8 = vector.load %arg3[%c0_5, %c0_6] : memref<8x1xf32, #tpu.memory_space<vmem>>, vector<8x1xf32>
    %9 = vector.broadcast %8 : vector<8x1xf32> to vector<8x256xf32>
    %10 = arith.mulf %7, %9 : vector<8x256xf32>
    %c0_7 = arith.constant 0 : index
    %c0_8 = arith.constant 0 : index
    %11 = vector.load %arg4[%c0_7, %c0_8] : memref<8x1xf32, #tpu.memory_space<vmem>>, vector<8x1xf32>
    %12 = vector.broadcast %11 : vector<8x1xf32> to vector<8x256xf32>
    %13 = arith.addf %10, %12 : vector<8x256xf32>
    %c0_9 = arith.constant 0 : index
    %c0_10 = arith.constant 0 : index
    %14 = vector.load %arg5[%c0_9, %c0_10] : memref<8x256xf32, #tpu.memory_space<vmem>>, vector<8x256xf32>
    tpu.vector_store %arg5[%c0_9, %c0_10], %13 {strides = array<i32>} : memref<8x256xf32, #tpu.memory_space<vmem>>, vector<8x256xf32>,
    return
  }
  func.func @transform_0(%arg0: i32) -> (i32, i32) {
    %c0_i32 = arith.constant 0 : i32
    %c0_i32_0 = arith.constant 0 : i32
    %c0_i32_1 = arith.constant 0 : i32
    return %c0_i32, %c0_i32_0 : i32, i32
  }
  func.func @transform_1(%arg0: i32) -> (i32, i32) {
    %c0_i32 = arith.constant 0 : i32
    %c0_i32_0 = arith.constant 0 : i32
    return %c0_i32, %arg0 : i32, i32
  }
  func.func @transform_2(%arg0: i32) -> (i32, i32) {
    %c0_i32 = arith.constant 0 : i32
    %c0_i32_0 = arith.constant 0 : i32
    %c0_i32_1 = arith.constant 0 : i32
    return %c0_i32, %c0_i32_0 : i32, i32
  }
  func.func @transform_3(%arg0: i32) -> (i32, i32) {
    %c0_i32 = arith.constant 0 : i32
    %c0_i32_0 = arith.constant 0 : i32
    %c0_i32_1 = arith.constant 0 : i32
    return %c0_i32, %c0_i32_0 : i32, i32
  }
  func.func @transform_4(%arg0: i32) -> (i32, i32) {
    %c0_i32 = arith.constant 0 : i32
    %c0_i32_0 = arith.constant 0 : i32
    return %c0_i32, %arg0 : i32, i32
  }
}

module attributes {stable_mosaic.version = 11 : i64} {
  func.func @_conv_gemm_kernel(%arg0: i32, %arg1: memref<16x128xbf16, #tpu.memory_space<vmem>>, %arg2: memref<128x128xbf16, #tpu.memory_space<vmem>>, %arg3: memref<16x1xf32, #tpu.memory_space<vmem>>, %arg4: memref<16x1xf32, #tpu.memory_space<vmem>>, %arg5: memref<16x128xf32, #tpu.memory_space<vmem>>) attributes {dimension_semantics = [#tpu.dimension_semantics<parallel>], iteration_bounds = array<i64: 1>, scalar_prefetch = 0 : i64, scratch_operands = 0 : i64, tpu.core_type = #tpu.core_type<tc>, window_params = [{pipeline_mode = #tpu.pipeline_mode<synchronous>, transform_indices = @transform_0, window_bounds = array<i64: 16, 128>}, {transform_indices = @transform_1, window_bounds = array<i64: 128, 128>}, {pipeline_mode = #tpu.pipeline_mode<synchronous>, transform_indices = @transform_2, window_bounds = array<i64: 16, 1>}, {pipeline_mode = #tpu.pipeline_mode<synchronous>, transform_indices = @transform_3, window_bounds = array<i64: 16, 1>}, {transform_indices = @transform_4, window_bounds = array<i64: 16, 128>}]} {
    %c0 = arith.constant 0 : index
    %c0_0 = arith.constant 0 : index
    %0 = vector.load %arg2[%c0, %c0_0] : memref<128x128xbf16, #tpu.memory_space<vmem>>, vector<128x128xbf16>
    %cst = arith.constant 0.000000e+00 : bf16
    %1 = vector.broadcast %cst : bf16 to vector<128x128xbf16>
    %2 = arith.cmpf ogt, %0, %1 : vector<128x128xbf16>
    %cst_1 = arith.constant 2.001950e-01 : bf16
    %3 = vector.broadcast %cst_1 : bf16 to vector<128x128xbf16>
    %4 = arith.mulf %3, %0 : vector<128x128xbf16>
    %5 = arith.select %2, %0, %4 : vector<128x128xi1>, vector<128x128xbf16>
    %c0_2 = arith.constant 0 : index
    %c0_3 = arith.constant 0 : index
    %6 = vector.load %arg1[%c0_2, %c0_3] : memref<16x128xbf16, #tpu.memory_space<vmem>>, vector<16x128xbf16>
    %cst_4 = arith.constant dense<0.000000e+00> : vector<16x128xf32>
    %7 = tpu.matmul %6, %5, %cst_4 {dimension_numbers = #tpu.dot_dimension_numbers<[1], [0], [0], [1], [0, 0, 1, 1], [], []>} : vector<16x128xbf16>, vector<128x128xbf16>, vector<16x128xf32> -> vector<16x128xf32>
    %c0_5 = arith.constant 0 : index
    %c0_6 = arith.constant 0 : index
    %8 = vector.load %arg3[%c0_5, %c0_6] : memref<16x1xf32, #tpu.memory_space<vmem>>, vector<16x1xf32>
    %9 = vector.broadcast %8 : vector<16x1xf32> to vector<16x128xf32>
    %10 = arith.mulf %7, %9 : vector<16x128xf32>
    %c0_7 = arith.constant 0 : index
    %c0_8 = arith.constant 0 : index
    %11 = vector.load %arg4[%c0_7, %c0_8] : memref<16x1xf32, #tpu.memory_space<vmem>>, vector<16x1xf32>
    %12 = vector.broadcast %11 : vector<16x1xf32> to vector<16x128xf32>
    %13 = arith.addf %10, %12 : vector<16x128xf32>
    %c0_9 = arith.constant 0 : index
    %c0_10 = arith.constant 0 : index
    %14 = vector.load %arg5[%c0_9, %c0_10] : memref<16x128xf32, #tpu.memory_space<vmem>>, vector<16x128xf32>
    tpu.vector_store %arg5[%c0_9, %c0_10], %13 {strides = array<i32>} : memref<16x128xf32, #tpu.memory_space<vmem>>, vector<16x128xf32>,
    return
  }
  func.func @transform_0(%arg0: i32) -> (i32, i32) {
    %c0_i32 = arith.constant 0 : i32
    %c0_i32_0 = arith.constant 0 : i32
    %c0_i32_1 = arith.constant 0 : i32
    return %c0_i32, %c0_i32_0 : i32, i32
  }
  func.func @transform_1(%arg0: i32) -> (i32, i32) {
    %c0_i32 = arith.constant 0 : i32
    %c0_i32_0 = arith.constant 0 : i32
    return %c0_i32, %arg0 : i32, i32
  }
  func.func @transform_2(%arg0: i32) -> (i32, i32) {
    %c0_i32 = arith.constant 0 : i32
    %c0_i32_0 = arith.constant 0 : i32
    %c0_i32_1 = arith.constant 0 : i32
    return %c0_i32, %c0_i32_0 : i32, i32
  }
  func.func @transform_3(%arg0: i32) -> (i32, i32) {
    %c0_i32 = arith.constant 0 : i32
    %c0_i32_0 = arith.constant 0 : i32
    %c0_i32_1 = arith.constant 0 : i32
    return %c0_i32, %c0_i32_0 : i32, i32
  }
  func.func @transform_4(%arg0: i32) -> (i32, i32) {
    %c0_i32 = arith.constant 0 : i32
    %c0_i32_0 = arith.constant 0 : i32
    return %c0_i32, %arg0 : i32, i32
  }
}

module attributes {stable_mosaic.version = 11 : i64} {
  func.func @_conv_gemm_kernel(%arg0: i32, %arg1: memref<32x256xbf16, #tpu.memory_space<vmem>>, %arg2: memref<256x32xbf16, #tpu.memory_space<vmem>>, %arg3: memref<32x1xf32, #tpu.memory_space<vmem>>, %arg4: memref<32x1xf32, #tpu.memory_space<vmem>>, %arg5: memref<32x32xf32, #tpu.memory_space<vmem>>) attributes {dimension_semantics = [#tpu.dimension_semantics<parallel>], iteration_bounds = array<i64: 1>, scalar_prefetch = 0 : i64, scratch_operands = 0 : i64, tpu.core_type = #tpu.core_type<tc>, window_params = [{pipeline_mode = #tpu.pipeline_mode<synchronous>, transform_indices = @transform_0, window_bounds = array<i64: 32, 256>}, {transform_indices = @transform_1, window_bounds = array<i64: 256, 32>}, {pipeline_mode = #tpu.pipeline_mode<synchronous>, transform_indices = @transform_2, window_bounds = array<i64: 32, 1>}, {pipeline_mode = #tpu.pipeline_mode<synchronous>, transform_indices = @transform_3, window_bounds = array<i64: 32, 1>}, {transform_indices = @transform_4, window_bounds = array<i64: 32, 32>}]} {
    %c0 = arith.constant 0 : index
    %c0_0 = arith.constant 0 : index
    %0 = vector.load %arg2[%c0, %c0_0] : memref<256x32xbf16, #tpu.memory_space<vmem>>, vector<256x32xbf16>
    %cst = arith.constant 0.000000e+00 : bf16
    %1 = vector.broadcast %cst : bf16 to vector<256x32xbf16>
    %2 = arith.cmpf ogt, %0, %1 : vector<256x32xbf16>
    %cst_1 = arith.constant 2.001950e-01 : bf16
    %3 = vector.broadcast %cst_1 : bf16 to vector<256x32xbf16>
    %4 = arith.mulf %3, %0 : vector<256x32xbf16>
    %5 = arith.select %2, %0, %4 : vector<256x32xi1>, vector<256x32xbf16>
    %c0_2 = arith.constant 0 : index
    %c0_3 = arith.constant 0 : index
    %6 = vector.load %arg1[%c0_2, %c0_3] : memref<32x256xbf16, #tpu.memory_space<vmem>>, vector<32x256xbf16>
    %cst_4 = arith.constant dense<0.000000e+00> : vector<32x32xf32>
    %7 = tpu.matmul %6, %5, %cst_4 {dimension_numbers = #tpu.dot_dimension_numbers<[1], [0], [0], [1], [0, 0, 1, 1], [], []>} : vector<32x256xbf16>, vector<256x32xbf16>, vector<32x32xf32> -> vector<32x32xf32>
    %c0_5 = arith.constant 0 : index
    %c0_6 = arith.constant 0 : index
    %8 = vector.load %arg3[%c0_5, %c0_6] : memref<32x1xf32, #tpu.memory_space<vmem>>, vector<32x1xf32>
    %9 = vector.broadcast %8 : vector<32x1xf32> to vector<32x32xf32>
    %10 = arith.mulf %7, %9 : vector<32x32xf32>
    %c0_7 = arith.constant 0 : index
    %c0_8 = arith.constant 0 : index
    %11 = vector.load %arg4[%c0_7, %c0_8] : memref<32x1xf32, #tpu.memory_space<vmem>>, vector<32x1xf32>
    %12 = vector.broadcast %11 : vector<32x1xf32> to vector<32x32xf32>
    %13 = arith.addf %10, %12 : vector<32x32xf32>
    %c0_9 = arith.constant 0 : index
    %c0_10 = arith.constant 0 : index
    %14 = vector.load %arg5[%c0_9, %c0_10] : memref<32x32xf32, #tpu.memory_space<vmem>>, vector<32x32xf32>
    tpu.vector_store %arg5[%c0_9, %c0_10], %13 {strides = array<i32>} : memref<32x32xf32, #tpu.memory_space<vmem>>, vector<32x32xf32>,
    return
  }
  func.func @transform_0(%arg0: i32) -> (i32, i32) {
    %c0_i32 = arith.constant 0 : i32
    %c0_i32_0 = arith.constant 0 : i32
    %c0_i32_1 = arith.constant 0 : i32
    return %c0_i32, %c0_i32_0 : i32, i32
  }
  func.func @transform_1(%arg0: i32) -> (i32, i32) {
    %c0_i32 = arith.constant 0 : i32
    %c0_i32_0 = arith.constant 0 : i32
    return %c0_i32, %arg0 : i32, i32
  }
  func.func @transform_2(%arg0: i32) -> (i32, i32) {
    %c0_i32 = arith.constant 0 : i32
    %c0_i32_0 = arith.constant 0 : i32
    %c0_i32_1 = arith.constant 0 : i32
    return %c0_i32, %c0_i32_0 : i32, i32
  }
  func.func @transform_3(%arg0: i32) -> (i32, i32) {
    %c0_i32 = arith.constant 0 : i32
    %c0_i32_0 = arith.constant 0 : i32
    %c0_i32_1 = arith.constant 0 : i32
    return %c0_i32, %c0_i32_0 : i32, i32
  }
  func.func @transform_4(%arg0: i32) -> (i32, i32) {
    %c0_i32 = arith.constant 0 : i32
    %c0_i32_0 = arith.constant 0 : i32
    return %c0_i32, %arg0 : i32, i32
  }
}

module attributes {stable_mosaic.version = 11 : i64} {
  func.func @_conv_gemm_kernel(%arg0: i32, %arg1: memref<32x128xbf16, #tpu.memory_space<vmem>>, %arg2: memref<128x8xbf16, #tpu.memory_space<vmem>>, %arg3: memref<32x1xf32, #tpu.memory_space<vmem>>, %arg4: memref<32x1xf32, #tpu.memory_space<vmem>>, %arg5: memref<32x8xf32, #tpu.memory_space<vmem>>) attributes {dimension_semantics = [#tpu.dimension_semantics<parallel>], iteration_bounds = array<i64: 1>, scalar_prefetch = 0 : i64, scratch_operands = 0 : i64, tpu.core_type = #tpu.core_type<tc>, window_params = [{pipeline_mode = #tpu.pipeline_mode<synchronous>, transform_indices = @transform_0, window_bounds = array<i64: 32, 128>}, {transform_indices = @transform_1, window_bounds = array<i64: 128, 8>}, {pipeline_mode = #tpu.pipeline_mode<synchronous>, transform_indices = @transform_2, window_bounds = array<i64: 32, 1>}, {pipeline_mode = #tpu.pipeline_mode<synchronous>, transform_indices = @transform_3, window_bounds = array<i64: 32, 1>}, {transform_indices = @transform_4, window_bounds = array<i64: 32, 8>}]} {
    %c0 = arith.constant 0 : index
    %c0_0 = arith.constant 0 : index
    %0 = vector.load %arg2[%c0, %c0_0] : memref<128x8xbf16, #tpu.memory_space<vmem>>, vector<128x8xbf16>
    %cst = arith.constant 0.000000e+00 : bf16
    %1 = vector.broadcast %cst : bf16 to vector<128x8xbf16>
    %2 = arith.cmpf ogt, %0, %1 : vector<128x8xbf16>
    %cst_1 = arith.constant 2.001950e-01 : bf16
    %3 = vector.broadcast %cst_1 : bf16 to vector<128x8xbf16>
    %4 = arith.mulf %3, %0 : vector<128x8xbf16>
    %5 = arith.select %2, %0, %4 : vector<128x8xi1>, vector<128x8xbf16>
    %c0_2 = arith.constant 0 : index
    %c0_3 = arith.constant 0 : index
    %6 = vector.load %arg1[%c0_2, %c0_3] : memref<32x128xbf16, #tpu.memory_space<vmem>>, vector<32x128xbf16>
    %cst_4 = arith.constant dense<0.000000e+00> : vector<32x8xf32>
    %7 = tpu.matmul %6, %5, %cst_4 {dimension_numbers = #tpu.dot_dimension_numbers<[1], [0], [0], [1], [0, 0, 1, 1], [], []>} : vector<32x128xbf16>, vector<128x8xbf16>, vector<32x8xf32> -> vector<32x8xf32>
    %c0_5 = arith.constant 0 : index
    %c0_6 = arith.constant 0 : index
    %8 = vector.load %arg3[%c0_5, %c0_6] : memref<32x1xf32, #tpu.memory_space<vmem>>, vector<32x1xf32>
    %9 = vector.broadcast %8 : vector<32x1xf32> to vector<32x8xf32>
    %10 = arith.mulf %7, %9 : vector<32x8xf32>
    %c0_7 = arith.constant 0 : index
    %c0_8 = arith.constant 0 : index
    %11 = vector.load %arg4[%c0_7, %c0_8] : memref<32x1xf32, #tpu.memory_space<vmem>>, vector<32x1xf32>
    %12 = vector.broadcast %11 : vector<32x1xf32> to vector<32x8xf32>
    %13 = arith.addf %10, %12 : vector<32x8xf32>
    %c0_9 = arith.constant 0 : index
    %c0_10 = arith.constant 0 : index
    %14 = vector.load %arg5[%c0_9, %c0_10] : memref<32x8xf32, #tpu.memory_space<vmem>>, vector<32x8xf32>
    tpu.vector_store %arg5[%c0_9, %c0_10], %13 {strides = array<i32>} : memref<32x8xf32, #tpu.memory_space<vmem>>, vector<32x8xf32>,
    return
  }
  func.func @transform_0(%arg0: i32) -> (i32, i32) {
    %c0_i32 = arith.constant 0 : i32
    %c0_i32_0 = arith.constant 0 : i32
    %c0_i32_1 = arith.constant 0 : i32
    return %c0_i32, %c0_i32_0 : i32, i32
  }
  func.func @transform_1(%arg0: i32) -> (i32, i32) {
    %c0_i32 = arith.constant 0 : i32
    %c0_i32_0 = arith.constant 0 : i32
    return %c0_i32, %arg0 : i32, i32
  }
  func.func @transform_2(%arg0: i32) -> (i32, i32) {
    %c0_i32 = arith.constant 0 : i32
    %c0_i32_0 = arith.constant 0 : i32
    %c0_i32_1 = arith.constant 0 : i32
    return %c0_i32, %c0_i32_0 : i32, i32
  }
  func.func @transform_3(%arg0: i32) -> (i32, i32) {
    %c0_i32 = arith.constant 0 : i32
    %c0_i32_0 = arith.constant 0 : i32
    %c0_i32_1 = arith.constant 0 : i32
    return %c0_i32, %c0_i32_0 : i32, i32
  }
  func.func @transform_4(%arg0: i32) -> (i32, i32) {
    %c0_i32 = arith.constant 0 : i32
    %c0_i32_0 = arith.constant 0 : i32
    return %c0_i32, %arg0 : i32, i32
  }
}

module attributes {stable_mosaic.version = 11 : i64} {
  func.func @_conv_gemm_kernel(%arg0: i32, %arg1: memref<32x128xbf16, #tpu.memory_space<vmem>>, %arg2: memref<128x2xbf16, #tpu.memory_space<vmem>>, %arg3: memref<32x1xf32, #tpu.memory_space<vmem>>, %arg4: memref<32x1xf32, #tpu.memory_space<vmem>>, %arg5: memref<32x2xf32, #tpu.memory_space<vmem>>) attributes {dimension_semantics = [#tpu.dimension_semantics<parallel>], iteration_bounds = array<i64: 1>, scalar_prefetch = 0 : i64, scratch_operands = 0 : i64, tpu.core_type = #tpu.core_type<tc>, window_params = [{pipeline_mode = #tpu.pipeline_mode<synchronous>, transform_indices = @transform_0, window_bounds = array<i64: 32, 128>}, {transform_indices = @transform_1, window_bounds = array<i64: 128, 2>}, {pipeline_mode = #tpu.pipeline_mode<synchronous>, transform_indices = @transform_2, window_bounds = array<i64: 32, 1>}, {pipeline_mode = #tpu.pipeline_mode<synchronous>, transform_indices = @transform_3, window_bounds = array<i64: 32, 1>}, {transform_indices = @transform_4, window_bounds = array<i64: 32, 2>}]} {
    %c0 = arith.constant 0 : index
    %c0_0 = arith.constant 0 : index
    %0 = vector.load %arg2[%c0, %c0_0] : memref<128x2xbf16, #tpu.memory_space<vmem>>, vector<128x2xbf16>
    %cst = arith.constant 0.000000e+00 : bf16
    %1 = vector.broadcast %cst : bf16 to vector<128x2xbf16>
    %2 = arith.cmpf ogt, %0, %1 : vector<128x2xbf16>
    %cst_1 = arith.constant 2.001950e-01 : bf16
    %3 = vector.broadcast %cst_1 : bf16 to vector<128x2xbf16>
    %4 = arith.mulf %3, %0 : vector<128x2xbf16>
    %5 = arith.select %2, %0, %4 : vector<128x2xi1>, vector<128x2xbf16>
    %c0_2 = arith.constant 0 : index
    %c0_3 = arith.constant 0 : index
    %6 = vector.load %arg1[%c0_2, %c0_3] : memref<32x128xbf16, #tpu.memory_space<vmem>>, vector<32x128xbf16>
    %cst_4 = arith.constant dense<0.000000e+00> : vector<32x2xf32>
    %7 = tpu.matmul %6, %5, %cst_4 {dimension_numbers = #tpu.dot_dimension_numbers<[1], [0], [0], [1], [0, 0, 1, 1], [], []>} : vector<32x128xbf16>, vector<128x2xbf16>, vector<32x2xf32> -> vector<32x2xf32>
    %c0_5 = arith.constant 0 : index
    %c0_6 = arith.constant 0 : index
    %8 = vector.load %arg3[%c0_5, %c0_6] : memref<32x1xf32, #tpu.memory_space<vmem>>, vector<32x1xf32>
    %9 = vector.broadcast %8 : vector<32x1xf32> to vector<32x2xf32>
    %10 = arith.mulf %7, %9 : vector<32x2xf32>
    %c0_7 = arith.constant 0 : index
    %c0_8 = arith.constant 0 : index
    %11 = vector.load %arg4[%c0_7, %c0_8] : memref<32x1xf32, #tpu.memory_space<vmem>>, vector<32x1xf32>
    %12 = vector.broadcast %11 : vector<32x1xf32> to vector<32x2xf32>
    %13 = arith.addf %10, %12 : vector<32x2xf32>
    %c0_9 = arith.constant 0 : index
    %c0_10 = arith.constant 0 : index
    %14 = vector.load %arg5[%c0_9, %c0_10] : memref<32x2xf32, #tpu.memory_space<vmem>>, vector<32x2xf32>
    tpu.vector_store %arg5[%c0_9, %c0_10], %13 {strides = array<i32>} : memref<32x2xf32, #tpu.memory_space<vmem>>, vector<32x2xf32>,
    return
  }
  func.func @transform_0(%arg0: i32) -> (i32, i32) {
    %c0_i32 = arith.constant 0 : i32
    %c0_i32_0 = arith.constant 0 : i32
    %c0_i32_1 = arith.constant 0 : i32
    return %c0_i32, %c0_i32_0 : i32, i32
  }
  func.func @transform_1(%arg0: i32) -> (i32, i32) {
    %c0_i32 = arith.constant 0 : i32
    %c0_i32_0 = arith.constant 0 : i32
    return %c0_i32, %arg0 : i32, i32
  }
  func.func @transform_2(%arg0: i32) -> (i32, i32) {
    %c0_i32 = arith.constant 0 : i32
    %c0_i32_0 = arith.constant 0 : i32
    %c0_i32_1 = arith.constant 0 : i32
    return %c0_i32, %c0_i32_0 : i32, i32
  }
  func.func @transform_3(%arg0: i32) -> (i32, i32) {
    %c0_i32 = arith.constant 0 : i32
    %c0_i32_0 = arith.constant 0 : i32
    %c0_i32_1 = arith.constant 0 : i32
    return %c0_i32, %c0_i32_0 : i32, i32
  }
  func.func @transform_4(%arg0: i32) -> (i32, i32) {
    %c0_i32 = arith.constant 0 : i32
    %c0_i32_0 = arith.constant 0 : i32
    return %c0_i32, %arg0 : i32, i32
  }
}

module attributes {stable_mosaic.version = 11 : i64} {
  func.func @_conv_gemm_kernel(%arg0: i32, %arg1: memref<32x32xbf16, #tpu.memory_space<vmem>>, %arg2: memref<32x8xbf16, #tpu.memory_space<vmem>>, %arg3: memref<32x1xf32, #tpu.memory_space<vmem>>, %arg4: memref<32x1xf32, #tpu.memory_space<vmem>>, %arg5: memref<32x8xf32, #tpu.memory_space<vmem>>) attributes {dimension_semantics = [#tpu.dimension_semantics<parallel>], iteration_bounds = array<i64: 1>, scalar_prefetch = 0 : i64, scratch_operands = 0 : i64, tpu.core_type = #tpu.core_type<tc>, window_params = [{pipeline_mode = #tpu.pipeline_mode<synchronous>, transform_indices = @transform_0, window_bounds = array<i64: 32, 32>}, {transform_indices = @transform_1, window_bounds = array<i64: 32, 8>}, {pipeline_mode = #tpu.pipeline_mode<synchronous>, transform_indices = @transform_2, window_bounds = array<i64: 32, 1>}, {pipeline_mode = #tpu.pipeline_mode<synchronous>, transform_indices = @transform_3, window_bounds = array<i64: 32, 1>}, {transform_indices = @transform_4, window_bounds = array<i64: 32, 8>}]} {
    %c0 = arith.constant 0 : index
    %c0_0 = arith.constant 0 : index
    %0 = vector.load %arg2[%c0, %c0_0] : memref<32x8xbf16, #tpu.memory_space<vmem>>, vector<32x8xbf16>
    %c0_1 = arith.constant 0 : index
    %c0_2 = arith.constant 0 : index
    %1 = vector.load %arg1[%c0_1, %c0_2] : memref<32x32xbf16, #tpu.memory_space<vmem>>, vector<32x32xbf16>
    %cst = arith.constant dense<0.000000e+00> : vector<32x8xf32>
    %2 = tpu.matmul %1, %0, %cst {dimension_numbers = #tpu.dot_dimension_numbers<[1], [0], [0], [1], [0, 0, 1, 1], [], []>} : vector<32x32xbf16>, vector<32x8xbf16>, vector<32x8xf32> -> vector<32x8xf32>
    %c0_3 = arith.constant 0 : index
    %c0_4 = arith.constant 0 : index
    %3 = vector.load %arg3[%c0_3, %c0_4] : memref<32x1xf32, #tpu.memory_space<vmem>>, vector<32x1xf32>
    %4 = vector.broadcast %3 : vector<32x1xf32> to vector<32x8xf32>
    %5 = arith.mulf %2, %4 : vector<32x8xf32>
    %c0_5 = arith.constant 0 : index
    %c0_6 = arith.constant 0 : index
    %6 = vector.load %arg4[%c0_5, %c0_6] : memref<32x1xf32, #tpu.memory_space<vmem>>, vector<32x1xf32>
    %7 = vector.broadcast %6 : vector<32x1xf32> to vector<32x8xf32>
    %8 = arith.addf %5, %7 : vector<32x8xf32>
    %c0_7 = arith.constant 0 : index
    %c0_8 = arith.constant 0 : index
    %9 = vector.load %arg5[%c0_7, %c0_8] : memref<32x8xf32, #tpu.memory_space<vmem>>, vector<32x8xf32>
    tpu.vector_store %arg5[%c0_7, %c0_8], %8 {strides = array<i32>} : memref<32x8xf32, #tpu.memory_space<vmem>>, vector<32x8xf32>,
    return
  }
  func.func @transform_0(%arg0: i32) -> (i32, i32) {
    %c0_i32 = arith.constant 0 : i32
    %c0_i32_0 = arith.constant 0 : i32
    %c0_i32_1 = arith.constant 0 : i32
    return %c0_i32, %c0_i32_0 : i32, i32
  }
  func.func @transform_1(%arg0: i32) -> (i32, i32) {
    %c0_i32 = arith.constant 0 : i32
    %c0_i32_0 = arith.constant 0 : i32
    return %c0_i32, %arg0 : i32, i32
  }
  func.func @transform_2(%arg0: i32) -> (i32, i32) {
    %c0_i32 = arith.constant 0 : i32
    %c0_i32_0 = arith.constant 0 : i32
    %c0_i32_1 = arith.constant 0 : i32
    return %c0_i32, %c0_i32_0 : i32, i32
  }
  func.func @transform_3(%arg0: i32) -> (i32, i32) {
    %c0_i32 = arith.constant 0 : i32
    %c0_i32_0 = arith.constant 0 : i32
    %c0_i32_1 = arith.constant 0 : i32
    return %c0_i32, %c0_i32_0 : i32, i32
  }
  func.func @transform_4(%arg0: i32) -> (i32, i32) {
    %c0_i32 = arith.constant 0 : i32
    %c0_i32_0 = arith.constant 0 : i32
    return %c0_i32, %arg0 : i32, i32
  }
}

module attributes {stable_mosaic.version = 11 : i64} {
  func.func @_conv_gemm_kernel(%arg0: i32, %arg1: memref<32x64xbf16, #tpu.memory_space<vmem>>, %arg2: memref<64x32xbf16, #tpu.memory_space<vmem>>, %arg3: memref<32x1xf32, #tpu.memory_space<vmem>>, %arg4: memref<32x1xf32, #tpu.memory_space<vmem>>, %arg5: memref<32x32xf32, #tpu.memory_space<vmem>>) attributes {dimension_semantics = [#tpu.dimension_semantics<parallel>], iteration_bounds = array<i64: 1>, scalar_prefetch = 0 : i64, scratch_operands = 0 : i64, tpu.core_type = #tpu.core_type<tc>, window_params = [{pipeline_mode = #tpu.pipeline_mode<synchronous>, transform_indices = @transform_0, window_bounds = array<i64: 32, 64>}, {transform_indices = @transform_1, window_bounds = array<i64: 64, 32>}, {pipeline_mode = #tpu.pipeline_mode<synchronous>, transform_indices = @transform_2, window_bounds = array<i64: 32, 1>}, {pipeline_mode = #tpu.pipeline_mode<synchronous>, transform_indices = @transform_3, window_bounds = array<i64: 32, 1>}, {transform_indices = @transform_4, window_bounds = array<i64: 32, 32>}]} {
    %c0 = arith.constant 0 : index
    %c0_0 = arith.constant 0 : index
    %0 = vector.load %arg2[%c0, %c0_0] : memref<64x32xbf16, #tpu.memory_space<vmem>>, vector<64x32xbf16>
    %c0_1 = arith.constant 0 : index
    %c0_2 = arith.constant 0 : index
    %1 = vector.load %arg1[%c0_1, %c0_2] : memref<32x64xbf16, #tpu.memory_space<vmem>>, vector<32x64xbf16>
    %cst = arith.constant dense<0.000000e+00> : vector<32x32xf32>
    %2 = tpu.matmul %1, %0, %cst {dimension_numbers = #tpu.dot_dimension_numbers<[1], [0], [0], [1], [0, 0, 1, 1], [], []>} : vector<32x64xbf16>, vector<64x32xbf16>, vector<32x32xf32> -> vector<32x32xf32>
    %c0_3 = arith.constant 0 : index
    %c0_4 = arith.constant 0 : index
    %3 = vector.load %arg3[%c0_3, %c0_4] : memref<32x1xf32, #tpu.memory_space<vmem>>, vector<32x1xf32>
    %4 = vector.broadcast %3 : vector<32x1xf32> to vector<32x32xf32>
    %5 = arith.mulf %2, %4 : vector<32x32xf32>
    %c0_5 = arith.constant 0 : index
    %c0_6 = arith.constant 0 : index
    %6 = vector.load %arg4[%c0_5, %c0_6] : memref<32x1xf32, #tpu.memory_space<vmem>>, vector<32x1xf32>
    %7 = vector.broadcast %6 : vector<32x1xf32> to vector<32x32xf32>
    %8 = arith.addf %5, %7 : vector<32x32xf32>
    %c0_7 = arith.constant 0 : index
    %c0_8 = arith.constant 0 : index
    %9 = vector.load %arg5[%c0_7, %c0_8] : memref<32x32xf32, #tpu.memory_space<vmem>>, vector<32x32xf32>
    tpu.vector_store %arg5[%c0_7, %c0_8], %8 {strides = array<i32>} : memref<32x32xf32, #tpu.memory_space<vmem>>, vector<32x32xf32>,
    return
  }
  func.func @transform_0(%arg0: i32) -> (i32, i32) {
    %c0_i32 = arith.constant 0 : i32
    %c0_i32_0 = arith.constant 0 : i32
    %c0_i32_1 = arith.constant 0 : i32
    return %c0_i32, %c0_i32_0 : i32, i32
  }
  func.func @transform_1(%arg0: i32) -> (i32, i32) {
    %c0_i32 = arith.constant 0 : i32
    %c0_i32_0 = arith.constant 0 : i32
    return %c0_i32, %arg0 : i32, i32
  }
  func.func @transform_2(%arg0: i32) -> (i32, i32) {
    %c0_i32 = arith.constant 0 : i32
    %c0_i32_0 = arith.constant 0 : i32
    %c0_i32_1 = arith.constant 0 : i32
    return %c0_i32, %c0_i32_0 : i32, i32
  }
  func.func @transform_3(%arg0: i32) -> (i32, i32) {
    %c0_i32 = arith.constant 0 : i32
    %c0_i32_0 = arith.constant 0 : i32
    %c0_i32_1 = arith.constant 0 : i32
    return %c0_i32, %c0_i32_0 : i32, i32
  }
  func.func @transform_4(%arg0: i32) -> (i32, i32) {
    %c0_i32 = arith.constant 0 : i32
    %c0_i32_0 = arith.constant 0 : i32
    return %c0_i32, %arg0 : i32, i32
  }
}

module attributes {stable_mosaic.version = 11 : i64} {
  func.func @_conv_gemm_kernel(%arg0: i32, %arg1: memref<16x576xbf16, #tpu.memory_space<vmem>>, %arg2: memref<576x128xbf16, #tpu.memory_space<vmem>>, %arg3: memref<16x1xf32, #tpu.memory_space<vmem>>, %arg4: memref<16x1xf32, #tpu.memory_space<vmem>>, %arg5: memref<16x128xf32, #tpu.memory_space<vmem>>) attributes {dimension_semantics = [#tpu.dimension_semantics<parallel>], iteration_bounds = array<i64: 1>, scalar_prefetch = 0 : i64, scratch_operands = 0 : i64, tpu.core_type = #tpu.core_type<tc>, window_params = [{pipeline_mode = #tpu.pipeline_mode<synchronous>, transform_indices = @transform_0, window_bounds = array<i64: 16, 576>}, {transform_indices = @transform_1, window_bounds = array<i64: 576, 128>}, {pipeline_mode = #tpu.pipeline_mode<synchronous>, transform_indices = @transform_2, window_bounds = array<i64: 16, 1>}, {pipeline_mode = #tpu.pipeline_mode<synchronous>, transform_indices = @transform_3, window_bounds = array<i64: 16, 1>}, {transform_indices = @transform_4, window_bounds = array<i64: 16, 128>}]} {
    %c0 = arith.constant 0 : index
    %c0_0 = arith.constant 0 : index
    %0 = vector.load %arg2[%c0, %c0_0] : memref<576x128xbf16, #tpu.memory_space<vmem>>, vector<576x128xbf16>
    %c0_1 = arith.constant 0 : index
    %c0_2 = arith.constant 0 : index
    %1 = vector.load %arg1[%c0_1, %c0_2] : memref<16x576xbf16, #tpu.memory_space<vmem>>, vector<16x576xbf16>
    %cst = arith.constant dense<0.000000e+00> : vector<16x128xf32>
    %2 = tpu.matmul %1, %0, %cst {dimension_numbers = #tpu.dot_dimension_numbers<[1], [0], [0], [1], [0, 0, 1, 1], [], []>} : vector<16x576xbf16>, vector<576x128xbf16>, vector<16x128xf32> -> vector<16x128xf32>
    %c0_3 = arith.constant 0 : index
    %c0_4 = arith.constant 0 : index
    %3 = vector.load %arg3[%c0_3, %c0_4] : memref<16x1xf32, #tpu.memory_space<vmem>>, vector<16x1xf32>
    %4 = vector.broadcast %3 : vector<16x1xf32> to vector<16x128xf32>
    %5 = arith.mulf %2, %4 : vector<16x128xf32>
    %c0_5 = arith.constant 0 : index
    %c0_6 = arith.constant 0 : index
    %6 = vector.load %arg4[%c0_5, %c0_6] : memref<16x1xf32, #tpu.memory_space<vmem>>, vector<16x1xf32>
    %7 = vector.broadcast %6 : vector<16x1xf32> to vector<16x128xf32>
    %8 = arith.addf %5, %7 : vector<16x128xf32>
    %c0_7 = arith.constant 0 : index
    %c0_8 = arith.constant 0 : index
    %9 = vector.load %arg5[%c0_7, %c0_8] : memref<16x128xf32, #tpu.memory_space<vmem>>, vector<16x128xf32>
    tpu.vector_store %arg5[%c0_7, %c0_8], %8 {strides = array<i32>} : memref<16x128xf32, #tpu.memory_space<vmem>>, vector<16x128xf32>,
    return
  }
  func.func @transform_0(%arg0: i32) -> (i32, i32) {
    %c0_i32 = arith.constant 0 : i32
    %c0_i32_0 = arith.constant 0 : i32
    %c0_i32_1 = arith.constant 0 : i32
    return %c0_i32, %c0_i32_0 : i32, i32
  }
  func.func @transform_1(%arg0: i32) -> (i32, i32) {
    %c0_i32 = arith.constant 0 : i32
    %c0_i32_0 = arith.constant 0 : i32
    return %c0_i32, %arg0 : i32, i32
  }
  func.func @transform_2(%arg0: i32) -> (i32, i32) {
    %c0_i32 = arith.constant 0 : i32
    %c0_i32_0 = arith.constant 0 : i32
    %c0_i32_1 = arith.constant 0 : i32
    return %c0_i32, %c0_i32_0 : i32, i32
  }
  func.func @transform_3(%arg0: i32) -> (i32, i32) {
    %c0_i32 = arith.constant 0 : i32
    %c0_i32_0 = arith.constant 0 : i32
    %c0_i32_1 = arith.constant 0 : i32
    return %c0_i32, %c0_i32_0 : i32, i32
  }
  func.func @transform_4(%arg0: i32) -> (i32, i32) {
    %c0_i32 = arith.constant 0 : i32
    %c0_i32_0 = arith.constant 0 : i32
    return %c0_i32, %arg0 : i32, i32
  }
}

module attributes {stable_mosaic.version = 11 : i64} {
  func.func @_conv_gemm_kernel(%arg0: i32, %arg1: memref<8x288xbf16, #tpu.memory_space<vmem>>, %arg2: memref<288x256xbf16, #tpu.memory_space<vmem>>, %arg3: memref<8x1xf32, #tpu.memory_space<vmem>>, %arg4: memref<8x1xf32, #tpu.memory_space<vmem>>, %arg5: memref<8x256xf32, #tpu.memory_space<vmem>>) attributes {dimension_semantics = [#tpu.dimension_semantics<parallel>], iteration_bounds = array<i64: 2>, scalar_prefetch = 0 : i64, scratch_operands = 0 : i64, tpu.core_type = #tpu.core_type<tc>, window_params = [{pipeline_mode = #tpu.pipeline_mode<synchronous>, transform_indices = @transform_0, window_bounds = array<i64: 8, 288>}, {transform_indices = @transform_1, window_bounds = array<i64: 288, 256>}, {pipeline_mode = #tpu.pipeline_mode<synchronous>, transform_indices = @transform_2, window_bounds = array<i64: 8, 1>}, {pipeline_mode = #tpu.pipeline_mode<synchronous>, transform_indices = @transform_3, window_bounds = array<i64: 8, 1>}, {transform_indices = @transform_4, window_bounds = array<i64: 8, 256>}]} {
    %c0 = arith.constant 0 : index
    %c0_0 = arith.constant 0 : index
    %0 = vector.load %arg2[%c0, %c0_0] : memref<288x256xbf16, #tpu.memory_space<vmem>>, vector<288x256xbf16>
    %c0_1 = arith.constant 0 : index
    %c0_2 = arith.constant 0 : index
    %1 = vector.load %arg1[%c0_1, %c0_2] : memref<8x288xbf16, #tpu.memory_space<vmem>>, vector<8x288xbf16>
    %cst = arith.constant dense<0.000000e+00> : vector<8x256xf32>
    %2 = tpu.matmul %1, %0, %cst {dimension_numbers = #tpu.dot_dimension_numbers<[1], [0], [0], [1], [0, 0, 1, 1], [], []>} : vector<8x288xbf16>, vector<288x256xbf16>, vector<8x256xf32> -> vector<8x256xf32>
    %c0_3 = arith.constant 0 : index
    %c0_4 = arith.constant 0 : index
    %3 = vector.load %arg3[%c0_3, %c0_4] : memref<8x1xf32, #tpu.memory_space<vmem>>, vector<8x1xf32>
    %4 = vector.broadcast %3 : vector<8x1xf32> to vector<8x256xf32>
    %5 = arith.mulf %2, %4 : vector<8x256xf32>
    %c0_5 = arith.constant 0 : index
    %c0_6 = arith.constant 0 : index
    %6 = vector.load %arg4[%c0_5, %c0_6] : memref<8x1xf32, #tpu.memory_space<vmem>>, vector<8x1xf32>
    %7 = vector.broadcast %6 : vector<8x1xf32> to vector<8x256xf32>
    %8 = arith.addf %5, %7 : vector<8x256xf32>
    %c0_7 = arith.constant 0 : index
    %c0_8 = arith.constant 0 : index
    %9 = vector.load %arg5[%c0_7, %c0_8] : memref<8x256xf32, #tpu.memory_space<vmem>>, vector<8x256xf32>
    tpu.vector_store %arg5[%c0_7, %c0_8], %8 {strides = array<i32>} : memref<8x256xf32, #tpu.memory_space<vmem>>, vector<8x256xf32>,
    return
  }
  func.func @transform_0(%arg0: i32) -> (i32, i32) {
    %c0_i32 = arith.constant 0 : i32
    %c0_i32_0 = arith.constant 0 : i32
    %c0_i32_1 = arith.constant 0 : i32
    return %c0_i32, %c0_i32_0 : i32, i32
  }
  func.func @transform_1(%arg0: i32) -> (i32, i32) {
    %c0_i32 = arith.constant 0 : i32
    %c0_i32_0 = arith.constant 0 : i32
    return %c0_i32, %arg0 : i32, i32
  }
  func.func @transform_2(%arg0: i32) -> (i32, i32) {
    %c0_i32 = arith.constant 0 : i32
    %c0_i32_0 = arith.constant 0 : i32
    %c0_i32_1 = arith.constant 0 : i32
    return %c0_i32, %c0_i32_0 : i32, i32
  }
  func.func @transform_3(%arg0: i32) -> (i32, i32) {
    %c0_i32 = arith.constant 0 : i32
    %c0_i32_0 = arith.constant 0 : i32
    %c0_i32_1 = arith.constant 0 : i32
    return %c0_i32, %c0_i32_0 : i32, i32
  }
  func.func @transform_4(%arg0: i32) -> (i32, i32) {
    %c0_i32 = arith.constant 0 : i32
    %c0_i32_0 = arith.constant 0 : i32
    return %c0_i32, %arg0 : i32, i32
  }
}

module attributes {stable_mosaic.version = 11 : i64} {
  func.func @_conv_gemm_kernel(%arg0: i32, %arg1: memref<8x144xbf16, #tpu.memory_space<vmem>>, %arg2: memref<144x512xbf16, #tpu.memory_space<vmem>>, %arg3: memref<8x1xf32, #tpu.memory_space<vmem>>, %arg4: memref<8x1xf32, #tpu.memory_space<vmem>>, %arg5: memref<8x512xf32, #tpu.memory_space<vmem>>) attributes {dimension_semantics = [#tpu.dimension_semantics<parallel>], iteration_bounds = array<i64: 4>, scalar_prefetch = 0 : i64, scratch_operands = 0 : i64, tpu.core_type = #tpu.core_type<tc>, window_params = [{pipeline_mode = #tpu.pipeline_mode<synchronous>, transform_indices = @transform_0, window_bounds = array<i64: 8, 144>}, {transform_indices = @transform_1, window_bounds = array<i64: 144, 512>}, {pipeline_mode = #tpu.pipeline_mode<synchronous>, transform_indices = @transform_2, window_bounds = array<i64: 8, 1>}, {pipeline_mode = #tpu.pipeline_mode<synchronous>, transform_indices = @transform_3, window_bounds = array<i64: 8, 1>}, {transform_indices = @transform_4, window_bounds = array<i64: 8, 512>}]} {
    %c0 = arith.constant 0 : index
    %c0_0 = arith.constant 0 : index
    %0 = vector.load %arg2[%c0, %c0_0] : memref<144x512xbf16, #tpu.memory_space<vmem>>, vector<144x512xbf16>
    %c0_1 = arith.constant 0 : index
    %c0_2 = arith.constant 0 : index
    %1 = vector.load %arg1[%c0_1, %c0_2] : memref<8x144xbf16, #tpu.memory_space<vmem>>, vector<8x144xbf16>
    %cst = arith.constant dense<0.000000e+00> : vector<8x512xf32>
    %2 = tpu.matmul %1, %0, %cst {dimension_numbers = #tpu.dot_dimension_numbers<[1], [0], [0], [1], [0, 0, 1, 1], [], []>} : vector<8x144xbf16>, vector<144x512xbf16>, vector<8x512xf32> -> vector<8x512xf32>
    %c0_3 = arith.constant 0 : index
    %c0_4 = arith.constant 0 : index
    %3 = vector.load %arg3[%c0_3, %c0_4] : memref<8x1xf32, #tpu.memory_space<vmem>>, vector<8x1xf32>
    %4 = vector.broadcast %3 : vector<8x1xf32> to vector<8x512xf32>
    %5 = arith.mulf %2, %4 : vector<8x512xf32>
    %c0_5 = arith.constant 0 : index
    %c0_6 = arith.constant 0 : index
    %6 = vector.load %arg4[%c0_5, %c0_6] : memref<8x1xf32, #tpu.memory_space<vmem>>, vector<8x1xf32>
    %7 = vector.broadcast %6 : vector<8x1xf32> to vector<8x512xf32>
    %8 = arith.addf %5, %7 : vector<8x512xf32>
    %c0_7 = arith.constant 0 : index
    %c0_8 = arith.constant 0 : index
    %9 = vector.load %arg5[%c0_7, %c0_8] : memref<8x512xf32, #tpu.memory_space<vmem>>, vector<8x512xf32>
    tpu.vector_store %arg5[%c0_7, %c0_8], %8 {strides = array<i32>} : memref<8x512xf32, #tpu.memory_space<vmem>>, vector<8x512xf32>,
    return
  }
  func.func @transform_0(%arg0: i32) -> (i32, i32) {
    %c0_i32 = arith.constant 0 : i32
    %c0_i32_0 = arith.constant 0 : i32
    %c0_i32_1 = arith.constant 0 : i32
    return %c0_i32, %c0_i32_0 : i32, i32
  }
  func.func @transform_1(%arg0: i32) -> (i32, i32) {
    %c0_i32 = arith.constant 0 : i32
    %c0_i32_0 = arith.constant 0 : i32
    return %c0_i32, %arg0 : i32, i32
  }
  func.func @transform_2(%arg0: i32) -> (i32, i32) {
    %c0_i32 = arith.constant 0 : i32
    %c0_i32_0 = arith.constant 0 : i32
    %c0_i32_1 = arith.constant 0 : i32
    return %c0_i32, %c0_i32_0 : i32, i32
  }
  func.func @transform_3(%arg0: i32) -> (i32, i32) {
    %c0_i32 = arith.constant 0 : i32
    %c0_i32_0 = arith.constant 0 : i32
    %c0_i32_1 = arith.constant 0 : i32
    return %c0_i32, %c0_i32_0 : i32, i32
  }
  func.func @transform_4(%arg0: i32) -> (i32, i32) {
    %c0_i32 = arith.constant 0 : i32
    %c0_i32_0 = arith.constant 0 : i32
    return %c0_i32, %arg0 : i32, i32
  }
}

module attributes {stable_mosaic.version = 11 : i64} {
  func.func @_conv_gemm_kernel(%arg0: i32, %arg1: memref<4x144xbf16, #tpu.memory_space<vmem>>, %arg2: memref<144x512xbf16, #tpu.memory_space<vmem>>, %arg3: memref<4x1xf32, #tpu.memory_space<vmem>>, %arg4: memref<4x1xf32, #tpu.memory_space<vmem>>, %arg5: memref<4x512xf32, #tpu.memory_space<vmem>>) attributes {dimension_semantics = [#tpu.dimension_semantics<parallel>], iteration_bounds = array<i64: 16>, scalar_prefetch = 0 : i64, scratch_operands = 0 : i64, tpu.core_type = #tpu.core_type<tc>, window_params = [{pipeline_mode = #tpu.pipeline_mode<synchronous>, transform_indices = @transform_0, window_bounds = array<i64: 4, 144>}, {transform_indices = @transform_1, window_bounds = array<i64: 144, 512>}, {pipeline_mode = #tpu.pipeline_mode<synchronous>, transform_indices = @transform_2, window_bounds = array<i64: 4, 1>}, {pipeline_mode = #tpu.pipeline_mode<synchronous>, transform_indices = @transform_3, window_bounds = array<i64: 4, 1>}, {transform_indices = @transform_4, window_bounds = array<i64: 4, 512>}]} {
    %c0 = arith.constant 0 : index
    %c0_0 = arith.constant 0 : index
    %0 = vector.load %arg2[%c0, %c0_0] : memref<144x512xbf16, #tpu.memory_space<vmem>>, vector<144x512xbf16>
    %c0_1 = arith.constant 0 : index
    %c0_2 = arith.constant 0 : index
    %1 = vector.load %arg1[%c0_1, %c0_2] : memref<4x144xbf16, #tpu.memory_space<vmem>>, vector<4x144xbf16>
    %cst = arith.constant dense<0.000000e+00> : vector<4x512xf32>
    %2 = tpu.matmul %1, %0, %cst {dimension_numbers = #tpu.dot_dimension_numbers<[1], [0], [0], [1], [0, 0, 1, 1], [], []>} : vector<4x144xbf16>, vector<144x512xbf16>, vector<4x512xf32> -> vector<4x512xf32>
    %c0_3 = arith.constant 0 : index
    %c0_4 = arith.constant 0 : index
    %3 = vector.load %arg3[%c0_3, %c0_4] : memref<4x1xf32, #tpu.memory_space<vmem>>, vector<4x1xf32>
    %4 = vector.broadcast %3 : vector<4x1xf32> to vector<4x512xf32>
    %5 = arith.mulf %2, %4 : vector<4x512xf32>
    %c0_5 = arith.constant 0 : index
    %c0_6 = arith.constant 0 : index
    %6 = vector.load %arg4[%c0_5, %c0_6] : memref<4x1xf32, #tpu.memory_space<vmem>>, vector<4x1xf32>
    %7 = vector.broadcast %6 : vector<4x1xf32> to vector<4x512xf32>
    %8 = arith.addf %5, %7 : vector<4x512xf32>
    %c0_7 = arith.constant 0 : index
    %c0_8 = arith.constant 0 : index
    %9 = vector.load %arg5[%c0_7, %c0_8] : memref<4x512xf32, #tpu.memory_space<vmem>>, vector<4x512xf32>
    tpu.vector_store %arg5[%c0_7, %c0_8], %8 {strides = array<i32>} : memref<4x512xf32, #tpu.memory_space<vmem>>, vector<4x512xf32>,
    return
  }
  func.func @transform_0(%arg0: i32) -> (i32, i32) {
    %c0_i32 = arith.constant 0 : i32
    %c0_i32_0 = arith.constant 0 : i32
    %c0_i32_1 = arith.constant 0 : i32
    return %c0_i32, %c0_i32_0 : i32, i32
  }
  func.func @transform_1(%arg0: i32) -> (i32, i32) {
    %c0_i32 = arith.constant 0 : i32
    %c0_i32_0 = arith.constant 0 : i32
    return %c0_i32, %arg0 : i32, i32
  }
  func.func @transform_2(%arg0: i32) -> (i32, i32) {
    %c0_i32 = arith.constant 0 : i32
    %c0_i32_0 = arith.constant 0 : i32
    %c0_i32_1 = arith.constant 0 : i32
    return %c0_i32, %c0_i32_0 : i32, i32
  }
  func.func @transform_3(%arg0: i32) -> (i32, i32) {
    %c0_i32 = arith.constant 0 : i32
    %c0_i32_0 = arith.constant 0 : i32
    %c0_i32_1 = arith.constant 0 : i32
    return %c0_i32, %c0_i32_0 : i32, i32
  }
  func.func @transform_4(%arg0: i32) -> (i32, i32) {
    %c0_i32 = arith.constant 0 : i32
    %c0_i32_0 = arith.constant 0 : i32
    return %c0_i32, %arg0 : i32, i32
  }
}

module attributes {stable_mosaic.version = 11 : i64} {
  func.func @_conv_gemm_kernel(%arg0: i32, %arg1: memref<12x32xbf16, #tpu.memory_space<vmem>>, %arg2: memref<32x512xbf16, #tpu.memory_space<vmem>>, %arg3: memref<12x1xf32, #tpu.memory_space<vmem>>, %arg4: memref<12x1xf32, #tpu.memory_space<vmem>>, %arg5: memref<12x512xf32, #tpu.memory_space<vmem>>) attributes {dimension_semantics = [#tpu.dimension_semantics<parallel>], iteration_bounds = array<i64: 17>, scalar_prefetch = 0 : i64, scratch_operands = 0 : i64, tpu.core_type = #tpu.core_type<tc>, window_params = [{pipeline_mode = #tpu.pipeline_mode<synchronous>, transform_indices = @transform_0, window_bounds = array<i64: 12, 32>}, {transform_indices = @transform_1, window_bounds = array<i64: 32, 512>}, {pipeline_mode = #tpu.pipeline_mode<synchronous>, transform_indices = @transform_2, window_bounds = array<i64: 12, 1>}, {pipeline_mode = #tpu.pipeline_mode<synchronous>, transform_indices = @transform_3, window_bounds = array<i64: 12, 1>}, {transform_indices = @transform_4, window_bounds = array<i64: 12, 512>}]} {
    %c0 = arith.constant 0 : index
    %c0_0 = arith.constant 0 : index
    %0 = vector.load %arg2[%c0, %c0_0] : memref<32x512xbf16, #tpu.memory_space<vmem>>, vector<32x512xbf16>
    %cst = arith.constant 0.000000e+00 : bf16
    %1 = vector.broadcast %cst : bf16 to vector<32x512xbf16>
    %2 = arith.maximumf %0, %1 : vector<32x512xbf16>
    %c0_1 = arith.constant 0 : index
    %c0_2 = arith.constant 0 : index
    %3 = vector.load %arg1[%c0_1, %c0_2] : memref<12x32xbf16, #tpu.memory_space<vmem>>, vector<12x32xbf16>
    %cst_3 = arith.constant dense<0.000000e+00> : vector<12x512xf32>
    %4 = tpu.matmul %3, %2, %cst_3 {dimension_numbers = #tpu.dot_dimension_numbers<[1], [0], [0], [1], [0, 0, 1, 1], [], []>} : vector<12x32xbf16>, vector<32x512xbf16>, vector<12x512xf32> -> vector<12x512xf32>
    %c0_4 = arith.constant 0 : index
    %c0_5 = arith.constant 0 : index
    %5 = vector.load %arg3[%c0_4, %c0_5] : memref<12x1xf32, #tpu.memory_space<vmem>>, vector<12x1xf32>
    %6 = vector.broadcast %5 : vector<12x1xf32> to vector<12x512xf32>
    %7 = arith.mulf %4, %6 : vector<12x512xf32>
    %c0_6 = arith.constant 0 : index
    %c0_7 = arith.constant 0 : index
    %8 = vector.load %arg4[%c0_6, %c0_7] : memref<12x1xf32, #tpu.memory_space<vmem>>, vector<12x1xf32>
    %9 = vector.broadcast %8 : vector<12x1xf32> to vector<12x512xf32>
    %10 = arith.addf %7, %9 : vector<12x512xf32>
    %c0_8 = arith.constant 0 : index
    %c0_9 = arith.constant 0 : index
    %11 = vector.load %arg5[%c0_8, %c0_9] : memref<12x512xf32, #tpu.memory_space<vmem>>, vector<12x512xf32>
    tpu.vector_store %arg5[%c0_8, %c0_9], %10 {strides = array<i32>} : memref<12x512xf32, #tpu.memory_space<vmem>>, vector<12x512xf32>,
    return
  }
  func.func @transform_0(%arg0: i32) -> (i32, i32) {
    %c0_i32 = arith.constant 0 : i32
    %c0_i32_0 = arith.constant 0 : i32
    %c0_i32_1 = arith.constant 0 : i32
    return %c0_i32, %c0_i32_0 : i32, i32
  }
  func.func @transform_1(%arg0: i32) -> (i32, i32) {
    %c0_i32 = arith.constant 0 : i32
    %c0_i32_0 = arith.constant 0 : i32
    return %c0_i32, %arg0 : i32, i32
  }
  func.func @transform_2(%arg0: i32) -> (i32, i32) {
    %c0_i32 = arith.constant 0 : i32
    %c0_i32_0 = arith.constant 0 : i32
    %c0_i32_1 = arith.constant 0 : i32
    return %c0_i32, %c0_i32_0 : i32, i32
  }
  func.func @transform_3(%arg0: i32) -> (i32, i32) {
    %c0_i32 = arith.constant 0 : i32
    %c0_i32_0 = arith.constant 0 : i32
    %c0_i32_1 = arith.constant 0 : i32
    return %c0_i32, %c0_i32_0 : i32, i32
  }
  func.func @transform_4(%arg0: i32) -> (i32, i32) {
    %c0_i32 = arith.constant 0 : i32
    %c0_i32_0 = arith.constant 0 : i32
    return %c0_i32, %arg0 : i32, i32
  }
}

</mosaic_0001>

<bundles_post_ra>
// kernel: tile.8
= control target key start
LH: loop header
LB: loop body
LE: loop exit
PB: predicated region body
PF: predicated region fallthrough
CT: control target
= control target key end

     0   :  { %2 = vsyncpa [#allocation1], 0  ;;  %s44_s6 = smov [#allocation0]   ;;  %s70_s0 = inlined_call_operand.hbm [shape: f32[3], index: 0, kind: input, shape index: {}]   ;;  %s71_s1 = inlined_call_operand.vmem [shape: f32[4,3], index: 1, kind: output, shape index: {}]  }
   0x1   :  { %s9_s7 = sshll.u32 %s44_s6, 4  ;;  %s20_s10 = scalar_lea.hbm %s70_s0, 16  ;;  %s10_s7 = int_to_ptr.vmem [resolvable:$true] %s9_s7 }
   0x2   :  { %p21_p0 = scmp.ne.s32.totalorder %s70_s0, %s20_s10  ;;  %p24_p1 = scmp.lt.u32.totalorder %s20_s10, %s70_s0 }
   0x4   :  { %p26_p2 = pnand %p24_p1, %p21_p0 }
   0x6   :  { %29 = shalt.err (!%p26_p2)
}
   0x7   :  { %s30_s15 = scalar_lea.vmem %s10_s7, 16  ;;  %s34_s16 = scalar_lea.vmem %s10_s7, 32 }
   0x8   :  { %p31_p3 = scmp.ne.s32.totalorder %s10_s7, %s30_s15  ;;  %p35_p4 = scmp.lt.s32.totalorder %s10_s7, %s10_s7 }
   0x9   :  { %p36_p5 = scmp.lt.s32.totalorder %s34_s16, %s30_s15 }
   0xb   :  { %p37_p6 = por %p36_p5, %p35_p4 }
   0xd   :  { %p38_p7 = pnand %p37_p6, %p31_p3 }
   0xf   :  { %41 = shalt.err (!%p38_p7)
}
  0x10   :  { %12 = dma.hbm_to_vmem [thread:$0]  %s70_s0, 16, %s10_s7, [#allocation1]  }
  0x11   :  { %42 = dma.done.wait [#allocation1], 16  }
  0x12   :  { %43 = vsyncadd [#allocation1], 4294967280  ;;  %v16_v0 = vld [vmem:[#allocation0] ss:$0 sm:$0xff] }
  0x13   :  { %17 = vst [vmem:[%s71_s1] sm:$0xf] %v16_v0 }
  0x14   :  { %18 = vsyncpa [#allocation1], 1 }

// kernel: tile.0
= control target key start
LH: loop header
LB: loop body
LE: loop exit
PB: predicated region body
PF: predicated region fallthrough
CT: control target
= control target key end

     0   :  { %vm7_vm0 = vcmask 7168   ;;  %s26_s10 = smov 126   ;;  %s49_s0 = inlined_call_operand.vmem [shape: f32[4,3], index: 0, kind: input, shape index: {}]   ;;  %s50_s1 = inlined_call_operand.vmem [shape: f32[12,1], index: 1, kind: output, shape index: {}]  }
   0x1   :  { %v4_v0 = vld [vmem:[%s49_s0] sm:$0xf]  ;;  %s25_s0 = smov 127  }
   0x2   :  { %5 = vst [vmem:[#allocation0] sm:$0xf] %v4_v0 }
   0x9   :  { %v9_v1 = vld [vmem:[#allocation0] sm:$0xf]  }
   0xa   :  { %v6_v2 = vld [vmem:[#allocation0] sm:$0xf]   ;;  %10 = vrot.lane.b32.xlu0 %v9_v1, %s25_s0 }
   0xb   :  { %8 = vst.msk [vmem:[%s50_s1] ss:$3 sm:$0xf] %vm7_vm0, %v6_v2   ;;  %v15_v3 = vld [vmem:[#allocation0] sm:$0xf]  }
   0xe   :  { %16 = vrot.lane.b32.xlu0 %v15_v3, %s26_s10 }
  0x7c   :  { %v11_v4 = vpop.permute.xlu0 %10  }
  0x7d   :  { %21 = vst.msk [vmem:[%s50_s1 + $0x1] ss:$3 sm:$0xf] %vm7_vm0, %v11_v4  }
  0x80   :  { %v17_v5 = vpop.permute.xlu0 %16  }
  0x81   :  { %22 = vst.msk [vmem:[%s50_s1 + $0x2] ss:$3 sm:$0xf] %vm7_vm0, %v17_v5  }

// kernel: turbnet_forward.14
= control target key start
LH: loop header
LB: loop body
LE: loop exit
PB: predicated region body
PF: predicated region fallthrough
CT: control target
= control target key end

     0   :  { %s616_s15 = smov 0   ;;  %s618_s16 = smov 0   ;;  %s677_s0 = inlined_call_operand.vmem [shape: bf16[4,48], index: 0, kind: input, shape index: {}]   ;;  %s678_s1 = inlined_call_operand.vmem [shape: bf16[48,8192], index: 1, kind: input, shape index: {}]   ;;  %s679_s2 = inlined_call_operand.vmem [shape: f32[4,1], index: 2, kind: input, shape index: {}]   ;;  %s680_s3 = inlined_call_operand.vmem [shape: f32[4,1], index: 3, kind: input, shape index: {}]   ;;  %s681_s4 = inlined_call_operand.vmem [shape: f32[4,8192], index: 4, kind: output, shape index: {}]  }
   0x1   :  { %s620_s17 = smov 0  }
   0x2 LB: > { %s494_s18 = sadd.s32 4294967295, %s588_s17   ;;  %s633_s19 = sadd.s32 1, %s588_s17   ;;  %s588_s17 = sphi %s620_s17, %s684_s17   ;;  %s584_s16 = sphi %s618_s16, %s683_s16   ;;  %s580_s15 = sphi %s616_s15, %s682_s15  }
   0x3   : > { %s39_s20 = ssub.s32 %s588_s17, %s633_s19  ;;  %s42_s21 = sadd.s32 1, %s584_s16 }
   0x4   : > { %p40_p0 = scmp.eq.s32.totalorder %s39_s20, 0  ;;  %p49_p1 = scmp.ne.s32.totalorder %s584_s16, %s580_s15 }
   0x5   : > { %p50_p2 = scmp.eq.s32.totalorder %s588_s17, 0  ;;  %p497_p4 = scmp.ge.s32.totalorder %s588_s17, 16 }
   0x6   : > { %s642_s22 = scalar_select %p40_p0, %s584_s16, %s42_s21  }
   0x7   : > { %p51_p3 = por %p50_p2, %p49_p1  ;;  %152 = sbr.rel (%p497_p4) target bundleno = 24 (0x18), region = 28 }
   0xe   : > { %155 = sbr.rel (!%p51_p3) target bundleno = 24 (0x18), region = 32  ;;  %s157_s23 = sand.u32 (%p51_p3), 1, %s584_s16  }
   0xf   : > { %s519_s24 = sshll.u32 (%p51_p3), %s588_s17, 4  ;;  %s520_s25 = smul.u32 (%p51_p3), 96, %s157_s23 }
  0x10   : > { %s162_s28 = scalar_lea.vmem (%p51_p3), %s678_s1, %s519_s24 }
  0x11   : > { %v175_v0 = vld [vmem:[%s162_s28] sm:$0xff] (%p51_p3)  ;;  %v177_v1 = vld [vmem:[%s162_s28 + $0x8] sm:$0xff] (%p51_p3)  ;;  %s159_s29 = scalar_lea.vmem (%p51_p3), [#allocation2], %s520_s25 }
  0x12   : > { %v179_v2 = vld [vmem:[%s162_s28 + $0x100] sm:$0xff] (%p51_p3)  ;;  %v181_v3 = vld [vmem:[%s162_s28 + $0x108] sm:$0xff] (%p51_p3)  ;;  %176 = vst [vmem:[%s159_s29] sm:$0xff] (%p51_p3), %v175_v0  ;;  %178 = vst [vmem:[%s159_s29 + $0x8] sm:$0xff] (%p51_p3), %v177_v1 }
  0x13   : > { %v183_v4 = vld [vmem:[%s162_s28 + $0x200] sm:$0xff] (%p51_p3)  ;;  %v185_v5 = vld [vmem:[%s162_s28 + $0x208] sm:$0xff] (%p51_p3)  ;;  %180 = vst [vmem:[%s159_s29 + $0x10] sm:$0xff] (%p51_p3), %v179_v2  ;;  %182 = vst [vmem:[%s159_s29 + $0x18] sm:$0xff] (%p51_p3), %v181_v3 }
  0x14   : > { %184 = vst [vmem:[%s159_s29 + $0x20] sm:$0xff] (%p51_p3), %v183_v4  ;;  %186 = vst [vmem:[%s159_s29 + $0x28] sm:$0xff] (%p51_p3), %v185_v5  ;;  %v187_v6 = vld [vmem:[%s162_s28 + $0x300] sm:$0xff] (%p51_p3)  ;;  %v189_v7 = vld [vmem:[%s162_s28 + $0x308] sm:$0xff] (%p51_p3) }
  0x15   : > { %v191_v8 = vld [vmem:[%s162_s28 + $0x400] sm:$0xff]  ;;  %188 = vst [vmem:[%s159_s29 + $0x30] sm:$0xff] %v187_v6  ;;  %190 = vst [vmem:[%s159_s29 + $0x38] sm:$0xff] %v189_v7  ;;  %v193_v9 = vld [vmem:[%s162_s28 + $0x408] sm:$0xff] }
  0x16   : > { %192 = vst [vmem:[%s159_s29 + $0x40] sm:$0xff] %v191_v8  ;;  %v195_v10 = vld [vmem:[%s162_s28 + $0x500] sm:$0xff]  ;;  %v197_v11 = vld [vmem:[%s162_s28 + $0x508] sm:$0xff]  ;;  %194 = vst [vmem:[%s159_s29 + $0x48] sm:$0xff] %v193_v9 }
  0x17   : > { %196 = vst [vmem:[%s159_s29 + $0x50] sm:$0xff] %v195_v10  ;;  %198 = vst [vmem:[%s159_s29 + $0x58] sm:$0xff] %v197_v11 }
  0x18 PF: > { %p500_p5 = scmp.ge.s32.totalorder %s588_s17, 1  ;;  %p203_p6 = scmp.lt.s32.totalorder %s588_s17, 17 }
  0x1a   : > { %p204_p7 = pnand %p500_p5, %p203_p6 }
  0x1b   : > { %s210_s30 = sand.u32 (!%p204_p7), 1, %s580_s15   ;;  %v590_v12 = vmov (!%p204_p7), 0   ;;  %v402_v13 = vld [vmem:[%s679_s2] sm:$0xf] (!%p204_p7)  ;;  %vm316_vm0 = vcmask (!%p204_p7), 392192   ;;  %s501_s13 = sshll.u32 (!%p204_p7), %s494_s18, 2 }
  0x1c   : > { %207 = sbr.rel (%p204_p7) target bundleno = 266 (0x10a), region = 55  ;;  %352 = vmatprep.mubr.bf16.mxu0 (!%p204_p7), %v590_v12  ;;  %393 = vmatprep.mubr.bf16.mxu1 (!%p204_p7), %v590_v12  ;;  %v412_v14 = vld [vmem:[%s680_s3] sm:$0xf] (!%p204_p7)  ;;  %p237_p8 = scmp.lt.s32.totalorder (!%p204_p7), %s501_s13, 63 }
  0x1d   : > { %s521_s5 = smul.u32 (!%p204_p7), 96, %s210_s30  ;;  %547 = vset.pattern.permute.xlu0 (!%p204_p7), %v590_v12  ;;  %v255_v27 = vld [vmem:[%s677_s0] sm:$0x3] (!%p204_p7) }
  0x1e   : > { %405 = vperm.xlu0 (!%p204_p7), %547, %v402_v13  }
  0x1f   : > { %s212_s10 = scalar_lea.vmem (!%p204_p7), [#allocation2], %s521_s5 }
  0x20   : > { %v548_v15 = vld [vmem:[%s212_s10 + $0x4] ss:$16 sps:$4 sm:$0xff] (!%p204_p7)   ;;  %v550_v16 = vld [vmem:[%s212_s10 + $0xc] ss:$16 sps:$4 sm:$0xff] (!%p204_p7)   ;;  %v552_v17 = vld [vmem:[%s212_s10] ss:$16 sps:$4 sm:$0xff] (!%p204_p7)  }
  0x21   : > { %320 = vmatprep.subr.bf16.mxu0 (!%p204_p7), %v548_v15  ;;  %v553_v18 = vld [vmem:[%s212_s10 + $0x8] ss:$16 sps:$4 sm:$0xff] (!%p204_p7)   ;;  %361 = vmatprep.subr.bf16.mxu1 (!%p204_p7), %v550_v16  ;;  %v554_v19 = vld [vmem:[%s212_s10 + $0x24] ss:$16 sps:$4 sm:$0xff] (!%p204_p7)   ;;  %v556_v20 = vld [vmem:[%s212_s10 + $0x2c] ss:$16 sps:$4 sm:$0xff] (!%p204_p7)  }
  0x22   : > { %415 = vperm.xlu0 (!%p204_p7), %547, %v412_v14   ;;  %321 = vmatpush1.bf16.msra.mxu0 (!%p204_p7), %v552_v17  ;;  %v558_v21 = vld [vmem:[%s212_s10 + $0x20] ss:$16 sps:$4 sm:$0xff] (!%p204_p7)   ;;  %v559_v22 = vld [vmem:[%s212_s10 + $0x28] ss:$16 sps:$4 sm:$0xff] (!%p204_p7)   ;;  %v560_v23 = vld [vmem:[%s212_s10 + $0x44] ss:$16 sps:$4 sm:$0xff] (!%p204_p7)  }
  0x23   : > { %362 = vmatpush1.bf16.msra.mxu1 %v553_v18  ;;  %322 = vmatprep.subr.bf16.mxu0 %v554_v19  ;;  %v562_v24 = vld [vmem:[%s212_s10 + $0x4c] ss:$16 sps:$4 sm:$0xff]   ;;  %v564_v25 = vld [vmem:[%s212_s10 + $0x40] ss:$16 sps:$4 sm:$0xff]   ;;  %v565_v26 = vld [vmem:[%s212_s10 + $0x48] ss:$16 sps:$4 sm:$0xff]  }
  0x24   : > { %363 = vmatprep.subr.bf16.mxu1 %v556_v20  ;;  %s686_s13 = smov (!%p237_p8, %s501_s13), 63 }
  0x25   : > { %s502_s14 = sshll.u32 %s686_s13, 2 }
  0x26   : > { %323 = vmatpush1.bf16.msra.mxu0 %v558_v21  ;;  %s240_s18 = scalar_lea.vmem %s681_s4, %s502_s14 }
  0x27   : > { %364 = vmatpush1.bf16.msra.mxu1 %v559_v22  ;;  %324 = vmatprep.subr.bf16.mxu0 %v560_v23 }
  0x28   : > { %365 = vmatprep.subr.bf16.mxu1 %v562_v24 }
  0x2a   : > { %325 = vmatpush1.bf16.msra.mxu0 %v564_v25 }
  0x2b   : > { %366 = vmatpush1.bf16.msra.mxu1 %v565_v26 }
  0x2d   : > { %515 = vmatmul.mubr.msk.bf16.vlgmr.msra.gmra.mrb[0].mxu0 %vm316_vm0, %v255_v27 }
  0x2e   : > { %516 = vmatmul.mubr.msk.bf16.vlgmr.msra.gmra.mrb[0].mxu1 %vm316_vm0, %v255_v27 }
  0x9d   : > { %v406_v28 = vpop.permute.xlu0 %405 }
  0xa1   : > { %v416_v29 = vpop.permute.xlu0 %415 }
 0x100   : > { %v354_v30 = vpop.f32.mrb[0].mxu0 }
 0x101   : > { %v395_v31 = vpop.f32.mrb[0].mxu1  ;;  %v408_v32 = vmul.f32 %v406_v28, %v354_v30  ;;  %v356_v34 = vpop.f32.mrb[1].mxu0 }
 0x102   : > { %v410_v33 = vmul.f32 %v406_v28, %v395_v31  ;;  %v397_v35 = vpop.f32.mrb[1].mxu1  ;;  %v409_v36 = vmul.f32 %v406_v28, %v356_v34  ;;  %v358_v38 = vpop.f32.mrb[2].mxu0 }
 0x103   : > { %v411_v37 = vmul.f32 %v406_v28, %v397_v35  ;;  %v399_v39 = vpop.f32.mrb[2].mxu1  ;;  %v418_v40 = vadd.f32 %v416_v29, %v408_v32  ;;  %v359_v42 = vpop.f32.mrb[3].mxu0 }
 0x104   : > { %v420_v41 = vadd.f32 %v416_v29, %v410_v33  ;;  %v400_v43 = vpop.f32.mrb[3].mxu1  ;;  %v419_v44 = vadd.f32 %v416_v29, %v409_v36 }
 0x105   : > { %v421_v45 = vadd.f32 %v416_v29, %v411_v37 }
 0x106   : > { %v426_v46 = vcombine.low %v418_v40, %v419_v44 }
 0x107   : > { %v427_v47 = vcombine.low %v420_v41, %v421_v45 }
 0x108   : > { %430 = vst [vmem:[%s240_s18] sm:$0xff] %v426_v46 }
 0x109   : > { %431 = vst [vmem:[%s240_s18 + $0x8] sm:$0xff] %v427_v47 }
 0x10a PF: > { %p11_p9 = scmp.ge.s32.totalorder %s633_s19, 18   ;;  %s682_s15 = smov %s584_s16 }
 0x10b   : > { %s683_s16 = smov %s642_s22  ;;  %s684_s17 = smov %s633_s19 }
 0x10c   :  { %13 = sbr.rel (!%p11_p9) target bundleno = 2 (0x2), region = 94 }

// kernel: turbnet_forward.15
= control target key start
LH: loop header
LB: loop body
LE: loop exit
PB: predicated region body
PF: predicated region fallthrough
CT: control target
= control target key end

     0   :  { %s677_s15 = smov 0   ;;  %s679_s16 = smov 0   ;;  %s774_s0 = inlined_call_operand.vmem [shape: bf16[8,64], index: 0, kind: input, shape index: {}]   ;;  %s775_s1 = inlined_call_operand.vmem [shape: bf16[64,2048], index: 1, kind: input, shape index: {}]   ;;  %s776_s2 = inlined_call_operand.vmem [shape: f32[8,1], index: 2, kind: input, shape index: {}]   ;;  %s777_s3 = inlined_call_operand.vmem [shape: f32[8,1], index: 3, kind: input, shape index: {}]   ;;  %s778_s4 = inlined_call_operand.vmem [shape: f32[8,2048], index: 4, kind: output, shape index: {}]  }
   0x1   :  { %s681_s17 = smov 0  }
   0x2 LB: > { %s569_s18 = sadd.s32 4294967295, %s649_s17   ;;  %s694_s19 = sadd.s32 1, %s649_s17   ;;  %s649_s17 = sphi %s681_s17, %s781_s17   ;;  %s645_s16 = sphi %s679_s16, %s780_s16   ;;  %s641_s15 = sphi %s677_s15, %s779_s15  }
   0x3   : > { %s39_s20 = ssub.s32 %s649_s17, %s694_s19  ;;  %s42_s21 = sadd.s32 1, %s645_s16 }
   0x4   : > { %p40_p0 = scmp.eq.s32.totalorder %s39_s20, 0  ;;  %p49_p1 = scmp.ne.s32.totalorder %s645_s16, %s641_s15 }
   0x5   : > { %p50_p2 = scmp.eq.s32.totalorder %s649_s17, 0  ;;  %p572_p4 = scmp.ge.s32.totalorder %s649_s17, 4 }
   0x6   : > { %s703_s22 = scalar_select %p40_p0, %s645_s16, %s42_s21  }
   0x7   : > { %p51_p3 = por %p50_p2, %p49_p1  ;;  %152 = sbr.rel (%p572_p4) target bundleno = 26 (0x1a), region = 28 }
   0xe   : > { %155 = sbr.rel (!%p51_p3) target bundleno = 26 (0x1a), region = 32  ;;  %s157_s23 = sand.u32 (%p51_p3), 1, %s645_s16  }
   0xf   : > { %s600_s24 = sshll.u32 (%p51_p3), %s649_s17, 4  ;;  %s573_s25 = sshll.u32 (%p51_p3), %s157_s23, 7 }
  0x10   : > { %s711_s28 = scalar_lea.vmem (%p51_p3), %s775_s1, %s600_s24  ;;  %s159_s29 = scalar_lea.vmem (%p51_p3), [#allocation2], %s573_s25 }
  0x11   : > { %v175_v0 = vld [vmem:[%s711_s28] sm:$0xff] (%p51_p3)  ;;  %v177_v1 = vld [vmem:[%s711_s28 + $0x8] sm:$0xff] (%p51_p3) }
  0x12   : > { %v179_v2 = vld [vmem:[%s711_s28 + $0x40] sm:$0xff] (%p51_p3)  ;;  %176 = vst [vmem:[%s159_s29] sm:$0xff] (%p51_p3), %v175_v0  ;;  %178 = vst [vmem:[%s159_s29 + $0x8] sm:$0xff] (%p51_p3), %v177_v1  ;;  %v181_v3 = vld [vmem:[%s711_s28 + $0x48] sm:$0xff] (%p51_p3) }
  0x13   : > { %180 = vst [vmem:[%s159_s29 + $0x10] sm:$0xff] (%p51_p3), %v179_v2  ;;  %v183_v4 = vld [vmem:[%s711_s28 + $0x80] sm:$0xff] (%p51_p3)  ;;  %v185_v5 = vld [vmem:[%s711_s28 + $0x88] sm:$0xff] (%p51_p3)  ;;  %182 = vst [vmem:[%s159_s29 + $0x18] sm:$0xff] (%p51_p3), %v181_v3 }
  0x14   : > { %184 = vst [vmem:[%s159_s29 + $0x20] sm:$0xff] (%p51_p3), %v183_v4  ;;  %186 = vst [vmem:[%s159_s29 + $0x28] sm:$0xff] (%p51_p3), %v185_v5  ;;  %v187_v6 = vld [vmem:[%s711_s28 + $0xc0] sm:$0xff] (%p51_p3)  ;;  %v189_v7 = vld [vmem:[%s711_s28 + $0xc8] sm:$0xff] (%p51_p3) }
  0x15   : > { %v191_v8 = vld [vmem:[%s711_s28 + $0x100] sm:$0xff]  ;;  %188 = vst [vmem:[%s159_s29 + $0x30] sm:$0xff] %v187_v6  ;;  %190 = vst [vmem:[%s159_s29 + $0x38] sm:$0xff] %v189_v7  ;;  %v193_v9 = vld [vmem:[%s711_s28 + $0x108] sm:$0xff] }
  0x16   : > { %192 = vst [vmem:[%s159_s29 + $0x40] sm:$0xff] %v191_v8  ;;  %v195_v10 = vld [vmem:[%s711_s28 + $0x140] sm:$0xff]  ;;  %v197_v11 = vld [vmem:[%s711_s28 + $0x148] sm:$0xff]  ;;  %194 = vst [vmem:[%s159_s29 + $0x48] sm:$0xff] %v193_v9 }
  0x17   : > { %196 = vst [vmem:[%s159_s29 + $0x50] sm:$0xff] %v195_v10  ;;  %198 = vst [vmem:[%s159_s29 + $0x58] sm:$0xff] %v197_v11  ;;  %v199_v12 = vld [vmem:[%s711_s28 + $0x180] sm:$0xff]  ;;  %v201_v13 = vld [vmem:[%s711_s28 + $0x188] sm:$0xff] }
  0x18   : > { %v203_v14 = vld [vmem:[%s711_s28 + $0x1c0] sm:$0xff]  ;;  %200 = vst [vmem:[%s159_s29 + $0x60] sm:$0xff] %v199_v12  ;;  %202 = vst [vmem:[%s159_s29 + $0x68] sm:$0xff] %v201_v13  ;;  %v205_v15 = vld [vmem:[%s711_s28 + $0x1c8] sm:$0xff] }
  0x19   : > { %204 = vst [vmem:[%s159_s29 + $0x70] sm:$0xff] %v203_v14  ;;  %206 = vst [vmem:[%s159_s29 + $0x78] sm:$0xff] %v205_v15 }
  0x1a PF: > { %p576_p5 = scmp.ge.s32.totalorder %s649_s17, 1  ;;  %p211_p6 = scmp.lt.s32.totalorder %s649_s17, 5 }
  0x1c   : > { %p212_p7 = pnand %p576_p5, %p211_p6 }
  0x1d   : > { %s218_s30 = sand.u32 (!%p212_p7), 1, %s641_s15   ;;  %v483_v16 = vld [vmem:[%s776_s2] sm:$0xff] (!%p212_p7)  ;;  %v651_v17 = vmov (!%p212_p7), 0   ;;  %s578_s13 = sshll.u32 (!%p212_p7), %s569_s18, 2 }
  0x1e   : > { %215 = sbr.rel (%p212_p7) target bundleno = 274 (0x112), region = 55  ;;  %s577_s7 = sshll.u32 (!%p212_p7), %s218_s30, 7  ;;  %433 = vmatprep.mubr.bf16.mxu0 (!%p212_p7), %v651_v17  ;;  %474 = vmatprep.mubr.bf16.mxu1 (!%p212_p7), %v651_v17  ;;  %v493_v18 = vld [vmem:[%s777_s3] sm:$0xff] (!%p212_p7) }
  0x1f   : > { %626 = vset.pattern.permute.xlu0 (!%p212_p7), %v651_v17  ;;  %s738_s10 = scalar_lea.vmem (!%p212_p7), [#allocation2], %s577_s7  ;;  %p245_p8 = scmp.lt.s32.totalorder (!%p212_p7), %s578_s13, 15 }
  0x20   : > { %v252_v19 = vld [vmem:[%s738_s10] sm:$0xff] (!%p212_p7)  ;;  %v254_v20 = vld [vmem:[%s738_s10 + $0x10] sm:$0xff] (!%p212_p7)  ;;  %v253_v21 = vld [vmem:[%s738_s10 + $0x8] sm:$0xff] (!%p212_p7)  ;;  %486 = vperm.xlu0 (!%p212_p7), %626, %v483_v16  }
  0x21   : > { %vm268_vm0 = vcmp.gt.bf16.partialorder (!%p212_p7), %v252_v19, 0  ;;  %vm270_vm1 = vcmp.gt.bf16.partialorder (!%p212_p7), %v254_v20, 0  ;;  %v284_v22 = vmul.bf16 (!%p212_p7), 1045249613, %v252_v19  ;;  %v286_v23 = vmul.bf16 (!%p212_p7), 1045249613, %v254_v20 }
  0x22   : > { %v255_v24 = vld [vmem:[%s738_s10 + $0x18] sm:$0xff] (!%p212_p7)  ;;  %vm269_vm2 = vcmp.gt.bf16.partialorder (!%p212_p7), %v253_v21, 0  ;;  %v285_v25 = vmul.bf16 (!%p212_p7), 1045249613, %v253_v21  ;;  %v256_v26 = vld [vmem:[%s738_s10 + $0x20] sm:$0xff] (!%p212_p7)  ;;  %v258_v27 = vld [vmem:[%s738_s10 + $0x30] sm:$0xff] (!%p212_p7) }
  0x23   : > { %v300_v28 = vsel (!%p212_p7), %vm268_vm0, %v252_v19, %v284_v22  ;;  %v302_v29 = vsel (!%p212_p7), %vm270_vm1, %v254_v20, %v286_v23  ;;  %vm271_vm3 = vcmp.gt.bf16.partialorder (!%p212_p7), %v255_v24, 0  ;;  %v287_v30 = vmul.bf16 (!%p212_p7), 1045249613, %v255_v24  ;;  %v257_v31 = vld [vmem:[%s738_s10 + $0x28] sm:$0xff] (!%p212_p7)  ;;  %v259_v32 = vld [vmem:[%s738_s10 + $0x38] sm:$0xff] (!%p212_p7)  ;;  %v260_v36 = vld [vmem:[%s738_s10 + $0x40] sm:$0xff] (!%p212_p7) }
  0x24   : > { %v581_v33 = vcombine.high (!%p212_p7), %v300_v28, %v302_v29  ;;  %v301_v34 = vsel (!%p212_p7), %vm269_vm2, %v253_v21, %v285_v25  ;;  %v580_v35 = vcombine.low (!%p212_p7), %v300_v28, %v302_v29  ;;  %vm272_vm4 = vcmp.gt.bf16.partialorder (!%p212_p7), %v256_v26, 0  ;;  %496 = vperm.xlu0 (!%p212_p7), %626, %v493_v18   ;;  %v262_v40 = vld [vmem:[%s738_s10 + $0x50] sm:$0xff] (!%p212_p7)  ;;  %v261_v47 = vld [vmem:[%s738_s10 + $0x48] sm:$0xff] (!%p212_p7)  ;;  %v263_v48 = vld [vmem:[%s738_s10 + $0x58] sm:$0xff] (!%p212_p7) }
  0x25   : > { %v303_v37 = vsel %vm271_vm3, %v255_v24, %v287_v30  ;;  %vm274_vm5 = vcmp.gt.bf16.partialorder %v258_v27, 0  ;;  %v288_v38 = vmul.bf16 1045249613, %v256_v26  ;;  %v290_v39 = vmul.bf16 1045249613, %v258_v27  ;;  %v264_v55 = vld [vmem:[%s738_s10 + $0x60] sm:$0xff] }
  0x26   : > { %401 = vmatprep.subr.bf16.mxu0 %v581_v33  ;;  %v583_v41 = vcombine.high %v301_v34, %v303_v37  ;;  %v582_v42 = vcombine.low %v301_v34, %v303_v37  ;;  %vm273_vm6 = vcmp.gt.bf16.partialorder %v257_v31, 0  ;;  %vm275_vm7 = vcmp.gt.bf16.partialorder %v259_v32, 0  ;;  %v266_v56 = vld [vmem:[%s738_s10 + $0x70] sm:$0xff]  ;;  %v265_v63 = vld [vmem:[%s738_s10 + $0x68] sm:$0xff]  ;;  %v267_v0 = vld [vmem:[%s738_s10 + $0x78] sm:$0xff]  ;;  %s783_s13 = smov (!%p245_p8, %s578_s13), 15 }
  0x27   : > { %402 = vmatpush1.bf16.msra.mxu0 %v580_v35  ;;  %v304_v43 = vsel %vm272_vm4, %v256_v26, %v288_v38  ;;  %v306_v44 = vsel %vm274_vm5, %v258_v27, %v290_v39  ;;  %v289_v45 = vmul.bf16 1045249613, %v257_v31  ;;  %v291_v46 = vmul.bf16 1045249613, %v259_v32  ;;  %v316_v19 = vld [vmem:[%s774_s0] sm:$0xf] }
  0x28   : > { %442 = vmatprep.subr.bf16.mxu1 %v583_v41  ;;  %v585_v49 = vcombine.high %v304_v43, %v306_v44  ;;  %v584_v50 = vcombine.low %v304_v43, %v306_v44  ;;  %vm276_vm8 = vcmp.gt.bf16.partialorder %v260_v36, 0  ;;  %vm278_vm9 = vcmp.gt.bf16.partialorder %v262_v40, 0  ;;  %s579_s14 = sshll.u32 %s783_s13, 3 }
  0x29   : > { %443 = vmatpush1.bf16.msra.mxu1 %v582_v42  ;;  %v305_v51 = vsel %vm273_vm6, %v257_v31, %v289_v45  ;;  %v307_v52 = vsel %vm275_vm7, %v259_v32, %v291_v46  ;;  %v292_v53 = vmul.bf16 1045249613, %v260_v36  ;;  %v294_v54 = vmul.bf16 1045249613, %v262_v40  ;;  %s248_s21 = scalar_lea.vmem %s778_s4, %s579_s14 }
  0x2a   : > { %403 = vmatprep.subr.bf16.mxu0 %v585_v49  ;;  %v587_v57 = vcombine.high %v305_v51, %v307_v52  ;;  %v586_v58 = vcombine.low %v305_v51, %v307_v52  ;;  %vm277_vm10 = vcmp.gt.bf16.partialorder %v261_v47, 0  ;;  %vm279_vm11 = vcmp.gt.bf16.partialorder %v263_v48, 0 }
  0x2b   : > { %404 = vmatpush1.bf16.msra.mxu0 %v584_v50  ;;  %v308_v59 = vsel %vm276_vm8, %v260_v36, %v292_v53  ;;  %v310_v60 = vsel %vm278_vm9, %v262_v40, %v294_v54  ;;  %v293_v61 = vmul.bf16 1045249613, %v261_v47  ;;  %v295_v62 = vmul.bf16 1045249613, %v263_v48 }
  0x2c   : > { %444 = vmatprep.subr.bf16.mxu1 %v587_v57  ;;  %v589_v1 = vcombine.high %v308_v59, %v310_v60  ;;  %v588_v2 = vcombine.low %v308_v59, %v310_v60  ;;  %vm280_vm12 = vcmp.gt.bf16.partialorder %v264_v55, 0  ;;  %vm282_vm13 = vcmp.gt.bf16.partialorder %v266_v56, 0 }
  0x2d   : > { %445 = vmatpush1.bf16.msra.mxu1 %v586_v58  ;;  %v309_v3 = vsel %vm277_vm10, %v261_v47, %v293_v61  ;;  %v311_v4 = vsel %vm279_vm11, %v263_v48, %v295_v62  ;;  %v296_v5 = vmul.bf16 1045249613, %v264_v55  ;;  %v298_v6 = vmul.bf16 1045249613, %v266_v56 }
  0x2e   : > { %405 = vmatprep.subr.bf16.mxu0 %v589_v1  ;;  %v591_v7 = vcombine.high %v309_v3, %v311_v4  ;;  %v590_v8 = vcombine.low %v309_v3, %v311_v4  ;;  %vm281_vm14 = vcmp.gt.bf16.partialorder %v265_v63, 0  ;;  %vm283_vm15 = vcmp.gt.bf16.partialorder %v267_v0, 0 }
  0x2f   : > { %406 = vmatpush1.bf16.msra.mxu0 %v588_v2  ;;  %v312_v9 = vsel %vm280_vm12, %v264_v55, %v296_v5  ;;  %v314_v10 = vsel %vm282_vm13, %v266_v56, %v298_v6  ;;  %v297_v11 = vmul.bf16 1045249613, %v265_v63  ;;  %v299_v12 = vmul.bf16 1045249613, %v267_v0 }
  0x30   : > { %446 = vmatprep.subr.bf16.mxu1 %v591_v7  ;;  %v593_v13 = vcombine.high %v312_v9, %v314_v10  ;;  %v592_v14 = vcombine.low %v312_v9, %v314_v10  ;;  %vm397_vm0 = vcmask 523264  }
  0x31   : > { %447 = vmatpush1.bf16.msra.mxu1 %v590_v8  ;;  %v313_v15 = vsel %vm281_vm14, %v265_v63, %v297_v11  ;;  %v315_v16 = vsel %vm283_vm15, %v267_v0, %v299_v12 }
  0x32   : > { %407 = vmatprep.subr.bf16.mxu0 %v593_v13  ;;  %v595_v17 = vcombine.high %v313_v15, %v315_v16  ;;  %v594_v18 = vcombine.low %v313_v15, %v315_v16 }
  0x33   : > { %408 = vmatpush1.bf16.msra.mxu0 %v592_v14 }
  0x34   : > { %448 = vmatprep.subr.bf16.mxu1 %v595_v17 }
  0x35   : > { %449 = vmatpush1.bf16.msra.mxu1 %v594_v18 }
  0x36   : > { %596 = vmatmul.mubr.msk.bf16.vlgmr.msra.gmra.mrb[0].mxu0 %vm397_vm0, %v316_v19 }
  0x38   : > { %597 = vmatmul.mubr.msk.bf16.vlgmr.msra.gmra.mrb[0].mxu1 %vm397_vm0, %v316_v19 }
  0x9f   : > { %v487_v20 = vpop.permute.xlu0 %486 }
  0xa3   : > { %v497_v22 = vpop.permute.xlu0 %496 }
 0x109   : > { %v435_v21 = vpop.f32.mrb[0].mxu0 }
 0x10a   : > { %v489_v23 = vmul.f32 %v487_v20, %v435_v21  ;;  %v437_v24 = vpop.f32.mrb[1].mxu0 }
 0x10b   : > { %v476_v25 = vpop.f32.mrb[0].mxu1  ;;  %v490_v26 = vmul.f32 %v487_v20, %v437_v24  ;;  %v439_v27 = vpop.f32.mrb[2].mxu0 }
 0x10c   : > { %v499_v28 = vadd.f32 %v497_v22, %v489_v23  ;;  %v491_v29 = vmul.f32 %v487_v20, %v476_v25  ;;  %v478_v30 = vpop.f32.mrb[1].mxu1  ;;  %v440_v31 = vpop.f32.mrb[3].mxu0 }
 0x10d   : > { %v500_v32 = vadd.f32 %v497_v22, %v490_v26  ;;  %v492_v33 = vmul.f32 %v487_v20, %v478_v30  ;;  %v480_v34 = vpop.f32.mrb[2].mxu1 }
 0x10e   : > { %503 = vst [vmem:[%s248_s21] sm:$0xff] %v499_v28  ;;  %v501_v35 = vadd.f32 %v497_v22, %v491_v29  ;;  %v481_v36 = vpop.f32.mrb[3].mxu1 }
 0x10f   : > { %504 = vst [vmem:[%s248_s21 + $0x8] sm:$0xff] %v500_v32  ;;  %v502_v37 = vadd.f32 %v497_v22, %v492_v33 }
 0x110   : > { %505 = vst [vmem:[%s248_s21 + $0x10] sm:$0xff] %v501_v35 }
 0x111   : > { %506 = vst [vmem:[%s248_s21 + $0x18] sm:$0xff] %v502_v37 }
 0x112 PF: > { %p11_p9 = scmp.ge.s32.totalorder %s694_s19, 6   ;;  %s779_s15 = smov %s645_s16 }
 0x113   : > { %s780_s16 = smov %s703_s22  ;;  %s781_s17 = smov %s694_s19 }
 0x114   :  { %13 = sbr.rel (!%p11_p9) target bundleno = 2 (0x2), region = 94 }

// kernel: turbnet_forward.16
= control target key start
LH: loop header
LB: loop body
LE: loop exit
PB: predicated region body
PF: predicated region fallthrough
CT: control target
= control target key end

     0   :  { %s669_s15 = smov 0   ;;  %s671_s16 = smov 0   ;;  %s766_s0 = inlined_call_operand.vmem [shape: bf16[8,128], index: 0, kind: input, shape index: {}]   ;;  %s767_s1 = inlined_call_operand.vmem [shape: bf16[128,512], index: 1, kind: input, shape index: {}]   ;;  %s768_s2 = inlined_call_operand.vmem [shape: f32[8,1], index: 2, kind: input, shape index: {}]   ;;  %s769_s3 = inlined_call_operand.vmem [shape: f32[8,1], index: 3, kind: input, shape index: {}]   ;;  %s770_s4 = inlined_call_operand.vmem [shape: f32[8,512], index: 4, kind: output, shape index: {}]  }
   0x1   :  { %s673_s17 = smov 0  }
   0x2 LB: > { %s563_s18 = sadd.s32 4294967295, %s641_s17   ;;  %s686_s19 = sadd.s32 1, %s641_s17   ;;  %s641_s17 = sphi %s673_s17, %s773_s17   ;;  %s637_s16 = sphi %s671_s16, %s772_s16   ;;  %s633_s15 = sphi %s669_s15, %s771_s15  }
   0x3   : > { %s39_s20 = ssub.s32 %s641_s17, %s686_s19  ;;  %s42_s21 = sadd.s32 1, %s637_s16 }
   0x4   : > { %p40_p0 = scmp.eq.s32.totalorder %s39_s20, 0  ;;  %p49_p1 = scmp.ne.s32.totalorder %s637_s16, %s633_s15 }
   0x5   : > { %p50_p2 = scmp.eq.s32.totalorder %s641_s17, 0  ;;  %p566_p4 = scmp.ge.s32.totalorder %s641_s17, 2 }
   0x6   : > { %s695_s22 = scalar_select %p40_p0, %s637_s16, %s42_s21  }
   0x7   : > { %p51_p3 = por %p50_p2, %p49_p1  ;;  %152 = sbr.rel (%p566_p4) target bundleno = 26 (0x1a), region = 28 }
   0xe   : > { %155 = sbr.rel (!%p51_p3) target bundleno = 26 (0x1a), region = 32  ;;  %s157_s23 = sand.u32 (%p51_p3), 1, %s637_s16  }
   0xf   : > { %s592_s24 = sshll.u32 (%p51_p3), %s641_s17, 3  ;;  %s567_s25 = sshll.u32 (%p51_p3), %s157_s23, 7 }
  0x10   : > { %s703_s28 = scalar_lea.vmem (%p51_p3), %s767_s1, %s592_s24  ;;  %s159_s29 = scalar_lea.vmem (%p51_p3), [#allocation2], %s567_s25 }
  0x11   : > { %v220_v0 = vld [vmem:[%s703_s28] sm:$0xff] (%p51_p3)  ;;  %v222_v1 = vld [vmem:[%s703_s28 + $0x10] sm:$0xff] (%p51_p3) }
  0x12   : > { %v224_v2 = vld [vmem:[%s703_s28 + $0x20] sm:$0xff] (%p51_p3)  ;;  %221 = vst [vmem:[%s159_s29] sm:$0xff] (%p51_p3), %v220_v0  ;;  %223 = vst [vmem:[%s159_s29 + $0x8] sm:$0xff] (%p51_p3), %v222_v1  ;;  %v226_v3 = vld [vmem:[%s703_s28 + $0x30] sm:$0xff] (%p51_p3) }
  0x13   : > { %225 = vst [vmem:[%s159_s29 + $0x10] sm:$0xff] (%p51_p3), %v224_v2  ;;  %v228_v4 = vld [vmem:[%s703_s28 + $0x40] sm:$0xff] (%p51_p3)  ;;  %v230_v5 = vld [vmem:[%s703_s28 + $0x50] sm:$0xff] (%p51_p3)  ;;  %227 = vst [vmem:[%s159_s29 + $0x18] sm:$0xff] (%p51_p3), %v226_v3 }
  0x14   : > { %229 = vst [vmem:[%s159_s29 + $0x20] sm:$0xff] (%p51_p3), %v228_v4  ;;  %231 = vst [vmem:[%s159_s29 + $0x28] sm:$0xff] (%p51_p3), %v230_v5  ;;  %v232_v6 = vld [vmem:[%s703_s28 + $0x60] sm:$0xff] (%p51_p3)  ;;  %v234_v7 = vld [vmem:[%s703_s28 + $0x70] sm:$0xff] (%p51_p3) }
  0x15   : > { %v236_v8 = vld [vmem:[%s703_s28 + $0x80] sm:$0xff]  ;;  %233 = vst [vmem:[%s159_s29 + $0x30] sm:$0xff] %v232_v6  ;;  %235 = vst [vmem:[%s159_s29 + $0x38] sm:$0xff] %v234_v7  ;;  %v238_v9 = vld [vmem:[%s703_s28 + $0x90] sm:$0xff] }
  0x16   : > { %237 = vst [vmem:[%s159_s29 + $0x40] sm:$0xff] %v236_v8  ;;  %v240_v10 = vld [vmem:[%s703_s28 + $0xa0] sm:$0xff]  ;;  %v242_v11 = vld [vmem:[%s703_s28 + $0xb0] sm:$0xff]  ;;  %239 = vst [vmem:[%s159_s29 + $0x48] sm:$0xff] %v238_v9 }
  0x17   : > { %241 = vst [vmem:[%s159_s29 + $0x50] sm:$0xff] %v240_v10  ;;  %243 = vst [vmem:[%s159_s29 + $0x58] sm:$0xff] %v242_v11  ;;  %v244_v12 = vld [vmem:[%s703_s28 + $0xc0] sm:$0xff]  ;;  %v246_v13 = vld [vmem:[%s703_s28 + $0xd0] sm:$0xff] }
  0x18   : > { %v248_v14 = vld [vmem:[%s703_s28 + $0xe0] sm:$0xff]  ;;  %245 = vst [vmem:[%s159_s29 + $0x60] sm:$0xff] %v244_v12  ;;  %247 = vst [vmem:[%s159_s29 + $0x68] sm:$0xff] %v246_v13  ;;  %v250_v15 = vld [vmem:[%s703_s28 + $0xf0] sm:$0xff] }
  0x19   : > { %249 = vst [vmem:[%s159_s29 + $0x70] sm:$0xff] %v248_v14  ;;  %251 = vst [vmem:[%s159_s29 + $0x78] sm:$0xff] %v250_v15 }
  0x1a PF: > { %p570_p5 = scmp.ge.s32.totalorder %s641_s17, 1  ;;  %p256_p6 = scmp.lt.s32.totalorder %s641_s17, 3 }
  0x1c   : > { %p257_p7 = pnand %p570_p5, %p256_p6 }
  0x1d   : > { %s263_s30 = sand.u32 (!%p257_p7), 1, %s633_s15   ;;  %v483_v16 = vld [vmem:[%s768_s2] sm:$0xff] (!%p257_p7)  ;;  %v643_v17 = vmov (!%p257_p7), 0   ;;  %s572_s13 = sshll.u32 (!%p257_p7), %s563_s18, 1 }
  0x1e   : > { %260 = sbr.rel (%p257_p7) target bundleno = 288 (0x120), region = 70  ;;  %s571_s7 = sshll.u32 (!%p257_p7), %s263_s30, 7  ;;  %474 = vmatprep.mubr.bf16.mxu0 (!%p257_p7), %v643_v17  ;;  %618 = vset.pattern.permute.xlu0 (!%p257_p7), %v643_v17  ;;  %v491_v18 = vld [vmem:[%s769_s3] sm:$0xff] (!%p257_p7) }
  0x1f   : > { %486 = vperm.xlu0 (!%p257_p7), %618, %v483_v16   ;;  %s730_s10 = scalar_lea.vmem (!%p257_p7), [#allocation2], %s571_s7  ;;  %p290_p8 = scmp.lt.s32.totalorder (!%p257_p7), %s572_s13, 3 }
  0x20   : > { %v297_v19 = vld [vmem:[%s730_s10] sm:$0xff] (!%p257_p7)  ;;  %v298_v20 = vld [vmem:[%s730_s10 + $0x8] sm:$0xff] (!%p257_p7)  ;;  %v299_v21 = vld [vmem:[%s730_s10 + $0x10] sm:$0xff] (!%p257_p7) }
  0x21   : > { %vm313_vm0 = vcmp.gt.bf16.partialorder (!%p257_p7), %v297_v19, 0  ;;  %vm314_vm1 = vcmp.gt.bf16.partialorder (!%p257_p7), %v298_v20, 0  ;;  %v329_v22 = vmul.bf16 (!%p257_p7), 1045249613, %v297_v19  ;;  %v330_v23 = vmul.bf16 (!%p257_p7), 1045249613, %v298_v20 }
  0x22   : > { %v300_v24 = vld [vmem:[%s730_s10 + $0x18] sm:$0xff] (!%p257_p7)  ;;  %vm315_vm2 = vcmp.gt.bf16.partialorder (!%p257_p7), %v299_v21, 0  ;;  %v331_v25 = vmul.bf16 (!%p257_p7), 1045249613, %v299_v21  ;;  %v301_v26 = vld [vmem:[%s730_s10 + $0x20] sm:$0xff] (!%p257_p7)  ;;  %v302_v27 = vld [vmem:[%s730_s10 + $0x28] sm:$0xff] (!%p257_p7) }
  0x23   : > { %v345_v28 = vsel (!%p257_p7), %vm313_vm0, %v297_v19, %v329_v22  ;;  %v346_v29 = vsel (!%p257_p7), %vm314_vm1, %v298_v20, %v330_v23  ;;  %vm316_vm3 = vcmp.gt.bf16.partialorder (!%p257_p7), %v300_v24, 0  ;;  %v332_v30 = vmul.bf16 (!%p257_p7), 1045249613, %v300_v24  ;;  %v303_v31 = vld [vmem:[%s730_s10 + $0x30] sm:$0xff] (!%p257_p7)  ;;  %v304_v32 = vld [vmem:[%s730_s10 + $0x38] sm:$0xff] (!%p257_p7)  ;;  %494 = vperm.xlu0 (!%p257_p7), %618, %v491_v18   ;;  %v305_v41 = vld [vmem:[%s730_s10 + $0x40] sm:$0xff] (!%p257_p7) }
  0x24   : > { %v575_v33 = vcombine.high (!%p257_p7), %v345_v28, %v346_v29  ;;  %v574_v34 = vcombine.low (!%p257_p7), %v345_v28, %v346_v29  ;;  %v347_v35 = vsel (!%p257_p7), %vm315_vm2, %v299_v21, %v331_v25  ;;  %vm317_vm4 = vcmp.gt.bf16.partialorder (!%p257_p7), %v301_v26, 0  ;;  %v306_v42 = vld [vmem:[%s730_s10 + $0x48] sm:$0xff] (!%p257_p7)  ;;  %v307_v52 = vld [vmem:[%s730_s10 + $0x50] sm:$0xff] (!%p257_p7)  ;;  %v308_v53 = vld [vmem:[%s730_s10 + $0x58] sm:$0xff] (!%p257_p7) }
  0x25   : > { %v348_v36 = vsel %vm316_vm3, %v300_v24, %v332_v30  ;;  %vm318_vm5 = vcmp.gt.bf16.partialorder %v302_v27, 0  ;;  %v333_v37 = vmul.bf16 1045249613, %v301_v26  ;;  %v334_v38 = vmul.bf16 1045249613, %v302_v27  ;;  %v309_v60 = vld [vmem:[%s730_s10 + $0x60] sm:$0xff] }
  0x26   : > { %442 = vmatprep.subr.bf16.mxu0 %v575_v33  ;;  %v577_v39 = vcombine.high %v347_v35, %v348_v36  ;;  %v576_v40 = vcombine.low %v347_v35, %v348_v36  ;;  %vm319_vm6 = vcmp.gt.bf16.partialorder %v303_v31, 0  ;;  %vm320_vm7 = vcmp.gt.bf16.partialorder %v304_v32, 0  ;;  %v310_v61 = vld [vmem:[%s730_s10 + $0x68] sm:$0xff]  ;;  %v311_v4 = vld [vmem:[%s730_s10 + $0x70] sm:$0xff]  ;;  %v312_v5 = vld [vmem:[%s730_s10 + $0x78] sm:$0xff]  ;;  %s775_s13 = smov (!%p290_p8, %s572_s13), 3 }
  0x27   : > { %443 = vmatpush1.bf16.msra.mxu0 %v574_v34  ;;  %v349_v43 = vsel %vm317_vm4, %v301_v26, %v333_v37  ;;  %v350_v44 = vsel %vm318_vm5, %v302_v27, %v334_v38  ;;  %v335_v45 = vmul.bf16 1045249613, %v303_v31  ;;  %v336_v46 = vmul.bf16 1045249613, %v304_v32  ;;  %v361_v19 = vld [vmem:[%s766_s0] sm:$0xf] }
  0x28   : > { %444 = vmatprep.subr.bf16.mxu0 %v577_v39  ;;  %v579_v47 = vcombine.high %v349_v43, %v350_v44  ;;  %v337_v50 = vmul.bf16 1045249613, %v305_v41  ;;  %v338_v51 = vmul.bf16 1045249613, %v306_v42  ;;  %vm321_vm8 = vcmp.gt.bf16.partialorder %v305_v41, 0  ;;  %s573_s14 = sshll.u32 %s775_s13, 3 }
  0x29   : > { %v351_v48 = vsel %vm319_vm6, %v303_v31, %v335_v45  ;;  %v352_v49 = vsel %vm320_vm7, %v304_v32, %v336_v46  ;;  %vm322_vm9 = vcmp.gt.bf16.partialorder %v306_v42, 0  ;;  %v578_v54 = vcombine.low %v349_v43, %v350_v44  ;;  %s293_s21 = scalar_lea.vmem %s770_s4, %s573_s14 }
  0x2a   : > { %v581_v55 = vcombine.high %v351_v48, %v352_v49  ;;  %v353_v56 = vsel %vm321_vm8, %v305_v41, %v337_v50  ;;  %v354_v57 = vsel %vm322_vm9, %v306_v42, %v338_v51  ;;  %v339_v58 = vmul.bf16 1045249613, %v307_v52 }
  0x2b   : > { %445 = vmatpush1.bf16.msra.mxu0 %v576_v40  ;;  %v340_v59 = vmul.bf16 1045249613, %v308_v53  ;;  %vm323_vm10 = vcmp.gt.bf16.partialorder %v307_v52, 0  ;;  %vm324_vm11 = vcmp.gt.bf16.partialorder %v308_v53, 0  ;;  %v580_v62 = vcombine.low %v351_v48, %v352_v49 }
  0x2c   : > { %446 = vmatprep.subr.bf16.mxu0 %v579_v47  ;;  %v583_v63 = vcombine.high %v353_v56, %v354_v57  ;;  %v355_v0 = vsel %vm323_vm10, %v307_v52, %v339_v58  ;;  %v341_v2 = vmul.bf16 1045249613, %v309_v60  ;;  %v342_v3 = vmul.bf16 1045249613, %v310_v61 }
  0x2d   : > { %v356_v1 = vsel %vm324_vm11, %v308_v53, %v340_v59  ;;  %vm325_vm12 = vcmp.gt.bf16.partialorder %v309_v60, 0  ;;  %vm326_vm13 = vcmp.gt.bf16.partialorder %v310_v61, 0  ;;  %v582_v6 = vcombine.low %v353_v56, %v354_v57 }
  0x2e   : > { %v585_v7 = vcombine.high %v355_v0, %v356_v1  ;;  %v357_v8 = vsel %vm325_vm12, %v309_v60, %v341_v2  ;;  %v358_v9 = vsel %vm326_vm13, %v310_v61, %v342_v3  ;;  %v343_v10 = vmul.bf16 1045249613, %v311_v4 }
  0x2f   : > { %447 = vmatpush1.bf16.msra.mxu0 %v578_v54  ;;  %v344_v11 = vmul.bf16 1045249613, %v312_v5  ;;  %vm327_vm14 = vcmp.gt.bf16.partialorder %v311_v4, 0  ;;  %vm328_vm15 = vcmp.gt.bf16.partialorder %v312_v5, 0  ;;  %v584_v12 = vcombine.low %v355_v0, %v356_v1 }
  0x30   : > { %448 = vmatprep.subr.bf16.mxu0 %v581_v55  ;;  %v587_v13 = vcombine.high %v357_v8, %v358_v9  ;;  %v359_v14 = vsel %vm327_vm14, %v311_v4, %v343_v10  ;;  %v586_v16 = vcombine.low %v357_v8, %v358_v9 }
  0x31   : > { %v360_v15 = vsel %vm328_vm15, %v312_v5, %v344_v11 }
  0x32   : > { %v589_v17 = vcombine.high %v359_v14, %v360_v15  ;;  %v588_v18 = vcombine.low %v359_v14, %v360_v15 }
  0x33   : > { %449 = vmatpush1.bf16.msra.mxu0 %v580_v62 }
  0x34   : > { %450 = vmatprep.subr.bf16.mxu0 %v583_v63 }
  0x37   : > { %451 = vmatpush1.bf16.msra.mxu0 %v582_v6 }
  0x38   : > { %452 = vmatprep.subr.bf16.mxu0 %v585_v7 }
  0x3b   : > { %453 = vmatpush1.bf16.msra.mxu0 %v584_v12 }
  0x3c   : > { %454 = vmatprep.subr.bf16.mxu0 %v587_v13 }
  0x3f   : > { %455 = vmatpush1.bf16.msra.mxu0 %v586_v16 }
  0x40   : > { %456 = vmatprep.subr.bf16.mxu0 %v589_v17 }
  0x43   : > { %457 = vmatpush1.bf16.msra.mxu0 %v588_v18 }
  0x46   : > { %475 = vmatmul.mubr.bf16.vlgmr.msra.gmra.mrb[0].mxu0 %v361_v19 }
  0x9e   : > { %v487_v20 = vpop.permute.xlu0 %486 }
  0xa2   : > { %v495_v24 = vpop.permute.xlu0 %494 }
 0x119   : > { %v476_v21 = vpop.f32.mrb[0].mxu0 }
 0x11a   : > { %v489_v22 = vmul.f32 %v487_v20, %v476_v21  ;;  %v478_v23 = vpop.f32.mrb[1].mxu0 }
 0x11b   : > { %v490_v25 = vmul.f32 %v487_v20, %v478_v23  ;;  %v480_v26 = vpop.f32.mrb[2].mxu0 }
 0x11c   : > { %v497_v27 = vadd.f32 %v495_v24, %v489_v22  ;;  %v481_v28 = vpop.f32.mrb[3].mxu0 }
 0x11d   : > { %v498_v29 = vadd.f32 %v495_v24, %v490_v25 }
 0x11e   : > { %499 = vst [vmem:[%s293_s21] sm:$0xff] %v497_v27 }
 0x11f   : > { %500 = vst [vmem:[%s293_s21 + $0x8] sm:$0xff] %v498_v29 }
 0x120 PF: > { %p11_p9 = scmp.ge.s32.totalorder %s686_s19, 4   ;;  %s771_s15 = smov %s637_s16 }
 0x121   : > { %s772_s16 = smov %s695_s22  ;;  %s773_s17 = smov %s686_s19 }
 0x122   :  { %13 = sbr.rel (!%p11_p9) target bundleno = 2 (0x2), region = 109 }

// kernel: turbnet_forward.17
= control target key start
LH: loop header
LB: loop body
LE: loop exit
PB: predicated region body
PF: predicated region fallthrough
CT: control target
= control target key end

     0   :  { %v258_v0 = vmov 0.0   ;;  %vm259_vm0 = vmmov 0   ;;  %v260_v6 = vmov 0   ;;  %s364_s1 = inlined_call_operand.vmem [shape: bf16[128,128], index: 1, kind: input, shape index: {}]   ;;  %s365_s2 = inlined_call_operand.vmem [shape: f32[16,1], index: 2, kind: input, shape index: {}]   ;;  %s366_s3 = inlined_call_operand.vmem [shape: f32[16,1], index: 3, kind: input, shape index: {}]   ;;  %s367_s0 = inlined_call_operand.vmem [shape: bf16[16,128], index: 0, kind: input, shape index: {}]   ;;  %s368_s4 = inlined_call_operand.vmem [shape: f32[16,128], index: 4, kind: output, shape index: {}]  }
   0x1   :  { %232 = vmatprep.subr.bf16.mxu0 %v258_v0  ;;  %v19_v1 = vld [vmem:[%s364_s1] sm:$0xf]  ;;  %v20_v2 = vld [vmem:[%s364_s1 + $0x4] sm:$0xf]  ;;  %v21_v3 = vld [vmem:[%s364_s1 + $0x8] sm:$0xf]  ;;  %248 = vmatprep.mubr.msk.bf16.mxu0 %vm259_vm0, %v258_v0 }
   0x2   :  { %vm35_vm1 = vcmp.gt.bf16.partialorder %v19_v1, 0  ;;  %vm36_vm2 = vcmp.gt.bf16.partialorder %v20_v2, 0  ;;  %v51_v4 = vmul.bf16 1045249613, %v19_v1  ;;  %v52_v5 = vmul.bf16 1045249613, %v20_v2  ;;  %255 = vset.pattern.permute.xlu0 %v260_v6  ;;  %256 = vset.pattern.permute.xlu1 %v260_v6 }
   0x3   :  { %v22_v7 = vld [vmem:[%s364_s1 + $0xc] sm:$0xf]  ;;  %vm37_vm3 = vcmp.gt.bf16.partialorder %v21_v3, 0  ;;  %v53_v8 = vmul.bf16 1045249613, %v21_v3  ;;  %v180_v13 = vld [vmem:[%s365_s2] sm:$0xff] }
   0x4   :  { %v67_v9 = vsel %vm35_vm1, %v19_v1, %v51_v4  ;;  %v68_v10 = vsel %vm36_vm2, %v20_v2, %v52_v5  ;;  %vm38_vm4 = vcmp.gt.bf16.partialorder %v22_v7, 0  ;;  %v54_v11 = vmul.bf16 1045249613, %v22_v7  ;;  %v23_v12 = vld [vmem:[%s364_s1 + $0x10] sm:$0xf]  ;;  %184 = vperm.xlu0 %255, %v180_v13   ;;  %v194_v18 = vld [vmem:[%s366_s3] sm:$0xff] }
   0x5   :  { %v215_v14 = vcombine.low %v67_v9, %v68_v10  ;;  %v69_v15 = vsel %vm37_vm3, %v21_v3, %v53_v8  ;;  %v24_v16 = vld [vmem:[%s364_s1 + $0x14] sm:$0xf]  ;;  %vm39_vm5 = vcmp.gt.bf16.partialorder %v23_v12, 0  ;;  %v55_v17 = vmul.bf16 1045249613, %v23_v12  ;;  %198 = vperm.xlu1 %256, %v194_v18   ;;  %v181_v22 = vld [vmem:[%s365_s2 + $0x8] sm:$0xff] }
   0x6   :  { %v70_v19 = vsel %vm38_vm4, %v22_v7, %v54_v11  ;;  %vm40_vm6 = vcmp.gt.bf16.partialorder %v24_v16, 0  ;;  %v56_v20 = vmul.bf16 1045249613, %v24_v16  ;;  %v25_v21 = vld [vmem:[%s364_s1 + $0x18] sm:$0xf]  ;;  %v195_v25 = vld [vmem:[%s366_s3 + $0x8] sm:$0xff] }
   0x7   :  { %233 = vmatpush3.bf16.msra.mxu0 %v215_v14  ;;  %v216_v23 = vcombine.low %v69_v15, %v70_v19  ;;  %v26_v24 = vld [vmem:[%s364_s1 + $0x1c] sm:$0xf]  ;;  %v71_v26 = vsel %vm39_vm5, %v23_v12, %v55_v17  ;;  %v57_v28 = vmul.bf16 1045249613, %v25_v21  ;;  %v27_v30 = vld [vmem:[%s364_s1 + $0x20] sm:$0xf] }
   0x8   :  { %234 = vmatprep.subr.bf16.mxu0 %v258_v0  ;;  %v72_v27 = vsel %vm40_vm6, %v24_v16, %v56_v20  ;;  %v58_v29 = vmul.bf16 1045249613, %v26_v24  ;;  %vm41_vm7 = vcmp.gt.bf16.partialorder %v25_v21, 0  ;;  %vm42_vm8 = vcmp.gt.bf16.partialorder %v26_v24, 0  ;;  %v28_v31 = vld [vmem:[%s364_s1 + $0x24] sm:$0xf]  ;;  %189 = vperm.xlu0 %255, %v181_v22  }
   0x9   :  { %203 = vperm.xlu1 %256, %v195_v25   ;;  %v217_v32 = vcombine.low %v71_v26, %v72_v27  ;;  %v59_v33 = vmul.bf16 1045249613, %v27_v30  ;;  %v73_v34 = vsel %vm41_vm7, %v25_v21, %v57_v28  ;;  %vm43_vm9 = vcmp.gt.bf16.partialorder %v27_v30, 0  ;;  %v29_v37 = vld [vmem:[%s364_s1 + $0x28] sm:$0xf]  ;;  %v257_v62 = vld [vmem:[%s367_s0] sm:$0xff]  }
   0xa   :  { %v74_v35 = vsel %vm42_vm8, %v26_v24, %v58_v29  ;;  %v60_v36 = vmul.bf16 1045249613, %v28_v31  ;;  %vm44_vm10 = vcmp.gt.bf16.partialorder %v28_v31, 0  ;;  %v30_v38 = vld [vmem:[%s364_s1 + $0x2c] sm:$0xf]  ;;  %vm45_vm11 = vcmp.gt.bf16.partialorder %v29_v37, 0 }
   0xb   :  { %235 = vmatpush3.bf16.msra.mxu0 %v216_v23  ;;  %v218_v39 = vcombine.low %v73_v34, %v74_v35  ;;  %v75_v40 = vsel %vm43_vm9, %v27_v30, %v59_v33  ;;  %v61_v41 = vmul.bf16 1045249613, %v29_v37  ;;  %vm46_vm12 = vcmp.gt.bf16.partialorder %v30_v38, 0  ;;  %v31_v44 = vld [vmem:[%s364_s1 + $0x30] sm:$0xf] }
   0xc   :  { %236 = vmatprep.subr.bf16.mxu0 %v258_v0  ;;  %v76_v42 = vsel %vm44_vm10, %v28_v31, %v60_v36  ;;  %v62_v43 = vmul.bf16 1045249613, %v30_v38  ;;  %v32_v45 = vld [vmem:[%s364_s1 + $0x34] sm:$0xf]  ;;  %v63_v49 = vmul.bf16 1045249613, %v31_v44 }
   0xd   :  { %v219_v46 = vcombine.low %v75_v40, %v76_v42  ;;  %v77_v47 = vsel %vm45_vm11, %v29_v37, %v61_v41  ;;  %v64_v50 = vmul.bf16 1045249613, %v32_v45  ;;  %vm47_vm13 = vcmp.gt.bf16.partialorder %v31_v44, 0  ;;  %v33_v51 = vld [vmem:[%s364_s1 + $0x38] sm:$0xf] }
   0xe   :  { %v78_v48 = vsel %vm46_vm12, %v30_v38, %v62_v43  ;;  %vm48_vm14 = vcmp.gt.bf16.partialorder %v32_v45, 0  ;;  %v34_v52 = vld [vmem:[%s364_s1 + $0x3c] sm:$0xf]  ;;  %v79_v54 = vsel %vm47_vm13, %v31_v44, %v63_v49  ;;  %v65_v56 = vmul.bf16 1045249613, %v33_v51 }
   0xf   :  { %237 = vmatpush3.bf16.msra.mxu0 %v217_v32  ;;  %v220_v53 = vcombine.low %v77_v47, %v78_v48  ;;  %v80_v55 = vsel %vm48_vm14, %v32_v45, %v64_v50  ;;  %v66_v57 = vmul.bf16 1045249613, %v34_v52  ;;  %vm49_vm15 = vcmp.gt.bf16.partialorder %v33_v51, 0 }
  0x10   :  { %238 = vmatprep.subr.bf16.mxu0 %v258_v0  ;;  %vm50_vm0 = vcmp.gt.bf16.partialorder %v34_v52, 0  ;;  %v221_v58 = vcombine.low %v79_v54, %v80_v55  ;;  %v81_v59 = vsel %vm49_vm15, %v33_v51, %v65_v56 }
  0x11   :  { %v82_v60 = vsel %vm50_vm0, %v34_v52, %v66_v57 }
  0x12   :  { %v222_v61 = vcombine.low %v81_v59, %v82_v60 }
  0x13   :  { %239 = vmatpush3.bf16.msra.mxu0 %v218_v39 }
  0x14   :  { %240 = vmatprep.subr.bf16.mxu0 %v258_v0 }
  0x17   :  { %241 = vmatpush3.bf16.msra.mxu0 %v219_v46 }
  0x18   :  { %242 = vmatprep.subr.bf16.mxu0 %v258_v0 }
  0x1b   :  { %243 = vmatpush3.bf16.msra.mxu0 %v220_v53 }
  0x1c   :  { %244 = vmatprep.subr.bf16.mxu0 %v258_v0 }
  0x1f   :  { %245 = vmatpush3.bf16.msra.mxu0 %v221_v58 }
  0x20   :  { %246 = vmatprep.subr.bf16.mxu0 %v258_v0 }
  0x23   :  { %247 = vmatpush3.bf16.msra.mxu0 %v222_v61 }
  0x26   :  { %249 = vmatmul.mubr.bf16.vlgmr.msra.gmra.mrb[0].mxu0 %v257_v62 }
  0x83   :  { %v185_v63 = vpop.permute.xlu0 %184 }
  0x84   :  { %v199_v1 = vpop.permute.xlu1 %198 }
  0x87   :  { %v190_v5 = vpop.permute.xlu0 %189 }
  0x88   :  { %v204_v10 = vpop.permute.xlu1 %203 }
  0xf9   :  { %v173_v2 = vpop.f32.mrb[0].mxu0 }
  0xfa   :  { %v192_v3 = vmul.f32 %v185_v63, %v173_v2  ;;  %v250_v4 = vpop.f32.mrb[1].mxu0 }
  0xfb   :  { %v176_v6 = vpop.f32.mrb[2].mxu0 }
  0xfc   :  { %v206_v7 = vadd.f32 %v199_v1, %v192_v3  ;;  %v193_v8 = vmul.f32 %v190_v5, %v176_v6  ;;  %v251_v9 = vpop.f32.mrb[3].mxu0 }
  0xfe   :  { %208 = vst [vmem:[%s368_s4] sm:$0xff] %v206_v7  ;;  %v207_v0 = vadd.f32 %v204_v10, %v193_v8 }
 0x100   :  { %209 = vst [vmem:[%s368_s4 + $0x8] sm:$0xff] %v207_v0 }

// kernel: turbnet_forward.18
= control target key start
LH: loop header
LB: loop body
LE: loop exit
PB: predicated region body
PF: predicated region fallthrough
CT: control target
= control target key end

     0   :  { %v454_v3 = vmov 0   ;;  %s624_s1 = inlined_call_operand.vmem [shape: bf16[256,32], index: 1, kind: input, shape index: {}]   ;;  %s625_s0 = inlined_call_operand.vmem [shape: bf16[32,256], index: 0, kind: input, shape index: {}]   ;;  %s626_s2 = inlined_call_operand.vmem [shape: f32[32,1], index: 2, kind: input, shape index: {}]   ;;  %s627_s3 = inlined_call_operand.vmem [shape: f32[32,1], index: 3, kind: input, shape index: {}]   ;;  %s628_s4 = inlined_call_operand.vmem [shape: f32[32,32], index: 4, kind: output, shape index: {}]  }
   0x1   :  { %v35_v0 = vld [vmem:[%s624_s1 + $0x40] sm:$0xf]  ;;  %v36_v1 = vld [vmem:[%s624_s1 + $0x44] sm:$0xf]  ;;  %447 = vset.pattern.permute.xlu1 %v454_v3  ;;  %446 = vset.pattern.permute.xlu0 %v454_v3  ;;  %v37_v11 = vld [vmem:[%s624_s1 + $0x48] sm:$0xf] }
   0x2   :  { %v19_v2 = vld [vmem:[%s624_s1] sm:$0xf]  ;;  %vm67_vm0 = vcmp.gt.bf16.partialorder %v35_v0, 0  ;;  %vm68_vm1 = vcmp.gt.bf16.partialorder %v36_v1, 0  ;;  %v99_v4 = vmul.bf16 1045249613, %v35_v0 }
   0x3   :  { %v100_v5 = vmul.bf16 1045249613, %v36_v1  ;;  %v20_v6 = vld [vmem:[%s624_s1 + $0x4] sm:$0xf]  ;;  %vm51_vm2 = vcmp.gt.bf16.partialorder %v19_v2, 0  ;;  %vm69_vm4 = vcmp.gt.bf16.partialorder %v37_v11, 0 }
   0x4   :  { %v83_v7 = vmul.bf16 1045249613, %v19_v2  ;;  %v131_v8 = vsel %vm67_vm0, %v35_v0, %v99_v4  ;;  %vm52_vm3 = vcmp.gt.bf16.partialorder %v20_v6, 0  ;;  %v84_v10 = vmul.bf16 1045249613, %v20_v6  ;;  %v318_v23 = vld [vmem:[%s626_s2 + $0x10] sm:$0xff] }
   0x5   :  { %v132_v9 = vsel %vm68_vm1, %v36_v1, %v100_v5  ;;  %v38_v14 = vld [vmem:[%s624_s1 + $0x4c] sm:$0xf]  ;;  %v101_v15 = vmul.bf16 1045249613, %v37_v11  ;;  %v21_v18 = vld [vmem:[%s624_s1 + $0x8] sm:$0xf]  ;;  %332 = vperm.xlu1 %447, %v318_v23  }
   0x6   :  { %v393_v12 = vcombine.low %v131_v8, %v132_v9  ;;  %v115_v13 = vsel %vm51_vm2, %v19_v2, %v83_v7  ;;  %v116_v16 = vsel %vm52_vm3, %v20_v6, %v84_v10  ;;  %vm70_vm5 = vcmp.gt.bf16.partialorder %v38_v14, 0  ;;  %v22_v21 = vld [vmem:[%s624_s1 + $0xc] sm:$0xf]  ;;  %v39_v26 = vld [vmem:[%s624_s1 + $0x50] sm:$0xf]  ;;  %v316_v27 = vld [vmem:[%s626_s2] sm:$0xff] }
   0x7   :  { %v102_v17 = vmul.bf16 1045249613, %v38_v14  ;;  %v385_v19 = vcombine.low %v115_v13, %v116_v16  ;;  %v133_v20 = vsel %vm69_vm4, %v37_v11, %v101_v15  ;;  %vm53_vm6 = vcmp.gt.bf16.partialorder %v21_v18, 0  ;;  %v40_v30 = vld [vmem:[%s624_s1 + $0x54] sm:$0xf]  ;;  %v319_v32 = vld [vmem:[%s626_s2 + $0x18] sm:$0xff]  ;;  %322 = vperm.xlu0 %446, %v316_v27  }
   0x8   :  { %401 = vmatprep.subr.bf16.mxu0 %v393_v12  ;;  %429 = vmatprep.subr.bf16.mxu1 %v393_v12  ;;  %v85_v22 = vmul.bf16 1045249613, %v21_v18  ;;  %vm54_vm7 = vcmp.gt.bf16.partialorder %v22_v21, 0  ;;  %v86_v25 = vmul.bf16 1045249613, %v22_v21  ;;  %vm71_vm8 = vcmp.gt.bf16.partialorder %v39_v26, 0 }
   0x9   :  { %v134_v24 = vsel %vm70_vm5, %v38_v14, %v102_v17  ;;  %402 = vmatpush3.bf16.msra.mxu0 %v385_v19  ;;  %437 = vmatpush3.bf16.msra.mxu1 %v385_v19  ;;  %v103_v31 = vmul.bf16 1045249613, %v39_v26  ;;  %vm72_vm9 = vcmp.gt.bf16.partialorder %v40_v30, 0  ;;  %v104_v34 = vmul.bf16 1045249613, %v40_v30  ;;  %v317_v40 = vld [vmem:[%s626_s2 + $0x8] sm:$0xff] }
   0xa   :  { %v394_v28 = vcombine.low %v133_v20, %v134_v24  ;;  %v117_v29 = vsel %vm53_vm6, %v21_v18, %v85_v22  ;;  %v118_v33 = vsel %vm54_vm7, %v22_v21, %v86_v25  ;;  %v23_v35 = vld [vmem:[%s624_s1 + $0x10] sm:$0xf]  ;;  %v24_v38 = vld [vmem:[%s624_s1 + $0x14] sm:$0xf]  ;;  %v41_v43 = vld [vmem:[%s624_s1 + $0x58] sm:$0xf]  ;;  %337 = vperm.xlu1 %447, %v319_v32  }
   0xb   :  { %v386_v36 = vcombine.low %v117_v29, %v118_v33  ;;  %v135_v37 = vsel %vm71_vm8, %v39_v26, %v103_v31  ;;  %vm55_vm10 = vcmp.gt.bf16.partialorder %v23_v35, 0  ;;  %v87_v39 = vmul.bf16 1045249613, %v23_v35  ;;  %v42_v46 = vld [vmem:[%s624_s1 + $0x5c] sm:$0xf]  ;;  %v345_v48 = vld [vmem:[%s627_s3 + $0x8] sm:$0xff]  ;;  %327 = vperm.xlu0 %446, %v317_v40  }
   0xc   :  { %403 = vmatprep.subr.bf16.mxu0 %v394_v28  ;;  %430 = vmatprep.subr.bf16.mxu1 %v394_v28  ;;  %v136_v41 = vsel %vm72_vm9, %v40_v30, %v104_v34  ;;  %vm56_vm11 = vcmp.gt.bf16.partialorder %v24_v38, 0  ;;  %v88_v42 = vmul.bf16 1045249613, %v24_v38  ;;  %vm73_vm12 = vcmp.gt.bf16.partialorder %v41_v43, 0  ;;  %v25_v51 = vld [vmem:[%s624_s1 + $0x18] sm:$0xf] }
   0xd   :  { %404 = vmatpush3.bf16.msra.mxu0 %v386_v36  ;;  %438 = vmatpush3.bf16.msra.mxu1 %v386_v36  ;;  %v395_v44 = vcombine.low %v135_v37, %v136_v41  ;;  %v119_v45 = vsel %vm55_vm10, %v23_v35, %v87_v39  ;;  %v105_v47 = vmul.bf16 1045249613, %v41_v43  ;;  %vm74_vm13 = vcmp.gt.bf16.partialorder %v42_v46, 0  ;;  %v26_v54 = vld [vmem:[%s624_s1 + $0x1c] sm:$0xf]  ;;  %v344_v56 = vld [vmem:[%s627_s3] sm:$0xff] }
   0xe   :  { %v120_v49 = vsel %vm56_vm11, %v24_v38, %v88_v42  ;;  %v106_v50 = vmul.bf16 1045249613, %v42_v46  ;;  %vm57_vm14 = vcmp.gt.bf16.partialorder %v25_v51, 0  ;;  %v89_v55 = vmul.bf16 1045249613, %v25_v51  ;;  %355 = vperm.xlu1 %447, %v345_v48   ;;  %v347_v0 = vld [vmem:[%s627_s3 + $0x18] sm:$0xff] }
   0xf   :  { %405 = vmatprep.subr.bf16.mxu0 %v395_v44  ;;  %431 = vmatprep.subr.bf16.mxu1 %v395_v44  ;;  %v387_v52 = vcombine.low %v119_v45, %v120_v49  ;;  %v137_v53 = vsel %vm73_vm12, %v41_v43, %v105_v47  ;;  %vm58_vm15 = vcmp.gt.bf16.partialorder %v26_v54, 0  ;;  %v90_v58 = vmul.bf16 1045249613, %v26_v54  ;;  %v43_v59 = vld [vmem:[%s624_s1 + $0x60] sm:$0xf]  ;;  %v346_v8 = vld [vmem:[%s627_s3 + $0x10] sm:$0xff] }
  0x10   :  { %v138_v57 = vsel %vm74_vm13, %v42_v46, %v106_v50  ;;  %v121_v61 = vsel %vm57_vm14, %v25_v51, %v89_v55  ;;  %v44_v62 = vld [vmem:[%s624_s1 + $0x64] sm:$0xf]  ;;  %vm75_vm0 = vcmp.gt.bf16.partialorder %v43_v59, 0  ;;  %v107_v63 = vmul.bf16 1045249613, %v43_v59  ;;  %350 = vperm.xlu0 %446, %v344_v56  }
  0x11   :  { %406 = vmatpush3.bf16.msra.mxu0 %v387_v52  ;;  %439 = vmatpush3.bf16.msra.mxu1 %v387_v52  ;;  %v396_v60 = vcombine.low %v137_v53, %v138_v57  ;;  %v122_v1 = vsel %vm58_vm15, %v26_v54, %v90_v58  ;;  %vm76_vm1 = vcmp.gt.bf16.partialorder %v44_v62, 0  ;;  %v108_v2 = vmul.bf16 1045249613, %v44_v62  ;;  %v27_v3 = vld [vmem:[%s624_s1 + $0x20] sm:$0xf] }
  0x12   :  { %v388_v4 = vcombine.low %v121_v61, %v122_v1  ;;  %v139_v5 = vsel %vm75_vm0, %v43_v59, %v107_v63  ;;  %v28_v6 = vld [vmem:[%s624_s1 + $0x24] sm:$0xf]  ;;  %vm59_vm2 = vcmp.gt.bf16.partialorder %v27_v3, 0  ;;  %v91_v7 = vmul.bf16 1045249613, %v27_v3  ;;  %365 = vperm.xlu1 %447, %v347_v0  }
  0x13   :  { %407 = vmatprep.subr.bf16.mxu0 %v396_v60  ;;  %432 = vmatprep.subr.bf16.mxu1 %v396_v60  ;;  %v140_v9 = vsel %vm76_vm1, %v44_v62, %v108_v2  ;;  %vm60_vm3 = vcmp.gt.bf16.partialorder %v28_v6, 0  ;;  %v92_v10 = vmul.bf16 1045249613, %v28_v6  ;;  %v45_v11 = vld [vmem:[%s624_s1 + $0x68] sm:$0xf]  ;;  %vm372_vm0 = vcmask 261120  }
  0x14   :  { %v397_v12 = vcombine.low %v139_v5, %v140_v9  ;;  %v123_v13 = vsel %vm59_vm2, %v27_v3, %v91_v7  ;;  %v46_v14 = vld [vmem:[%s624_s1 + $0x6c] sm:$0xf]  ;;  %vm77_vm4 = vcmp.gt.bf16.partialorder %v45_v11, 0  ;;  %v109_v15 = vmul.bf16 1045249613, %v45_v11  ;;  %360 = vperm.xlu0 %446, %v346_v8  }
  0x15   :  { %408 = vmatpush3.bf16.msra.mxu0 %v388_v4  ;;  %440 = vmatpush3.bf16.msra.mxu1 %v388_v4  ;;  %v124_v16 = vsel %vm60_vm3, %v28_v6, %v92_v10  ;;  %vm78_vm5 = vcmp.gt.bf16.partialorder %v46_v14, 0  ;;  %v110_v17 = vmul.bf16 1045249613, %v46_v14  ;;  %v29_v18 = vld [vmem:[%s624_s1 + $0x28] sm:$0xf] }
  0x16   :  { %409 = vmatprep.subr.bf16.mxu0 %v397_v12  ;;  %433 = vmatprep.subr.bf16.mxu1 %v397_v12  ;;  %v389_v19 = vcombine.low %v123_v13, %v124_v16  ;;  %v141_v20 = vsel %vm77_vm4, %v45_v11, %v109_v15  ;;  %v30_v21 = vld [vmem:[%s624_s1 + $0x2c] sm:$0xf]  ;;  %vm61_vm6 = vcmp.gt.bf16.partialorder %v29_v18, 0  ;;  %v93_v22 = vmul.bf16 1045249613, %v29_v18 }
  0x17   :  { %v142_v23 = vsel %vm78_vm5, %v46_v14, %v110_v17  ;;  %vm62_vm7 = vcmp.gt.bf16.partialorder %v30_v21, 0  ;;  %v94_v24 = vmul.bf16 1045249613, %v30_v21  ;;  %v47_v25 = vld [vmem:[%s624_s1 + $0x70] sm:$0xf] }
  0x18   :  { %v398_v26 = vcombine.low %v141_v20, %v142_v23  ;;  %v125_v27 = vsel %vm61_vm6, %v29_v18, %v93_v22  ;;  %v48_v28 = vld [vmem:[%s624_s1 + $0x74] sm:$0xf]  ;;  %vm79_vm8 = vcmp.gt.bf16.partialorder %v47_v25, 0  ;;  %v111_v29 = vmul.bf16 1045249613, %v47_v25 }
  0x19   :  { %410 = vmatpush3.bf16.msra.mxu0 %v389_v19  ;;  %441 = vmatpush3.bf16.msra.mxu1 %v389_v19  ;;  %v126_v30 = vsel %vm62_vm7, %v30_v21, %v94_v24  ;;  %vm80_vm9 = vcmp.gt.bf16.partialorder %v48_v28, 0  ;;  %v112_v31 = vmul.bf16 1045249613, %v48_v28  ;;  %v31_v32 = vld [vmem:[%s624_s1 + $0x30] sm:$0xf] }
  0x1a   :  { %411 = vmatprep.subr.bf16.mxu0 %v398_v26  ;;  %434 = vmatprep.subr.bf16.mxu1 %v398_v26  ;;  %v390_v33 = vcombine.low %v125_v27, %v126_v30  ;;  %v143_v34 = vsel %vm79_vm8, %v47_v25, %v111_v29  ;;  %v32_v35 = vld [vmem:[%s624_s1 + $0x34] sm:$0xf]  ;;  %vm63_vm10 = vcmp.gt.bf16.partialorder %v31_v32, 0  ;;  %v95_v36 = vmul.bf16 1045249613, %v31_v32 }
  0x1b   :  { %v144_v37 = vsel %vm80_vm9, %v48_v28, %v112_v31  ;;  %vm64_vm11 = vcmp.gt.bf16.partialorder %v32_v35, 0  ;;  %v96_v38 = vmul.bf16 1045249613, %v32_v35  ;;  %v49_v39 = vld [vmem:[%s624_s1 + $0x78] sm:$0xf] }
  0x1c   :  { %v399_v40 = vcombine.low %v143_v34, %v144_v37  ;;  %v127_v41 = vsel %vm63_vm10, %v31_v32, %v95_v36  ;;  %v50_v42 = vld [vmem:[%s624_s1 + $0x7c] sm:$0xf]  ;;  %vm81_vm12 = vcmp.gt.bf16.partialorder %v49_v39, 0  ;;  %v113_v43 = vmul.bf16 1045249613, %v49_v39 }
  0x1d   :  { %412 = vmatpush3.bf16.msra.mxu0 %v390_v33  ;;  %442 = vmatpush3.bf16.msra.mxu1 %v390_v33  ;;  %v128_v44 = vsel %vm64_vm11, %v32_v35, %v96_v38  ;;  %vm82_vm13 = vcmp.gt.bf16.partialorder %v50_v42, 0  ;;  %v114_v45 = vmul.bf16 1045249613, %v50_v42  ;;  %v33_v46 = vld [vmem:[%s624_s1 + $0x38] sm:$0xf] }
  0x1e   :  { %413 = vmatprep.subr.bf16.mxu0 %v399_v40  ;;  %435 = vmatprep.subr.bf16.mxu1 %v399_v40  ;;  %v391_v47 = vcombine.low %v127_v41, %v128_v44  ;;  %v145_v48 = vsel %vm81_vm12, %v49_v39, %v113_v43  ;;  %v34_v49 = vld [vmem:[%s624_s1 + $0x3c] sm:$0xf]  ;;  %vm65_vm14 = vcmp.gt.bf16.partialorder %v33_v46, 0  ;;  %v97_v50 = vmul.bf16 1045249613, %v33_v46 }
  0x1f   :  { %v146_v51 = vsel %vm82_vm13, %v50_v42, %v114_v45  ;;  %vm66_vm15 = vcmp.gt.bf16.partialorder %v34_v49, 0  ;;  %v98_v52 = vmul.bf16 1045249613, %v34_v49  ;;  %v450_v55 = vld [vmem:[%s625_s0 + $0x4] ss:$8 sps:$4 sm:$0xff]  }
  0x20   :  { %v400_v53 = vcombine.low %v145_v48, %v146_v51  ;;  %v129_v54 = vsel %vm65_vm14, %v33_v46, %v97_v50  ;;  %v453_v56 = vld [vmem:[%s625_s0 + $0x14] ss:$8 sps:$4 sm:$0xff]   ;;  %v448_v59 = vld [vmem:[%s625_s0] ss:$8 sps:$4 sm:$0xff]   ;;  %299 = vmatprep.mubr.bf16.mxu0 %v450_v55  ;;  %v451_v60 = vld [vmem:[%s625_s0 + $0x10] ss:$8 sps:$4 sm:$0xff]  }
  0x21   :  { %414 = vmatpush3.bf16.msra.mxu0 %v391_v47  ;;  %443 = vmatpush3.bf16.msra.mxu1 %v391_v47  ;;  %v130_v57 = vsel %vm66_vm15, %v34_v49, %v98_v52 }
  0x22   :  { %415 = vmatprep.subr.bf16.mxu0 %v400_v53  ;;  %436 = vmatprep.subr.bf16.mxu1 %v400_v53  ;;  %v392_v58 = vcombine.low %v129_v54, %v130_v57 }
  0x23   :  { %307 = vmatprep.mubr.bf16.mxu1 %v453_v56 }
  0x25   :  { %416 = vmatpush3.bf16.msra.mxu0 %v392_v58  ;;  %444 = vmatpush3.bf16.msra.mxu1 %v392_v58 }
  0x28   :  { %300 = vmatmul.mubr.bf16.vlgmr.msra.gmra.mrb[0].mxu0 %v448_v59  ;;  %308 = vmatmul.mubr.bf16.vlgmr.msra.gmra.mrb[0].mxu1 %v451_v60 }
  0x84   :  { %v333_v61 = vpop.permute.xlu1 %332 }
  0x86   :  { %v323_v62 = vpop.permute.xlu0 %322 }
  0x89   :  { %v338_v63 = vpop.permute.xlu1 %337 }
  0x8a   :  { %v328_v0 = vpop.permute.xlu0 %327 }
  0x8d   :  { %v356_v1 = vpop.permute.xlu1 %355 }
  0x8f   :  { %v351_v2 = vpop.permute.xlu0 %350 }
  0x91   :  { %v366_v22 = vpop.permute.xlu1 %365 }
  0x93   :  { %v361_v17 = vpop.permute.xlu0 %360 }
  0xfb   :  { %v417_v3 = vpop.f32.mrb[0].mxu0  ;;  %v423_v4 = vpop.f32.mrb[0].mxu1 }
  0xfc   :  { %v418_v5 = vpop.f32.mrb[1].mxu0  ;;  %v424_v6 = vpop.f32.mrb[1].mxu1 }
  0xfd   :  { %v419_v7 = vadd.f32 %v418_v5, %v417_v3  ;;  %v425_v8 = vadd.f32 %v424_v6, %v423_v4  ;;  %v420_v9 = vpop.f32.mrb[2].mxu0  ;;  %v426_v10 = vpop.f32.mrb[2].mxu1 }
  0xfe   :  { %v421_v11 = vpop.f32.mrb[3].mxu0  ;;  %v427_v12 = vpop.f32.mrb[3].mxu1 }
  0xff   :  { %v340_v13 = vmul.f32 %v419_v7, %v323_v62  ;;  %v342_v14 = vmul.f32 %v425_v8, %v333_v61  ;;  %v422_v15 = vadd.f32 %v421_v11, %v420_v9  ;;  %v428_v16 = vadd.f32 %v427_v12, %v426_v10 }
 0x101   :  { %v368_v18 = vadd.f32 %v351_v2, %v340_v13  ;;  %v370_v19 = vadd.f32 %v361_v17, %v342_v14  ;;  %v341_v20 = vmul.f32 %v422_v15, %v328_v0  ;;  %v343_v21 = vmul.f32 %v428_v16, %v338_v63 }
 0x103   :  { %373 = vst.msk [vmem:[%s628_s4] sm:$0xff] %vm372_vm0, %v368_v18  ;;  %375 = vst.msk [vmem:[%s628_s4 + $0x10] sm:$0xff] %vm372_vm0, %v370_v19  ;;  %v369_v23 = vadd.f32 %v356_v1, %v341_v20  ;;  %v371_v24 = vadd.f32 %v366_v22, %v343_v21 }
 0x105   :  { %374 = vst.msk [vmem:[%s628_s4 + $0x8] sm:$0xff] %vm372_vm0, %v369_v23  ;;  %376 = vst.msk [vmem:[%s628_s4 + $0x18] sm:$0xff] %vm372_vm0, %v371_v24 }

// kernel: turbnet_forward.19
= control target key start
LH: loop header
LB: loop body
LE: loop exit
PB: predicated region body
PF: predicated region fallthrough
CT: control target
= control target key end

     0   :  { %v306_v3 = vmov 0   ;;  %s422_s1 = inlined_call_operand.vmem [shape: bf16[128,8], index: 1, kind: input, shape index: {}]   ;;  %s423_s0 = inlined_call_operand.vmem [shape: bf16[32,128], index: 0, kind: input, shape index: {}]   ;;  %s424_s2 = inlined_call_operand.vmem [shape: f32[32,1], index: 2, kind: input, shape index: {}]   ;;  %s425_s3 = inlined_call_operand.vmem [shape: f32[32,1], index: 3, kind: input, shape index: {}]   ;;  %s426_s4 = inlined_call_operand.vmem [shape: f32[32,8], index: 4, kind: output, shape index: {}]  }
   0x1   :  { %v19_v0 = vld [vmem:[%s422_s1] sm:$0xf]  ;;  %v20_v1 = vld [vmem:[%s422_s1 + $0x4] sm:$0xf]  ;;  %v21_v2 = vld [vmem:[%s422_s1 + $0x8] sm:$0xf]  ;;  %303 = vset.pattern.permute.xlu1 %v306_v3  ;;  %302 = vset.pattern.permute.xlu0 %v306_v3 }
   0x2   :  { %vm35_vm0 = vcmp.gt.bf16.partialorder %v19_v0, 0  ;;  %vm36_vm1 = vcmp.gt.bf16.partialorder %v20_v1, 0  ;;  %v51_v4 = vmul.bf16 1045249613, %v19_v0  ;;  %v52_v5 = vmul.bf16 1045249613, %v20_v1 }
   0x3   :  { %v22_v6 = vld [vmem:[%s422_s1 + $0xc] sm:$0xf]  ;;  %vm37_vm2 = vcmp.gt.bf16.partialorder %v21_v2, 0  ;;  %v53_v7 = vmul.bf16 1045249613, %v21_v2  ;;  %v304_v8 = vld [vmem:[%s423_s0] sm:$0xff]  }
   0x4   :  { %v67_v9 = vsel %vm35_vm0, %v19_v0, %v51_v4  ;;  %v68_v10 = vsel %vm36_vm1, %v20_v1, %v52_v5  ;;  %vm38_vm3 = vcmp.gt.bf16.partialorder %v22_v6, 0  ;;  %v54_v11 = vmul.bf16 1045249613, %v22_v6  ;;  %v23_v12 = vld [vmem:[%s422_s1 + $0x10] sm:$0xf]  ;;  %297 = vmatprep.mubr.bf16.mxu0 %v304_v8  ;;  %v196_v21 = vld [vmem:[%s424_s2] sm:$0xff] }
   0x5   :  { %v263_v13 = vcombine.low %v67_v9, %v68_v10  ;;  %v69_v14 = vsel %vm37_vm2, %v21_v2, %v53_v7  ;;  %v24_v15 = vld [vmem:[%s422_s1 + $0x14] sm:$0xf]  ;;  %vm39_vm4 = vcmp.gt.bf16.partialorder %v23_v12, 0  ;;  %v55_v16 = vmul.bf16 1045249613, %v23_v12  ;;  %202 = vperm.xlu0 %302, %v196_v21   ;;  %v199_v26 = vld [vmem:[%s424_s2 + $0x18] sm:$0xff] }
   0x6   :  { %v198_v17 = vld [vmem:[%s424_s2 + $0x10] sm:$0xff]  ;;  %v70_v18 = vsel %vm38_vm3, %v22_v6, %v54_v11  ;;  %vm40_vm5 = vcmp.gt.bf16.partialorder %v24_v15, 0  ;;  %v56_v19 = vmul.bf16 1045249613, %v24_v15  ;;  %v25_v20 = vld [vmem:[%s422_s1 + $0x18] sm:$0xf] }
   0x7   :  { %212 = vperm.xlu1 %303, %v198_v17   ;;  %281 = vmatprep.subr.bf16.mxu0 %v263_v13  ;;  %v264_v22 = vcombine.low %v69_v14, %v70_v18  ;;  %v71_v23 = vsel %vm39_vm4, %v23_v12, %v55_v16  ;;  %v26_v24 = vld [vmem:[%s422_s1 + $0x1c] sm:$0xf]  ;;  %vm41_vm6 = vcmp.gt.bf16.partialorder %v25_v20, 0  ;;  %v57_v25 = vmul.bf16 1045249613, %v25_v20  ;;  %v197_v30 = vld [vmem:[%s424_s2 + $0x8] sm:$0xff] }
   0x8   :  { %282 = vmatpush3.bf16.msra.mxu0 %v263_v13  ;;  %v72_v27 = vsel %vm40_vm5, %v24_v15, %v56_v19  ;;  %vm42_vm7 = vcmp.gt.bf16.partialorder %v26_v24, 0  ;;  %v58_v28 = vmul.bf16 1045249613, %v26_v24  ;;  %v27_v29 = vld [vmem:[%s422_s1 + $0x20] sm:$0xf]  ;;  %v225_v39 = vld [vmem:[%s425_s3 + $0x8] sm:$0xff] }
   0x9   :  { %283 = vmatprep.subr.bf16.mxu0 %v264_v22  ;;  %v265_v31 = vcombine.low %v71_v23, %v72_v27  ;;  %v28_v32 = vld [vmem:[%s422_s1 + $0x24] sm:$0xf]  ;;  %v59_v33 = vmul.bf16 1045249613, %v27_v29  ;;  %v73_v34 = vsel %vm41_vm6, %v25_v20, %v57_v25  ;;  %vm43_vm8 = vcmp.gt.bf16.partialorder %v27_v29, 0  ;;  %207 = vperm.xlu0 %302, %v197_v30   ;;  %v227_v48 = vld [vmem:[%s425_s3 + $0x18] sm:$0xff] }
   0xa   :  { %v74_v35 = vsel %vm42_vm7, %v26_v24, %v58_v28  ;;  %v60_v36 = vmul.bf16 1045249613, %v28_v32  ;;  %vm44_vm9 = vcmp.gt.bf16.partialorder %v28_v32, 0  ;;  %v29_v37 = vld [vmem:[%s422_s1 + $0x28] sm:$0xf]  ;;  %v224_v40 = vld [vmem:[%s425_s3] sm:$0xff] }
   0xb   :  { %217 = vperm.xlu1 %303, %v199_v26   ;;  %v30_v38 = vld [vmem:[%s422_s1 + $0x2c] sm:$0xf]  ;;  %v266_v41 = vcombine.low %v73_v34, %v74_v35  ;;  %v75_v42 = vsel %vm43_vm8, %v27_v29, %v59_v33  ;;  %vm45_vm10 = vcmp.gt.bf16.partialorder %v29_v37, 0  ;;  %v61_v44 = vmul.bf16 1045249613, %v29_v37  ;;  %v226_v49 = vld [vmem:[%s425_s3 + $0x10] sm:$0xff] }
   0xc   :  { %284 = vmatpush3.bf16.msra.mxu0 %v264_v22  ;;  %v76_v43 = vsel %vm44_vm9, %v28_v32, %v60_v36  ;;  %v62_v45 = vmul.bf16 1045249613, %v30_v38  ;;  %vm46_vm11 = vcmp.gt.bf16.partialorder %v30_v38, 0  ;;  %v31_v46 = vld [vmem:[%s422_s1 + $0x30] sm:$0xf]  ;;  %v305_v2 = vld [vmem:[%s423_s0 + $0x8] sm:$0xff]  }
   0xd   :  { %285 = vmatprep.subr.bf16.mxu0 %v265_v31  ;;  %v32_v47 = vld [vmem:[%s422_s1 + $0x34] sm:$0xf]  ;;  %230 = vperm.xlu0 %302, %v224_v40   ;;  %v267_v50 = vcombine.low %v75_v42, %v76_v43  ;;  %v77_v51 = vsel %vm45_vm10, %v29_v37, %v61_v44  ;;  %v63_v53 = vmul.bf16 1045249613, %v31_v46  ;;  %vm47_vm12 = vcmp.gt.bf16.partialorder %v31_v46, 0 }
   0xe   :  { %v78_v52 = vsel %vm46_vm11, %v30_v38, %v62_v45  ;;  %v64_v54 = vmul.bf16 1045249613, %v32_v47  ;;  %vm48_vm13 = vcmp.gt.bf16.partialorder %v32_v47, 0  ;;  %v33_v55 = vld [vmem:[%s422_s1 + $0x38] sm:$0xf]  ;;  %vm252_vm0 = vcmask 64512  }
   0xf   :  { %235 = vperm.xlu1 %303, %v225_v39   ;;  %v34_v56 = vld [vmem:[%s422_s1 + $0x3c] sm:$0xf]  ;;  %v268_v57 = vcombine.low %v77_v51, %v78_v52  ;;  %v79_v58 = vsel %vm47_vm12, %v31_v46, %v63_v53  ;;  %v65_v60 = vmul.bf16 1045249613, %v33_v55  ;;  %vm49_vm14 = vcmp.gt.bf16.partialorder %v33_v55, 0 }
  0x10   :  { %286 = vmatpush3.bf16.msra.mxu0 %v265_v31  ;;  %v80_v59 = vsel %vm48_vm13, %v32_v47, %v64_v54  ;;  %v66_v61 = vmul.bf16 1045249613, %v34_v56  ;;  %vm50_vm15 = vcmp.gt.bf16.partialorder %v34_v56, 0 }
  0x11   :  { %287 = vmatprep.subr.bf16.mxu0 %v266_v41  ;;  %240 = vperm.xlu0 %302, %v226_v49   ;;  %v269_v62 = vcombine.low %v79_v58, %v80_v59  ;;  %v81_v63 = vsel %vm49_vm14, %v33_v55, %v65_v60 }
  0x12   :  { %v82_v0 = vsel %vm50_vm15, %v34_v56, %v66_v61 }
  0x13   :  { %245 = vperm.xlu1 %303, %v227_v48   ;;  %v270_v1 = vcombine.low %v81_v63, %v82_v0 }
  0x14   :  { %288 = vmatpush3.bf16.msra.mxu0 %v266_v41 }
  0x15   :  { %289 = vmatprep.subr.bf16.mxu0 %v267_v50 }
  0x18   :  { %290 = vmatpush3.bf16.msra.mxu0 %v267_v50 }
  0x19   :  { %291 = vmatprep.subr.bf16.mxu0 %v268_v57 }
  0x1c   :  { %292 = vmatpush3.bf16.msra.mxu0 %v268_v57 }
  0x1d   :  { %293 = vmatprep.subr.bf16.mxu0 %v269_v62 }
  0x20   :  { %294 = vmatpush3.bf16.msra.mxu0 %v269_v62 }
  0x21   :  { %295 = vmatprep.subr.bf16.mxu0 %v270_v1 }
  0x24   :  { %296 = vmatpush3.bf16.msra.mxu0 %v270_v1 }
  0x27   :  { %298 = vmatmul.mubr.bf16.vlgmr.msra.gmra.mrb[0].mxu0 %v305_v2 }
  0x84   :  { %v203_v3 = vpop.permute.xlu0 %202 }
  0x86   :  { %v213_v4 = vpop.permute.xlu1 %212 }
  0x88   :  { %v208_v5 = vpop.permute.xlu0 %207 }
  0x8a   :  { %v218_v6 = vpop.permute.xlu1 %217 }
  0x8c   :  { %v231_v7 = vpop.permute.xlu0 %230 }
  0x8e   :  { %v236_v8 = vpop.permute.xlu1 %235 }
  0x90   :  { %v241_v12 = vpop.permute.xlu0 %240 }
  0x92   :  { %v246_v18 = vpop.permute.xlu1 %245 }
  0xfa   :  { %v299_v9 = vpop.f32.mrb[0].mxu0 }
  0xfb   :  { %v222_v10 = vmul.f32 %v299_v9, %v213_v4  ;;  %v181_v11 = vpop.f32.mrb[1].mxu0 }
  0xfc   :  { %v220_v13 = vmul.f32 %v203_v3, %v181_v11  ;;  %v300_v14 = vpop.f32.mrb[2].mxu0 }
  0xfd   :  { %v250_v15 = vadd.f32 %v241_v12, %v222_v10  ;;  %v223_v16 = vmul.f32 %v300_v14, %v218_v6  ;;  %v184_v17 = vpop.f32.mrb[3].mxu0 }
  0xfe   :  { %v248_v19 = vadd.f32 %v231_v7, %v220_v13  ;;  %v221_v20 = vmul.f32 %v208_v5, %v184_v17 }
  0xff   :  { %255 = vst.msk [vmem:[%s426_s4 + $0x10] sm:$0xff] %vm252_vm0, %v250_v15  ;;  %v251_v21 = vadd.f32 %v246_v18, %v223_v16 }
 0x100   :  { %253 = vst.msk [vmem:[%s426_s4] sm:$0xff] %vm252_vm0, %v248_v19  ;;  %v249_v22 = vadd.f32 %v236_v8, %v221_v20 }
 0x101   :  { %256 = vst.msk [vmem:[%s426_s4 + $0x18] sm:$0xff] %vm252_vm0, %v251_v21 }
 0x102   :  { %254 = vst.msk [vmem:[%s426_s4 + $0x8] sm:$0xff] %vm252_vm0, %v249_v22 }

// kernel: turbnet_forward.20
= control target key start
LH: loop header
LB: loop body
LE: loop exit
PB: predicated region body
PF: predicated region fallthrough
CT: control target
= control target key end

     0   :  { %v306_v3 = vmov 0   ;;  %s422_s1 = inlined_call_operand.vmem [shape: bf16[128,2], index: 1, kind: input, shape index: {}]   ;;  %s423_s0 = inlined_call_operand.vmem [shape: bf16[32,128], index: 0, kind: input, shape index: {}]   ;;  %s424_s2 = inlined_call_operand.vmem [shape: f32[32,1], index: 2, kind: input, shape index: {}]   ;;  %s425_s3 = inlined_call_operand.vmem [shape: f32[32,1], index: 3, kind: input, shape index: {}]   ;;  %s426_s4 = inlined_call_operand.vmem [shape: f32[32,2], index: 4, kind: output, shape index: {}]  }
   0x1   :  { %v19_v0 = vld [vmem:[%s422_s1] sm:$0xf]  ;;  %v20_v1 = vld [vmem:[%s422_s1 + $0x4] sm:$0xf]  ;;  %v21_v2 = vld [vmem:[%s422_s1 + $0x8] sm:$0xf]  ;;  %303 = vset.pattern.permute.xlu1 %v306_v3  ;;  %302 = vset.pattern.permute.xlu0 %v306_v3 }
   0x2   :  { %vm35_vm0 = vcmp.gt.bf16.partialorder %v19_v0, 0  ;;  %vm36_vm1 = vcmp.gt.bf16.partialorder %v20_v1, 0  ;;  %v51_v4 = vmul.bf16 1045249613, %v19_v0  ;;  %v52_v5 = vmul.bf16 1045249613, %v20_v1 }
   0x3   :  { %v22_v6 = vld [vmem:[%s422_s1 + $0xc] sm:$0xf]  ;;  %vm37_vm2 = vcmp.gt.bf16.partialorder %v21_v2, 0  ;;  %v53_v7 = vmul.bf16 1045249613, %v21_v2  ;;  %v304_v8 = vld [vmem:[%s423_s0] sm:$0xff]  }
   0x4   :  { %v67_v9 = vsel %vm35_vm0, %v19_v0, %v51_v4  ;;  %v68_v10 = vsel %vm36_vm1, %v20_v1, %v52_v5  ;;  %vm38_vm3 = vcmp.gt.bf16.partialorder %v22_v6, 0  ;;  %v54_v11 = vmul.bf16 1045249613, %v22_v6  ;;  %v23_v12 = vld [vmem:[%s422_s1 + $0x10] sm:$0xf]  ;;  %297 = vmatprep.mubr.bf16.mxu0 %v304_v8  ;;  %v196_v21 = vld [vmem:[%s424_s2] sm:$0xff] }
   0x5   :  { %v263_v13 = vcombine.low %v67_v9, %v68_v10  ;;  %v69_v14 = vsel %vm37_vm2, %v21_v2, %v53_v7  ;;  %v24_v15 = vld [vmem:[%s422_s1 + $0x14] sm:$0xf]  ;;  %vm39_vm4 = vcmp.gt.bf16.partialorder %v23_v12, 0  ;;  %v55_v16 = vmul.bf16 1045249613, %v23_v12  ;;  %202 = vperm.xlu0 %302, %v196_v21   ;;  %v199_v26 = vld [vmem:[%s424_s2 + $0x18] sm:$0xff] }
   0x6   :  { %v198_v17 = vld [vmem:[%s424_s2 + $0x10] sm:$0xff]  ;;  %v70_v18 = vsel %vm38_vm3, %v22_v6, %v54_v11  ;;  %vm40_vm5 = vcmp.gt.bf16.partialorder %v24_v15, 0  ;;  %v56_v19 = vmul.bf16 1045249613, %v24_v15  ;;  %v25_v20 = vld [vmem:[%s422_s1 + $0x18] sm:$0xf] }
   0x7   :  { %212 = vperm.xlu1 %303, %v198_v17   ;;  %281 = vmatprep.subr.bf16.mxu0 %v263_v13  ;;  %v264_v22 = vcombine.low %v69_v14, %v70_v18  ;;  %v71_v23 = vsel %vm39_vm4, %v23_v12, %v55_v16  ;;  %v26_v24 = vld [vmem:[%s422_s1 + $0x1c] sm:$0xf]  ;;  %vm41_vm6 = vcmp.gt.bf16.partialorder %v25_v20, 0  ;;  %v57_v25 = vmul.bf16 1045249613, %v25_v20  ;;  %v197_v30 = vld [vmem:[%s424_s2 + $0x8] sm:$0xff] }
   0x8   :  { %282 = vmatpush3.bf16.msra.mxu0 %v263_v13  ;;  %v72_v27 = vsel %vm40_vm5, %v24_v15, %v56_v19  ;;  %vm42_vm7 = vcmp.gt.bf16.partialorder %v26_v24, 0  ;;  %v58_v28 = vmul.bf16 1045249613, %v26_v24  ;;  %v27_v29 = vld [vmem:[%s422_s1 + $0x20] sm:$0xf]  ;;  %v225_v39 = vld [vmem:[%s425_s3 + $0x8] sm:$0xff] }
   0x9   :  { %283 = vmatprep.subr.bf16.mxu0 %v264_v22  ;;  %v265_v31 = vcombine.low %v71_v23, %v72_v27  ;;  %v28_v32 = vld [vmem:[%s422_s1 + $0x24] sm:$0xf]  ;;  %v59_v33 = vmul.bf16 1045249613, %v27_v29  ;;  %v73_v34 = vsel %vm41_vm6, %v25_v20, %v57_v25  ;;  %vm43_vm8 = vcmp.gt.bf16.partialorder %v27_v29, 0  ;;  %207 = vperm.xlu0 %302, %v197_v30   ;;  %v227_v48 = vld [vmem:[%s425_s3 + $0x18] sm:$0xff] }
   0xa   :  { %v74_v35 = vsel %vm42_vm7, %v26_v24, %v58_v28  ;;  %v60_v36 = vmul.bf16 1045249613, %v28_v32  ;;  %vm44_vm9 = vcmp.gt.bf16.partialorder %v28_v32, 0  ;;  %v29_v37 = vld [vmem:[%s422_s1 + $0x28] sm:$0xf]  ;;  %v224_v40 = vld [vmem:[%s425_s3] sm:$0xff] }
   0xb   :  { %217 = vperm.xlu1 %303, %v199_v26   ;;  %v30_v38 = vld [vmem:[%s422_s1 + $0x2c] sm:$0xf]  ;;  %v266_v41 = vcombine.low %v73_v34, %v74_v35  ;;  %v75_v42 = vsel %vm43_vm8, %v27_v29, %v59_v33  ;;  %vm45_vm10 = vcmp.gt.bf16.partialorder %v29_v37, 0  ;;  %v61_v44 = vmul.bf16 1045249613, %v29_v37  ;;  %v226_v49 = vld [vmem:[%s425_s3 + $0x10] sm:$0xff] }
   0xc   :  { %284 = vmatpush3.bf16.msra.mxu0 %v264_v22  ;;  %v76_v43 = vsel %vm44_vm9, %v28_v32, %v60_v36  ;;  %v62_v45 = vmul.bf16 1045249613, %v30_v38  ;;  %vm46_vm11 = vcmp.gt.bf16.partialorder %v30_v38, 0  ;;  %v31_v46 = vld [vmem:[%s422_s1 + $0x30] sm:$0xf]  ;;  %v305_v2 = vld [vmem:[%s423_s0 + $0x8] sm:$0xff]  }
   0xd   :  { %285 = vmatprep.subr.bf16.mxu0 %v265_v31  ;;  %v32_v47 = vld [vmem:[%s422_s1 + $0x34] sm:$0xf]  ;;  %230 = vperm.xlu0 %302, %v224_v40   ;;  %v267_v50 = vcombine.low %v75_v42, %v76_v43  ;;  %v77_v51 = vsel %vm45_vm10, %v29_v37, %v61_v44  ;;  %v63_v53 = vmul.bf16 1045249613, %v31_v46  ;;  %vm47_vm12 = vcmp.gt.bf16.partialorder %v31_v46, 0 }
   0xe   :  { %v78_v52 = vsel %vm46_vm11, %v30_v38, %v62_v45  ;;  %v64_v54 = vmul.bf16 1045249613, %v32_v47  ;;  %vm48_vm13 = vcmp.gt.bf16.partialorder %v32_v47, 0  ;;  %v33_v55 = vld [vmem:[%s422_s1 + $0x38] sm:$0xf]  ;;  %vm252_vm0 = vcmask 15360  }
   0xf   :  { %235 = vperm.xlu1 %303, %v225_v39   ;;  %v34_v56 = vld [vmem:[%s422_s1 + $0x3c] sm:$0xf]  ;;  %v268_v57 = vcombine.low %v77_v51, %v78_v52  ;;  %v79_v58 = vsel %vm47_vm12, %v31_v46, %v63_v53  ;;  %v65_v60 = vmul.bf16 1045249613, %v33_v55  ;;  %vm49_vm14 = vcmp.gt.bf16.partialorder %v33_v55, 0 }
  0x10   :  { %286 = vmatpush3.bf16.msra.mxu0 %v265_v31  ;;  %v80_v59 = vsel %vm48_vm13, %v32_v47, %v64_v54  ;;  %v66_v61 = vmul.bf16 1045249613, %v34_v56  ;;  %vm50_vm15 = vcmp.gt.bf16.partialorder %v34_v56, 0 }
  0x11   :  { %287 = vmatprep.subr.bf16.mxu0 %v266_v41  ;;  %240 = vperm.xlu0 %302, %v226_v49   ;;  %v269_v62 = vcombine.low %v79_v58, %v80_v59  ;;  %v81_v63 = vsel %vm49_vm14, %v33_v55, %v65_v60 }
  0x12   :  { %v82_v0 = vsel %vm50_vm15, %v34_v56, %v66_v61 }
  0x13   :  { %245 = vperm.xlu1 %303, %v227_v48   ;;  %v270_v1 = vcombine.low %v81_v63, %v82_v0 }
  0x14   :  { %288 = vmatpush3.bf16.msra.mxu0 %v266_v41 }
  0x15   :  { %289 = vmatprep.subr.bf16.mxu0 %v267_v50 }
  0x18   :  { %290 = vmatpush3.bf16.msra.mxu0 %v267_v50 }
  0x19   :  { %291 = vmatprep.subr.bf16.mxu0 %v268_v57 }
  0x1c   :  { %292 = vmatpush3.bf16.msra.mxu0 %v268_v57 }
  0x1d   :  { %293 = vmatprep.subr.bf16.mxu0 %v269_v62 }
  0x20   :  { %294 = vmatpush3.bf16.msra.mxu0 %v269_v62 }
  0x21   :  { %295 = vmatprep.subr.bf16.mxu0 %v270_v1 }
  0x24   :  { %296 = vmatpush3.bf16.msra.mxu0 %v270_v1 }
  0x27   :  { %298 = vmatmul.mubr.bf16.vlgmr.msra.gmra.mrb[0].mxu0 %v305_v2 }
  0x84   :  { %v203_v3 = vpop.permute.xlu0 %202 }
  0x86   :  { %v213_v4 = vpop.permute.xlu1 %212 }
  0x88   :  { %v208_v5 = vpop.permute.xlu0 %207 }
  0x8a   :  { %v218_v6 = vpop.permute.xlu1 %217 }
  0x8c   :  { %v231_v7 = vpop.permute.xlu0 %230 }
  0x8e   :  { %v236_v8 = vpop.permute.xlu1 %235 }
  0x90   :  { %v241_v12 = vpop.permute.xlu0 %240 }
  0x92   :  { %v246_v18 = vpop.permute.xlu1 %245 }
  0xfa   :  { %v299_v9 = vpop.f32.mrb[0].mxu0 }
  0xfb   :  { %v222_v10 = vmul.f32 %v299_v9, %v213_v4  ;;  %v181_v11 = vpop.f32.mrb[1].mxu0 }
  0xfc   :  { %v220_v13 = vmul.f32 %v203_v3, %v181_v11  ;;  %v300_v14 = vpop.f32.mrb[2].mxu0 }
  0xfd   :  { %v250_v15 = vadd.f32 %v241_v12, %v222_v10  ;;  %v223_v16 = vmul.f32 %v300_v14, %v218_v6  ;;  %v184_v17 = vpop.f32.mrb[3].mxu0 }
  0xfe   :  { %v248_v19 = vadd.f32 %v231_v7, %v220_v13  ;;  %v221_v20 = vmul.f32 %v208_v5, %v184_v17 }
  0xff   :  { %255 = vst.msk [vmem:[%s426_s4 + $0x10] sm:$0xff] %vm252_vm0, %v250_v15  ;;  %v251_v21 = vadd.f32 %v246_v18, %v223_v16 }
 0x100   :  { %253 = vst.msk [vmem:[%s426_s4] sm:$0xff] %vm252_vm0, %v248_v19  ;;  %v249_v22 = vadd.f32 %v236_v8, %v221_v20 }
 0x101   :  { %256 = vst.msk [vmem:[%s426_s4 + $0x18] sm:$0xff] %vm252_vm0, %v251_v21 }
 0x102   :  { %254 = vst.msk [vmem:[%s426_s4 + $0x8] sm:$0xff] %vm252_vm0, %v249_v22 }

// kernel: turbnet_forward.21
= control target key start
LH: loop header
LB: loop body
LE: loop exit
PB: predicated region body
PF: predicated region fallthrough
CT: control target
= control target key end

     0   :  { %v194_v1 = vmov 0   ;;  %vm48_vm0 = vcmask 261120   ;;  %vm160_vm1 = vcmask 64512   ;;  %s270_s1 = inlined_call_operand.vmem [shape: bf16[32,8], index: 1, kind: input, shape index: {}]   ;;  %s271_s0 = inlined_call_operand.vmem [shape: bf16[32,32], index: 0, kind: input, shape index: {}]   ;;  %s272_s2 = inlined_call_operand.vmem [shape: f32[32,1], index: 2, kind: input, shape index: {}]   ;;  %s273_s3 = inlined_call_operand.vmem [shape: f32[32,1], index: 3, kind: input, shape index: {}]   ;;  %s274_s4 = inlined_call_operand.vmem [shape: f32[32,8], index: 4, kind: output, shape index: {}]  }
   0x1   :  { %v190_v0 = vld [vmem:[%s270_s1] sm:$0xff]   ;;  %189 = vset.pattern.permute.xlu1 %v194_v1  ;;  %188 = vset.pattern.permute.xlu0 %v194_v1  ;;  %v191_v2 = vld [vmem:[%s270_s1 + $0x8] sm:$0xff]   ;;  %v106_v4 = vld [vmem:[%s272_s2 + $0x10] sm:$0xff] }
   0x2   :  { %179 = vmatprep.subr.bf16.mxu0 %v190_v0  ;;  %v192_v3 = vld [vmem:[%s271_s0] sm:$0xff]   ;;  %120 = vperm.xlu1 %189, %v106_v4   ;;  %v193_v6 = vld [vmem:[%s271_s0 + $0x8] sm:$0xff]   ;;  %v107_v7 = vld [vmem:[%s272_s2 + $0x18] sm:$0xff] }
   0x3   :  { %180 = vmatpush3.bf16.msra.mxu0 %v190_v0  ;;  %183 = vmatprep.mubr.msk.bf16.mxu0 %vm48_vm0, %v192_v3  ;;  %v104_v5 = vld [vmem:[%s272_s2] sm:$0xff]  ;;  %v105_v8 = vld [vmem:[%s272_s2 + $0x8] sm:$0xff]  ;;  %v135_v11 = vld [vmem:[%s273_s3 + $0x18] sm:$0xff] }
   0x4   :  { %181 = vmatprep.subr.bf16.mxu0 %v191_v2  ;;  %110 = vperm.xlu0 %188, %v104_v5   ;;  %v133_v9 = vld [vmem:[%s273_s3 + $0x8] sm:$0xff]  ;;  %v132_v10 = vld [vmem:[%s273_s3] sm:$0xff]  ;;  %v134_v12 = vld [vmem:[%s273_s3 + $0x10] sm:$0xff] }
   0x6   :  { %125 = vperm.xlu1 %189, %v107_v7  }
   0x7   :  { %182 = vmatpush3.bf16.msra.mxu0 %v191_v2 }
   0x8   :  { %115 = vperm.xlu0 %188, %v105_v8  }
   0xa   :  { %184 = vmatmul.mubr.msk.bf16.vlgmr.msra.gmra.mrb[0].mxu0 %vm48_vm0, %v193_v6  ;;  %143 = vperm.xlu1 %189, %v133_v9  }
   0xc   :  { %138 = vperm.xlu0 %188, %v132_v10  }
   0xe   :  { %153 = vperm.xlu1 %189, %v135_v11  }
  0x10   :  { %148 = vperm.xlu0 %188, %v134_v12  }
  0x81   :  { %v121_v14 = vpop.permute.xlu1 %120 }
  0x83   :  { %v111_v13 = vpop.permute.xlu0 %110 }
  0x85   :  { %v126_v16 = vpop.permute.xlu1 %125 }
  0x87   :  { %v116_v15 = vpop.permute.xlu0 %115 }
  0x89   :  { %v144_v18 = vpop.permute.xlu1 %143 }
  0x8b   :  { %v139_v17 = vpop.permute.xlu0 %138 }
  0x8d   :  { %v154_v28 = vpop.permute.xlu1 %153 }
  0x8f   :  { %v149_v22 = vpop.permute.xlu0 %148 }
  0xdd   :  { %v185_v19 = vpop.f32.mrb[0].mxu0 }
  0xde   :  { %v130_v20 = vmul.f32 %v185_v19, %v121_v14  ;;  %v89_v21 = vpop.f32.mrb[1].mxu0 }
  0xdf   :  { %v128_v23 = vmul.f32 %v111_v13, %v89_v21  ;;  %v186_v24 = vpop.f32.mrb[2].mxu0 }
  0xe0   :  { %v158_v25 = vadd.f32 %v149_v22, %v130_v20  ;;  %v131_v26 = vmul.f32 %v186_v24, %v126_v16  ;;  %v92_v27 = vpop.f32.mrb[3].mxu0 }
  0xe1   :  { %v156_v29 = vadd.f32 %v139_v17, %v128_v23  ;;  %v129_v30 = vmul.f32 %v116_v15, %v92_v27 }
  0xe2   :  { %163 = vst.msk [vmem:[%s274_s4 + $0x10] sm:$0xff] %vm160_vm1, %v158_v25  ;;  %v159_v31 = vadd.f32 %v154_v28, %v131_v26 }
  0xe3   :  { %161 = vst.msk [vmem:[%s274_s4] sm:$0xff] %vm160_vm1, %v156_v29  ;;  %v157_v32 = vadd.f32 %v144_v18, %v129_v30 }
  0xe4   :  { %164 = vst.msk [vmem:[%s274_s4 + $0x18] sm:$0xff] %vm160_vm1, %v159_v31 }
  0xe5   :  { %162 = vst.msk [vmem:[%s274_s4 + $0x8] sm:$0xff] %vm160_vm1, %v157_v32 }

// kernel: turbnet_forward.22
= control target key start
LH: loop header
LB: loop body
LE: loop exit
PB: predicated region body
PF: predicated region fallthrough
CT: control target
= control target key end

     0   :  { %v220_v1 = vmov 0   ;;  %vm64_vm0 = vcmask 523264   ;;  %vm176_vm1 = vcmask 261120   ;;  %s302_s1 = inlined_call_operand.vmem [shape: bf16[64,32], index: 1, kind: input, shape index: {}]   ;;  %s303_s0 = inlined_call_operand.vmem [shape: bf16[32,64], index: 0, kind: input, shape index: {}]   ;;  %s304_s2 = inlined_call_operand.vmem [shape: f32[32,1], index: 2, kind: input, shape index: {}]   ;;  %s305_s3 = inlined_call_operand.vmem [shape: f32[32,1], index: 3, kind: input, shape index: {}]   ;;  %s306_s4 = inlined_call_operand.vmem [shape: f32[32,32], index: 4, kind: output, shape index: {}]  }
   0x1   :  { %v214_v0 = vld [vmem:[%s302_s1] sm:$0xff]   ;;  %213 = vset.pattern.permute.xlu1 %v220_v1  ;;  %212 = vset.pattern.permute.xlu0 %v220_v1  ;;  %v215_v2 = vld [vmem:[%s302_s1 + $0x8] sm:$0xff]   ;;  %v216_v3 = vld [vmem:[%s302_s1 + $0x10] sm:$0xff]  }
   0x2   :  { %199 = vmatprep.subr.bf16.mxu0 %v214_v0  ;;  %v218_v4 = vld [vmem:[%s303_s0] sm:$0xff]   ;;  %v122_v5 = vld [vmem:[%s304_s2 + $0x10] sm:$0xff]  ;;  %v217_v7 = vld [vmem:[%s302_s1 + $0x18] sm:$0xff]  }
   0x3   :  { %200 = vmatpush3.bf16.msra.mxu0 %v214_v0  ;;  %207 = vmatprep.mubr.msk.bf16.mxu0 %vm64_vm0, %v218_v4  ;;  %v120_v6 = vld [vmem:[%s304_s2] sm:$0xff]  ;;  %v123_v8 = vld [vmem:[%s304_s2 + $0x18] sm:$0xff]  ;;  %v121_v9 = vld [vmem:[%s304_s2 + $0x8] sm:$0xff] }
   0x4   :  { %201 = vmatprep.subr.bf16.mxu0 %v215_v2  ;;  %136 = vperm.xlu1 %213, %v122_v5   ;;  %v149_v10 = vld [vmem:[%s305_s3 + $0x8] sm:$0xff]  ;;  %v148_v11 = vld [vmem:[%s305_s3] sm:$0xff]  ;;  %v151_v13 = vld [vmem:[%s305_s3 + $0x18] sm:$0xff] }
   0x5   :  { %126 = vperm.xlu0 %212, %v120_v6   ;;  %v219_v12 = vld [vmem:[%s303_s0 + $0x8] sm:$0xff]   ;;  %v150_v14 = vld [vmem:[%s305_s3 + $0x10] sm:$0xff] }
   0x7   :  { %202 = vmatpush3.bf16.msra.mxu0 %v215_v2 }
   0x8   :  { %203 = vmatprep.subr.bf16.mxu0 %v216_v3  ;;  %141 = vperm.xlu1 %213, %v123_v8  }
   0x9   :  { %131 = vperm.xlu0 %212, %v121_v9  }
   0xb   :  { %204 = vmatpush3.bf16.msra.mxu0 %v216_v3 }
   0xc   :  { %205 = vmatprep.subr.bf16.mxu0 %v217_v7  ;;  %159 = vperm.xlu1 %213, %v149_v10  }
   0xd   :  { %154 = vperm.xlu0 %212, %v148_v11  }
   0xf   :  { %206 = vmatpush3.bf16.msra.mxu0 %v217_v7 }
  0x10   :  { %169 = vperm.xlu1 %213, %v151_v13  }
  0x11   :  { %164 = vperm.xlu0 %212, %v150_v14  }
  0x12   :  { %208 = vmatmul.mubr.msk.bf16.vlgmr.msra.gmra.mrb[0].mxu0 %vm64_vm0, %v219_v12 }
  0x83   :  { %v137_v16 = vpop.permute.xlu1 %136 }
  0x84   :  { %v127_v15 = vpop.permute.xlu0 %126 }
  0x87   :  { %v142_v18 = vpop.permute.xlu1 %141 }
  0x88   :  { %v132_v17 = vpop.permute.xlu0 %131 }
  0x8b   :  { %v160_v20 = vpop.permute.xlu1 %159 }
  0x8c   :  { %v155_v19 = vpop.permute.xlu0 %154 }
  0x8f   :  { %v170_v30 = vpop.permute.xlu1 %169 }
  0x90   :  { %v165_v24 = vpop.permute.xlu0 %164 }
  0xe5   :  { %v209_v21 = vpop.f32.mrb[0].mxu0 }
  0xe6   :  { %v146_v22 = vmul.f32 %v209_v21, %v137_v16  ;;  %v105_v23 = vpop.f32.mrb[1].mxu0 }
  0xe7   :  { %v144_v25 = vmul.f32 %v127_v15, %v105_v23  ;;  %v210_v26 = vpop.f32.mrb[2].mxu0 }
  0xe8   :  { %v174_v27 = vadd.f32 %v165_v24, %v146_v22  ;;  %v147_v28 = vmul.f32 %v210_v26, %v142_v18  ;;  %v108_v29 = vpop.f32.mrb[3].mxu0 }
  0xe9   :  { %v172_v31 = vadd.f32 %v155_v19, %v144_v25  ;;  %v145_v32 = vmul.f32 %v132_v17, %v108_v29 }
  0xea   :  { %179 = vst.msk [vmem:[%s306_s4 + $0x10] sm:$0xff] %vm176_vm1, %v174_v27  ;;  %v175_v33 = vadd.f32 %v170_v30, %v147_v28 }
  0xeb   :  { %177 = vst.msk [vmem:[%s306_s4] sm:$0xff] %vm176_vm1, %v172_v31  ;;  %v173_v34 = vadd.f32 %v160_v20, %v145_v32 }
  0xec   :  { %180 = vst.msk [vmem:[%s306_s4 + $0x18] sm:$0xff] %vm176_vm1, %v175_v33 }
  0xed   :  { %178 = vst.msk [vmem:[%s306_s4 + $0x8] sm:$0xff] %vm176_vm1, %v173_v34 }

// kernel: turbnet_forward.23
= control target key start
LH: loop header
LB: loop body
LE: loop exit
PB: predicated region body
PF: predicated region fallthrough
CT: control target
= control target key end

     0   :  { %v649_v1 = vmov 0   ;;  %v650_v35 = vmov 0.0   ;;  %vm651_vm0 = vmmov 0   ;;  %vm337_vm1 = vcmask 523264   ;;  %s818_s1 = inlined_call_operand.vmem [shape: bf16[576,128], index: 1, kind: input, shape index: {}]   ;;  %s819_s0 = inlined_call_operand.vmem [shape: bf16[16,576], index: 0, kind: input, shape index: {}]   ;;  %s820_s2 = inlined_call_operand.vmem [shape: f32[16,1], index: 2, kind: input, shape index: {}]   ;;  %s821_s3 = inlined_call_operand.vmem [shape: f32[16,1], index: 3, kind: input, shape index: {}]   ;;  %s822_s4 = inlined_call_operand.vmem [shape: f32[16,128], index: 4, kind: output, shape index: {}]  }
   0x1   :  { %v606_v0 = vld [vmem:[%s818_s1 + $0x40] sm:$0xff]   ;;  %604 = vset.pattern.permute.xlu0 %v649_v1  ;;  %605 = vset.pattern.permute.xlu1 %v649_v1  ;;  %v610_v5 = vld [vmem:[%s818_s1 + $0x48] sm:$0xff]   ;;  %v614_v9 = vld [vmem:[%s818_s1 + $0x50] sm:$0xff]  }
   0x2   :  { %v607_v2 = vld [vmem:[%s818_s1 + $0xc0] sm:$0xff]   ;;  %540 = vmatprep.subr.bf16.mxu0 %v606_v0  ;;  %v611_v6 = vld [vmem:[%s818_s1 + $0xc8] sm:$0xff]   ;;  %v615_v10 = vld [vmem:[%s818_s1 + $0xd0] sm:$0xff]  }
   0x3   :  { %v608_v3 = vld [vmem:[%s818_s1] sm:$0xff]   ;;  %562 = vmatprep.subr.bf16.mxu1 %v607_v2  ;;  %v612_v7 = vld [vmem:[%s818_s1 + $0x8] sm:$0xff]   ;;  %v616_v11 = vld [vmem:[%s818_s1 + $0x10] sm:$0xff]  }
   0x4   :  { %v609_v4 = vld [vmem:[%s818_s1 + $0x80] sm:$0xff]   ;;  %541 = vmatpush3.bf16.msra.mxu0 %v608_v3  ;;  %v613_v8 = vld [vmem:[%s818_s1 + $0x88] sm:$0xff]   ;;  %v617_v12 = vld [vmem:[%s818_s1 + $0x90] sm:$0xff]  }
   0x5   :  { %563 = vmatpush3.bf16.msra.mxu1 %v609_v4  ;;  %542 = vmatprep.subr.bf16.mxu0 %v610_v5  ;;  %v618_v13 = vld [vmem:[%s818_s1 + $0x58] sm:$0xff]   ;;  %v622_v17 = vld [vmem:[%s818_s1 + $0x60] sm:$0xff]   ;;  %v626_v21 = vld [vmem:[%s818_s1 + $0x68] sm:$0xff]  }
   0x6   :  { %564 = vmatprep.subr.bf16.mxu1 %v611_v6  ;;  %v619_v14 = vld [vmem:[%s818_s1 + $0xd8] sm:$0xff]   ;;  %v623_v18 = vld [vmem:[%s818_s1 + $0xe0] sm:$0xff]   ;;  %v627_v22 = vld [vmem:[%s818_s1 + $0xe8] sm:$0xff]  }
   0x7   :  { %v620_v15 = vld [vmem:[%s818_s1 + $0x18] sm:$0xff]   ;;  %v624_v19 = vld [vmem:[%s818_s1 + $0x20] sm:$0xff]   ;;  %v628_v23 = vld [vmem:[%s818_s1 + $0x28] sm:$0xff]  }
   0x8   :  { %543 = vmatpush3.bf16.msra.mxu0 %v612_v7  ;;  %v621_v16 = vld [vmem:[%s818_s1 + $0x98] sm:$0xff]   ;;  %v625_v20 = vld [vmem:[%s818_s1 + $0xa0] sm:$0xff]   ;;  %v629_v24 = vld [vmem:[%s818_s1 + $0xa8] sm:$0xff]  }
   0x9   :  { %565 = vmatpush3.bf16.msra.mxu1 %v613_v8  ;;  %544 = vmatprep.subr.bf16.mxu0 %v614_v9  ;;  %v630_v25 = vld [vmem:[%s818_s1 + $0x70] sm:$0xff]   ;;  %v634_v29 = vld [vmem:[%s818_s1 + $0x78] sm:$0xff]   ;;  %v643_v37 = vld [vmem:[%s819_s0 + $0xc] ss:$20 sps:$4 sm:$0xff]  }
   0xa   :  { %566 = vmatprep.subr.bf16.mxu1 %v615_v10  ;;  %v631_v26 = vld [vmem:[%s818_s1 + $0xf0] sm:$0xff]   ;;  %v635_v30 = vld [vmem:[%s818_s1 + $0xf8] sm:$0xff]   ;;  %v644_v38 = vld [vmem:[%s818_s1 + $0x100] sm:$0xff]   ;;  %414 = vmatprep.mubr.bf16.mxu1 %v643_v37 }
   0xb   :  { %v632_v27 = vld [vmem:[%s818_s1 + $0x30] sm:$0xff]   ;;  %v636_v31 = vld [vmem:[%s818_s1 + $0x38] sm:$0xff]   ;;  %v645_v39 = vld [vmem:[%s818_s1 + $0x108] sm:$0xff]  }
   0xc   :  { %545 = vmatpush3.bf16.msra.mxu0 %v616_v11  ;;  %v633_v28 = vld [vmem:[%s818_s1 + $0xb0] sm:$0xff]   ;;  %v637_v32 = vld [vmem:[%s818_s1 + $0xb8] sm:$0xff]   ;;  %v464_v40 = vld [vmem:[%s820_s2] sm:$0xff] }
   0xd   :  { %567 = vmatpush3.bf16.msra.mxu1 %v617_v12  ;;  %546 = vmatprep.subr.bf16.mxu0 %v618_v13  ;;  %v638_v33 = vld [vmem:[%s819_s0] ss:$20 sps:$4 sm:$0xff]   ;;  %v640_v34 = vld [vmem:[%s819_s0 + $0x4] ss:$20 sps:$4 sm:$0xff]   ;;  %v641_v36 = vld [vmem:[%s819_s0 + $0x8] ss:$20 sps:$4 sm:$0xff]  }
   0xe   :  { %568 = vmatprep.subr.bf16.mxu1 %v619_v14  ;;  %373 = vmatprep.mubr.bf16.mxu0 %v640_v34  ;;  %v478_v41 = vld [vmem:[%s821_s3] sm:$0xff]  ;;  %v646_v42 = vld [vmem:[%s818_s1 + $0x110] sm:$0xff]   ;;  %v465_v43 = vld [vmem:[%s820_s2 + $0x8] sm:$0xff] }
   0xf   :  { %468 = vperm.xlu0 %604, %v464_v40   ;;  %482 = vperm.xlu1 %605, %v478_v41   ;;  %v479_v44 = vld [vmem:[%s821_s3 + $0x8] sm:$0xff]  ;;  %v647_v45 = vld [vmem:[%s818_s1 + $0x118] sm:$0xff]   ;;  %v648_v46 = vld [vmem:[%s819_s0 + $0x10] ss:$20 sps:$4 sm:$0xff]  }
  0x10   :  { %547 = vmatpush3.bf16.msra.mxu0 %v620_v15 }
  0x11   :  { %569 = vmatpush3.bf16.msra.mxu1 %v621_v16  ;;  %548 = vmatprep.subr.bf16.mxu0 %v622_v17 }
  0x12   :  { %570 = vmatprep.subr.bf16.mxu1 %v623_v18 }
  0x13   :  { %473 = vperm.xlu0 %604, %v465_v43   ;;  %487 = vperm.xlu1 %605, %v479_v44  }
  0x14   :  { %549 = vmatpush3.bf16.msra.mxu0 %v624_v19 }
  0x15   :  { %571 = vmatpush3.bf16.msra.mxu1 %v625_v20  ;;  %550 = vmatprep.subr.bf16.mxu0 %v626_v21 }
  0x16   :  { %572 = vmatprep.subr.bf16.mxu1 %v627_v22 }
  0x18   :  { %551 = vmatpush3.bf16.msra.mxu0 %v628_v23 }
  0x19   :  { %573 = vmatpush3.bf16.msra.mxu1 %v629_v24  ;;  %552 = vmatprep.subr.bf16.mxu0 %v630_v25 }
  0x1a   :  { %574 = vmatprep.subr.bf16.mxu1 %v631_v26 }
  0x1c   :  { %553 = vmatpush3.bf16.msra.mxu0 %v632_v27 }
  0x1d   :  { %575 = vmatpush3.bf16.msra.mxu1 %v633_v28  ;;  %554 = vmatprep.subr.bf16.mxu0 %v634_v29 }
  0x1e   :  { %576 = vmatprep.subr.bf16.mxu1 %v635_v30 }
  0x20   :  { %555 = vmatpush3.bf16.msra.mxu0 %v636_v31 }
  0x21   :  { %577 = vmatpush3.bf16.msra.mxu1 %v637_v32  ;;  %589 = vmatprep.subr.bf16.mxu0 %v650_v35 }
  0x23   :  { %374 = vmatmul.mubr.bf16.vlgmr.msra.gmra.mrb[0].mxu0 %v638_v33 }
  0x24   :  { %415 = vmatmul.mubr.bf16.vlgmr.msra.gmra.mrb[0].mxu1 %v641_v36  ;;  %590 = vmatpush3.bf16.msra.mxu0 %v644_v38 }
  0x25   :  { %591 = vmatprep.subr.bf16.mxu0 %v650_v35  ;;  %597 = vmatprep.mubr.msk.bf16.mxu0 %vm651_vm0, %v650_v35 }
  0x28   :  { %592 = vmatpush3.bf16.msra.mxu0 %v645_v39 }
  0x29   :  { %593 = vmatprep.subr.bf16.mxu0 %v650_v35 }
  0x2c   :  { %594 = vmatpush3.bf16.msra.mxu0 %v646_v42 }
  0x2d   :  { %595 = vmatprep.subr.bf16.mxu0 %v650_v35 }
  0x30   :  { %596 = vmatpush3.bf16.msra.mxu0 %v647_v45 }
  0x33   :  { %598 = vmatmul.mubr.msk.bf16.vlgmr.msra.gmra.mrb[4].mxu0 %vm337_vm1, %v648_v46 }
  0x8e   :  { %v469_v61 = vpop.permute.xlu0 %468  ;;  %v483_v62 = vpop.permute.xlu1 %482 }
  0x92   :  { %v474_v6 = vpop.permute.xlu0 %473  ;;  %v488_v9 = vpop.permute.xlu1 %487 }
  0xf6   :  { %v556_v47 = vpop.f32.mrb[0].mxu0 }
  0xf7   :  { %v578_v48 = vpop.f32.mrb[0].mxu1  ;;  %v557_v49 = vpop.f32.mrb[1].mxu0 }
  0xf8   :  { %v558_v50 = vadd.f32 %v557_v49, %v556_v47  ;;  %v579_v51 = vpop.f32.mrb[1].mxu1  ;;  %v559_v52 = vpop.f32.mrb[2].mxu0 }
  0xf9   :  { %v580_v53 = vadd.f32 %v579_v51, %v578_v48  ;;  %v581_v54 = vpop.f32.mrb[2].mxu1  ;;  %v560_v55 = vpop.f32.mrb[3].mxu0 }
  0xfa   :  { %v561_v56 = vadd.f32 %v560_v55, %v559_v52  ;;  %v582_v57 = vpop.f32.mrb[3].mxu1 }
  0xfb   :  { %v583_v58 = vadd.f32 %v582_v57, %v581_v54  ;;  %v417_v59 = vadd.f32 %v580_v53, %v558_v50 }
  0xfd   :  { %v420_v60 = vadd.f32 %v583_v58, %v561_v56 }
 0x106   :  { %v457_v63 = vpop.f32.mrb[4].mxu0 }
 0x107   :  { %v458_v0 = vadd.f32 %v457_v63, %v417_v59  ;;  %v599_v1 = vpop.f32.mrb[5].mxu0 }
 0x108   :  { %v460_v2 = vpop.f32.mrb[6].mxu0 }
 0x109   :  { %v476_v3 = vmul.f32 %v469_v61, %v458_v0  ;;  %v461_v4 = vadd.f32 %v460_v2, %v420_v60  ;;  %v600_v5 = vpop.f32.mrb[7].mxu0 }
 0x10b   :  { %v490_v7 = vadd.f32 %v483_v62, %v476_v3  ;;  %v477_v8 = vmul.f32 %v474_v6, %v461_v4 }
 0x10d   :  { %492 = vst [vmem:[%s822_s4] sm:$0xff] %v490_v7  ;;  %v491_v10 = vadd.f32 %v488_v9, %v477_v8 }
 0x10f   :  { %493 = vst [vmem:[%s822_s4 + $0x8] sm:$0xff] %v491_v10 }

// kernel: turbnet_forward.24
= control target key start
LH: loop header
LB: loop body
LE: loop exit
PB: predicated region body
PF: predicated region fallthrough
CT: control target
= control target key end

     0   :  { %s959_s15 = smov 0   ;;  %s961_s16 = smov 0   ;;  %s1143_s0 = inlined_call_operand.vmem [shape: bf16[8,288], index: 0, kind: input, shape index: {}]   ;;  %s1144_s1 = inlined_call_operand.vmem [shape: bf16[288,512], index: 1, kind: input, shape index: {}]   ;;  %s1145_s2 = inlined_call_operand.vmem [shape: f32[8,1], index: 2, kind: input, shape index: {}]   ;;  %s1146_s3 = inlined_call_operand.vmem [shape: f32[8,1], index: 3, kind: input, shape index: {}]   ;;  %s1147_s4 = inlined_call_operand.vmem [shape: f32[8,512], index: 4, kind: output, shape index: {}]  }
   0x1   :  { %s963_s17 = smov 0  }
   0x2 LB: > { %s770_s18 = sadd.s32 4294967295, %s931_s17   ;;  %s976_s19 = sadd.s32 1, %s931_s17   ;;  %s931_s17 = sphi %s963_s17, %s1150_s17   ;;  %s927_s16 = sphi %s961_s16, %s1149_s16   ;;  %s923_s15 = sphi %s959_s15, %s1148_s15  }
   0x3   : > { %s39_s20 = ssub.s32 %s931_s17, %s976_s19  ;;  %s42_s21 = sadd.s32 1, %s927_s16 }
   0x4   : > { %p40_p0 = scmp.eq.s32.totalorder %s39_s20, 0  ;;  %p49_p1 = scmp.ne.s32.totalorder %s927_s16, %s923_s15 }
   0x5   : > { %p50_p2 = scmp.eq.s32.totalorder %s931_s17, 0  ;;  %p773_p4 = scmp.ge.s32.totalorder %s931_s17, 2 }
   0x6   : > { %s985_s22 = scalar_select %p40_p0, %s927_s16, %s42_s21  }
   0x7   : > { %p51_p3 = por %p50_p2, %p49_p1  ;;  %152 = sbr.rel (%p773_p4) target bundleno = 36 (0x24), region = 28 }
   0xe   : > { %155 = sbr.rel (!%p51_p3) target bundleno = 36 (0x24), region = 32  ;;  %s157_s23 = sand.u32 (%p51_p3), 1, %s927_s16  }
   0xf   : > { %s821_s24 = sshll.u32 (%p51_p3), %s931_s17, 3  ;;  %s824_s25 = smul.u32 (%p51_p3), 288, %s157_s23 }
  0x10   : > { %s993_s28 = scalar_lea.vmem (%p51_p3), %s1144_s1, %s821_s24 }
  0x11   : > { %v260_v0 = vld [vmem:[%s993_s28] sm:$0xff] (%p51_p3)  ;;  %v262_v1 = vld [vmem:[%s993_s28 + $0x10] sm:$0xff] (%p51_p3)  ;;  %s1001_s29 = scalar_lea.vmem (%p51_p3), [#allocation2], %s824_s25 }
  0x12   : > { %v264_v2 = vld [vmem:[%s993_s28 + $0x20] sm:$0xff] (%p51_p3)  ;;  %v266_v3 = vld [vmem:[%s993_s28 + $0x30] sm:$0xff] (%p51_p3)  ;;  %261 = vst [vmem:[%s1001_s29] sm:$0xff] (%p51_p3), %v260_v0  ;;  %263 = vst [vmem:[%s1001_s29 + $0x8] sm:$0xff] (%p51_p3), %v262_v1 }
  0x13   : > { %v268_v4 = vld [vmem:[%s993_s28 + $0x40] sm:$0xff] (%p51_p3)  ;;  %v270_v5 = vld [vmem:[%s993_s28 + $0x50] sm:$0xff] (%p51_p3)  ;;  %265 = vst [vmem:[%s1001_s29 + $0x10] sm:$0xff] (%p51_p3), %v264_v2  ;;  %267 = vst [vmem:[%s1001_s29 + $0x18] sm:$0xff] (%p51_p3), %v266_v3 }
  0x14   : > { %269 = vst [vmem:[%s1001_s29 + $0x20] sm:$0xff] (%p51_p3), %v268_v4  ;;  %271 = vst [vmem:[%s1001_s29 + $0x28] sm:$0xff] (%p51_p3), %v270_v5  ;;  %v272_v6 = vld [vmem:[%s993_s28 + $0x60] sm:$0xff] (%p51_p3)  ;;  %v274_v7 = vld [vmem:[%s993_s28 + $0x70] sm:$0xff] (%p51_p3) }
  0x15   : > { %v276_v8 = vld [vmem:[%s993_s28 + $0x80] sm:$0xff]  ;;  %273 = vst [vmem:[%s1001_s29 + $0x30] sm:$0xff] %v272_v6  ;;  %275 = vst [vmem:[%s1001_s29 + $0x38] sm:$0xff] %v274_v7  ;;  %v278_v9 = vld [vmem:[%s993_s28 + $0x90] sm:$0xff] }
  0x16   : > { %277 = vst [vmem:[%s1001_s29 + $0x40] sm:$0xff] %v276_v8  ;;  %v280_v10 = vld [vmem:[%s993_s28 + $0xa0] sm:$0xff]  ;;  %v282_v11 = vld [vmem:[%s993_s28 + $0xb0] sm:$0xff]  ;;  %279 = vst [vmem:[%s1001_s29 + $0x48] sm:$0xff] %v278_v9 }
  0x17   : > { %281 = vst [vmem:[%s1001_s29 + $0x50] sm:$0xff] %v280_v10  ;;  %283 = vst [vmem:[%s1001_s29 + $0x58] sm:$0xff] %v282_v11  ;;  %v284_v12 = vld [vmem:[%s993_s28 + $0xc0] sm:$0xff]  ;;  %v286_v13 = vld [vmem:[%s993_s28 + $0xd0] sm:$0xff] }
  0x18   : > { %v288_v14 = vld [vmem:[%s993_s28 + $0xe0] sm:$0xff]  ;;  %285 = vst [vmem:[%s1001_s29 + $0x60] sm:$0xff] %v284_v12  ;;  %287 = vst [vmem:[%s1001_s29 + $0x68] sm:$0xff] %v286_v13  ;;  %v290_v15 = vld [vmem:[%s993_s28 + $0xf0] sm:$0xff] }
  0x19   : > { %289 = vst [vmem:[%s1001_s29 + $0x70] sm:$0xff] %v288_v14  ;;  %v292_v16 = vld [vmem:[%s993_s28 + $0x100] sm:$0xff]  ;;  %v294_v17 = vld [vmem:[%s993_s28 + $0x110] sm:$0xff]  ;;  %291 = vst [vmem:[%s1001_s29 + $0x78] sm:$0xff] %v290_v15 }
  0x1a   : > { %293 = vst [vmem:[%s1001_s29 + $0x80] sm:$0xff] %v292_v16  ;;  %295 = vst [vmem:[%s1001_s29 + $0x88] sm:$0xff] %v294_v17  ;;  %v296_v18 = vld [vmem:[%s993_s28 + $0x120] sm:$0xff]  ;;  %v298_v19 = vld [vmem:[%s993_s28 + $0x130] sm:$0xff] }
  0x1b   : > { %v300_v20 = vld [vmem:[%s993_s28 + $0x140] sm:$0xff]  ;;  %297 = vst [vmem:[%s1001_s29 + $0x90] sm:$0xff] %v296_v18  ;;  %299 = vst [vmem:[%s1001_s29 + $0x98] sm:$0xff] %v298_v19  ;;  %v302_v21 = vld [vmem:[%s993_s28 + $0x150] sm:$0xff] }
  0x1c   : > { %301 = vst [vmem:[%s1001_s29 + $0xa0] sm:$0xff] %v300_v20  ;;  %v304_v22 = vld [vmem:[%s993_s28 + $0x160] sm:$0xff]  ;;  %v306_v23 = vld [vmem:[%s993_s28 + $0x170] sm:$0xff]  ;;  %303 = vst [vmem:[%s1001_s29 + $0xa8] sm:$0xff] %v302_v21 }
  0x1d   : > { %305 = vst [vmem:[%s1001_s29 + $0xb0] sm:$0xff] %v304_v22  ;;  %307 = vst [vmem:[%s1001_s29 + $0xb8] sm:$0xff] %v306_v23  ;;  %v308_v24 = vld [vmem:[%s993_s28 + $0x180] sm:$0xff]  ;;  %v310_v25 = vld [vmem:[%s993_s28 + $0x190] sm:$0xff] }
  0x1e   : > { %v312_v26 = vld [vmem:[%s993_s28 + $0x1a0] sm:$0xff]  ;;  %309 = vst [vmem:[%s1001_s29 + $0xc0] sm:$0xff] %v308_v24  ;;  %311 = vst [vmem:[%s1001_s29 + $0xc8] sm:$0xff] %v310_v25  ;;  %v314_v27 = vld [vmem:[%s993_s28 + $0x1b0] sm:$0xff] }
  0x1f   : > { %313 = vst [vmem:[%s1001_s29 + $0xd0] sm:$0xff] %v312_v26  ;;  %v316_v28 = vld [vmem:[%s993_s28 + $0x1c0] sm:$0xff]  ;;  %v318_v29 = vld [vmem:[%s993_s28 + $0x1d0] sm:$0xff]  ;;  %315 = vst [vmem:[%s1001_s29 + $0xd8] sm:$0xff] %v314_v27 }
  0x20   : > { %317 = vst [vmem:[%s1001_s29 + $0xe0] sm:$0xff] %v316_v28  ;;  %319 = vst [vmem:[%s1001_s29 + $0xe8] sm:$0xff] %v318_v29  ;;  %v320_v30 = vld [vmem:[%s993_s28 + $0x1e0] sm:$0xff]  ;;  %v322_v31 = vld [vmem:[%s993_s28 + $0x1f0] sm:$0xff] }
  0x21   : > { %v324_v32 = vld [vmem:[%s993_s28 + $0x200] sm:$0xff]  ;;  %321 = vst [vmem:[%s1001_s29 + $0xf0] sm:$0xff] %v320_v30  ;;  %323 = vst [vmem:[%s1001_s29 + $0xf8] sm:$0xff] %v322_v31  ;;  %v326_v33 = vld [vmem:[%s993_s28 + $0x210] sm:$0xff] }
  0x22   : > { %325 = vst [vmem:[%s1001_s29 + $0x100] sm:$0xff] %v324_v32  ;;  %v328_v34 = vld [vmem:[%s993_s28 + $0x220] sm:$0xff]  ;;  %v330_v35 = vld [vmem:[%s993_s28 + $0x230] sm:$0xff]  ;;  %327 = vst [vmem:[%s1001_s29 + $0x108] sm:$0xff] %v326_v33 }
  0x23   : > { %329 = vst [vmem:[%s1001_s29 + $0x110] sm:$0xff] %v328_v34  ;;  %331 = vst [vmem:[%s1001_s29 + $0x118] sm:$0xff] %v330_v35 }
  0x24 PF: > { %p776_p5 = scmp.ge.s32.totalorder %s931_s17, 1  ;;  %p336_p6 = scmp.lt.s32.totalorder %s931_s17, 3 }
  0x26   : > { %p337_p7 = pnand %p776_p5, %p336_p6 }
  0x27   : > { %s343_s30 = sand.u32 (!%p337_p7), 1, %s923_s15   ;;  %v933_v36 = vmov (!%p337_p7), 0   ;;  %v1075_v37 = vld [vmem:[%s1143_s0] sm:$0xff] (!%p337_p7)  ;;  %v906_v60 = vld [vmem:[%s1143_s0 + $0x8] ss:$0 sps:$4 sm:$0xff] (!%p337_p7)   ;;  %vm604_vm0 = vcmask (!%p337_p7), 261120  }
  0x28   : > { %340 = sbr.rel (%p337_p7) target bundleno = 329 (0x149), region = 70  ;;  %681 = vmatprep.mubr.bf16.mxu0 (!%p337_p7), %v933_v36  ;;  %851 = vset.pattern.permute.xlu0 (!%p337_p7), %v933_v36  ;;  %v690_v38 = vld [vmem:[%s1145_s2] sm:$0xff] (!%p337_p7)  ;;  %v780_v39 = vcombine.high (!%p337_p7), %v1075_v37, %v1075_v37  ;;  %v779_v14 = vcombine.low (!%p337_p7), %v1075_v37, %v1075_v37  ;;  %s777_s15 = sshll.u32 (!%p337_p7), %s770_s18, 1 }
  0x29   : > { %s825_s5 = smul.u32 (!%p337_p7), 288, %s343_s30  ;;  %693 = vperm.xlu0 (!%p337_p7), %851, %v690_v38   ;;  %v698_v40 = vld [vmem:[%s1146_s3] sm:$0xff] (!%p337_p7)  ;;  %p370_p8 = scmp.lt.s32.totalorder (!%p337_p7), %s777_s15, 3 }
  0x2a   : > { %640 = vmatprep.mubr.bf16.mxu1 (!%p337_p7), %v780_v39 }
  0x2b   : > { %s1085_s12 = scalar_lea.vmem (!%p337_p7), [#allocation2], %s825_s5 }
  0x2c   : > { %v852_v41 = vld [vmem:[%s1085_s12 + $0x4] ss:$8 sps:$4 sm:$0xff] (!%p337_p7)   ;;  %v854_v42 = vld [vmem:[%s1085_s12] ss:$8 sps:$4 sm:$0xff] (!%p337_p7)   ;;  %v855_v43 = vld [vmem:[%s1085_s12 + $0x14] ss:$8 sps:$4 sm:$0xff] (!%p337_p7)  }
  0x2d   : > { %608 = vmatprep.subr.bf16.mxu1 (!%p337_p7), %v852_v41  ;;  %701 = vperm.xlu0 (!%p337_p7), %851, %v698_v40   ;;  %v857_v44 = vld [vmem:[%s1085_s12 + $0x10] ss:$8 sps:$4 sm:$0xff] (!%p337_p7)   ;;  %v858_v45 = vld [vmem:[%s1085_s12 + $0x24] ss:$8 sps:$4 sm:$0xff] (!%p337_p7)   ;;  %v860_v46 = vld [vmem:[%s1085_s12 + $0x20] ss:$8 sps:$4 sm:$0xff] (!%p337_p7)  }
  0x2e   : > { %609 = vmatpush1.bf16.msra.mxu1 (!%p337_p7), %v854_v42  ;;  %v861_v47 = vld [vmem:[%s1085_s12 + $0x34] ss:$8 sps:$4 sm:$0xff] (!%p337_p7)   ;;  %v863_v48 = vld [vmem:[%s1085_s12 + $0x30] ss:$8 sps:$4 sm:$0xff] (!%p337_p7)   ;;  %v864_v49 = vld [vmem:[%s1085_s12 + $0x44] ss:$8 sps:$4 sm:$0xff] (!%p337_p7)  }
  0x2f   : > { %610 = vmatprep.subr.bf16.mxu1 %v855_v43  ;;  %v866_v50 = vld [vmem:[%s1085_s12 + $0x40] ss:$8 sps:$4 sm:$0xff]   ;;  %v867_v51 = vld [vmem:[%s1085_s12 + $0x54] ss:$8 sps:$4 sm:$0xff]   ;;  %v869_v52 = vld [vmem:[%s1085_s12 + $0x50] ss:$8 sps:$4 sm:$0xff]  }
  0x30   : > { %v894_v53 = vld [vmem:[%s1085_s12 + $0x104] ss:$8 sps:$4 sm:$0xff]   ;;  %v896_v54 = vld [vmem:[%s1085_s12 + $0x100] ss:$8 sps:$4 sm:$0xff]   ;;  %v900_v56 = vld [vmem:[%s1085_s12 + $0x114] ss:$8 sps:$4 sm:$0xff]  }
  0x31   : > { %v870_v55 = vld [vmem:[%s1085_s12 + $0x64] ss:$8 sps:$4 sm:$0xff]   ;;  %649 = vmatprep.subr.bf16.mxu0 %v894_v53  ;;  %v902_v57 = vld [vmem:[%s1085_s12 + $0x110] ss:$8 sps:$4 sm:$0xff]   ;;  %v872_v58 = vld [vmem:[%s1085_s12 + $0x60] ss:$8 sps:$4 sm:$0xff]  }
  0x32   : > { %611 = vmatpush1.bf16.msra.mxu1 %v857_v44  ;;  %650 = vmatpush1.bf16.msra.mxu0 %v896_v54  ;;  %v873_v59 = vld [vmem:[%s1085_s12 + $0x74] ss:$8 sps:$4 sm:$0xff]   ;;  %v875_v61 = vld [vmem:[%s1085_s12 + $0x70] ss:$8 sps:$4 sm:$0xff]   ;;  %v876_v62 = vld [vmem:[%s1085_s12 + $0x84] ss:$8 sps:$4 sm:$0xff]  }
  0x33   : > { %612 = vmatprep.subr.bf16.mxu1 %v858_v45  ;;  %651 = vmatprep.subr.bf16.mxu0 %v900_v56  ;;  %v878_v63 = vld [vmem:[%s1085_s12 + $0x80] ss:$8 sps:$4 sm:$0xff]   ;;  %v879_v0 = vld [vmem:[%s1085_s12 + $0x94] ss:$8 sps:$4 sm:$0xff]   ;;  %v881_v1 = vld [vmem:[%s1085_s12 + $0x90] ss:$8 sps:$4 sm:$0xff]  }
  0x34   : > { %v882_v2 = vld [vmem:[%s1085_s12 + $0xa4] ss:$8 sps:$4 sm:$0xff]   ;;  %v884_v3 = vld [vmem:[%s1085_s12 + $0xa0] ss:$8 sps:$4 sm:$0xff]   ;;  %v885_v4 = vld [vmem:[%s1085_s12 + $0xb4] ss:$8 sps:$4 sm:$0xff]  }
  0x35   : > { %v887_v5 = vld [vmem:[%s1085_s12 + $0xb0] ss:$8 sps:$4 sm:$0xff]   ;;  %v888_v6 = vld [vmem:[%s1085_s12 + $0xc4] ss:$8 sps:$4 sm:$0xff]   ;;  %v890_v7 = vld [vmem:[%s1085_s12 + $0xc0] ss:$8 sps:$4 sm:$0xff]  }
  0x36   : > { %613 = vmatpush1.bf16.msra.mxu1 %v860_v46  ;;  %652 = vmatpush1.bf16.msra.mxu0 %v902_v57  ;;  %v891_v8 = vld [vmem:[%s1085_s12 + $0xd4] ss:$8 sps:$4 sm:$0xff]   ;;  %v893_v9 = vld [vmem:[%s1085_s12 + $0xd0] ss:$8 sps:$4 sm:$0xff]   ;;  %v897_v10 = vld [vmem:[%s1085_s12 + $0xe4] ss:$8 sps:$4 sm:$0xff]  }
  0x37   : > { %614 = vmatprep.subr.bf16.mxu1 %v861_v47  ;;  %v899_v11 = vld [vmem:[%s1085_s12 + $0xe0] ss:$8 sps:$4 sm:$0xff]   ;;  %v903_v12 = vld [vmem:[%s1085_s12 + $0xf4] ss:$8 sps:$4 sm:$0xff]   ;;  %v905_v13 = vld [vmem:[%s1085_s12 + $0xf0] ss:$8 sps:$4 sm:$0xff]  }
  0x38   : > { %s1152_s15 = smov (!%p370_p8, %s777_s15), 3 }
  0x39   : > { %818 = vmatmul.mubr.msk.bf16.vlgmr.msra.gmra.mrb[0].mxu0 %vm604_vm0, %v906_v60  ;;  %s778_s20 = sshll.u32 %s1152_s15, 3 }
  0x3a   : > { %615 = vmatpush1.bf16.msra.mxu1 %v863_v48  ;;  %s373_s24 = scalar_lea.vmem %s1147_s4, %s778_s20 }
  0x3b   : > { %616 = vmatprep.subr.bf16.mxu1 %v864_v49 }
  0x3e   : > { %617 = vmatpush1.bf16.msra.mxu1 %v866_v50 }
  0x3f   : > { %618 = vmatprep.subr.bf16.mxu1 %v867_v51 }
  0x42   : > { %619 = vmatpush1.bf16.msra.mxu1 %v869_v52 }
  0x43   : > { %620 = vmatprep.subr.bf16.mxu1 %v870_v55 }
  0x46   : > { %621 = vmatpush1.bf16.msra.mxu1 %v872_v58 }
  0x47   : > { %622 = vmatprep.subr.bf16.mxu1 %v873_v59 }
  0x4a   : > { %623 = vmatpush1.bf16.msra.mxu1 %v875_v61 }
  0x4b   : > { %624 = vmatprep.subr.bf16.mxu1 %v876_v62 }
  0x4e   : > { %625 = vmatpush1.bf16.msra.mxu1 %v878_v63 }
  0x4f   : > { %626 = vmatprep.subr.bf16.mxu1 %v879_v0 }
  0x52   : > { %627 = vmatpush1.bf16.msra.mxu1 %v881_v1 }
  0x53   : > { %628 = vmatprep.subr.bf16.mxu1 %v882_v2 }
  0x56   : > { %629 = vmatpush1.bf16.msra.mxu1 %v884_v3 }
  0x57   : > { %630 = vmatprep.subr.bf16.mxu1 %v885_v4 }
  0x5a   : > { %631 = vmatpush1.bf16.msra.mxu1 %v887_v5 }
  0x5b   : > { %632 = vmatprep.subr.bf16.mxu1 %v888_v6 }
  0x5e   : > { %633 = vmatpush1.bf16.msra.mxu1 %v890_v7 }
  0x5f   : > { %634 = vmatprep.subr.bf16.mxu1 %v891_v8 }
  0x62   : > { %635 = vmatpush1.bf16.msra.mxu1 %v893_v9 }
  0x63   : > { %636 = vmatprep.subr.bf16.mxu1 %v897_v10 }
  0x66   : > { %637 = vmatpush1.bf16.msra.mxu1 %v899_v11 }
  0x67   : > { %638 = vmatprep.subr.bf16.mxu1 %v903_v12 }
  0x6a   : > { %639 = vmatpush1.bf16.msra.mxu1 %v905_v13 }
  0x6d   : > { %641 = vmatmul.mubr.bf16.vlgmr.msra.gmra.mrb[0].mxu1 %v779_v14 }
  0xa8   : > { %v694_v19 = vpop.permute.xlu0 %693 }
  0xac   : > { %v702_v27 = vpop.permute.xlu0 %701 }
 0x10c   : > { %v683_v15 = vpop.f32.mrb[0].mxu0 }
 0x10d   : > { %v685_v16 = vpop.f32.mrb[1].mxu0 }
 0x10e   : > { %v687_v17 = vpop.f32.mrb[2].mxu0 }
 0x10f   : > { %v688_v18 = vpop.f32.mrb[3].mxu0 }
 0x140   : > { %v642_v20 = vpop.f32.mrb[0].mxu1 }
 0x141   : > { %v684_v21 = vadd.f32 %v683_v15, %v642_v20  ;;  %v644_v22 = vpop.f32.mrb[1].mxu1 }
 0x142   : > { %v686_v23 = vadd.f32 %v685_v16, %v644_v22  ;;  %v646_v24 = vpop.f32.mrb[2].mxu1 }
 0x143   : > { %v696_v25 = vmul.f32 %v694_v19, %v684_v21  ;;  %v647_v26 = vpop.f32.mrb[3].mxu1 }
 0x144   : > { %v697_v28 = vmul.f32 %v694_v19, %v686_v23 }
 0x145   : > { %v704_v29 = vadd.f32 %v702_v27, %v696_v25 }
 0x146   : > { %v705_v30 = vadd.f32 %v702_v27, %v697_v28 }
 0x147   : > { %706 = vst [vmem:[%s373_s24] sm:$0xff] %v704_v29 }
 0x148   : > { %707 = vst [vmem:[%s373_s24 + $0x8] sm:$0xff] %v705_v30 }
 0x149 PF: > { %p11_p9 = scmp.ge.s32.totalorder %s976_s19, 4   ;;  %s1148_s15 = smov %s927_s16 }
 0x14a   : > { %s1149_s16 = smov %s985_s22  ;;  %s1150_s17 = smov %s976_s19 }
 0x14b   :  { %13 = sbr.rel (!%p11_p9) target bundleno = 2 (0x2), region = 109 }

// kernel: turbnet_forward.25
= control target key start
LH: loop header
LB: loop body
LE: loop exit
PB: predicated region body
PF: predicated region fallthrough
CT: control target
= control target key end

     0   :  { %s872_s15 = smov 0   ;;  %s874_s16 = smov 0   ;;  %s1053_s0 = inlined_call_operand.vmem [shape: bf16[8,144], index: 0, kind: input, shape index: {}]   ;;  %s1054_s1 = inlined_call_operand.vmem [shape: bf16[144,2048], index: 1, kind: input, shape index: {}]   ;;  %s1055_s2 = inlined_call_operand.vmem [shape: f32[8,1], index: 2, kind: input, shape index: {}]   ;;  %s1056_s3 = inlined_call_operand.vmem [shape: f32[8,1], index: 3, kind: input, shape index: {}]   ;;  %s1057_s4 = inlined_call_operand.vmem [shape: f32[8,2048], index: 4, kind: output, shape index: {}]  }
   0x1   :  { %s876_s17 = smov 0  }
   0x2 LB: > { %s686_s18 = sadd.s32 4294967295, %s844_s17   ;;  %s889_s19 = sadd.s32 1, %s844_s17   ;;  %s844_s17 = sphi %s876_s17, %s1060_s17   ;;  %s840_s16 = sphi %s874_s16, %s1059_s16   ;;  %s836_s15 = sphi %s872_s15, %s1058_s15  }
   0x3   : > { %s39_s20 = ssub.s32 %s844_s17, %s889_s19  ;;  %s42_s21 = sadd.s32 1, %s840_s16 }
   0x4   : > { %p40_p0 = scmp.eq.s32.totalorder %s39_s20, 0  ;;  %p49_p1 = scmp.ne.s32.totalorder %s840_s16, %s836_s15 }
   0x5   : > { %p50_p2 = scmp.eq.s32.totalorder %s844_s17, 0  ;;  %p689_p4 = scmp.ge.s32.totalorder %s844_s17, 4 }
   0x6   : > { %s898_s22 = scalar_select %p40_p0, %s840_s16, %s42_s21  }
   0x7   : > { %p51_p3 = por %p50_p2, %p49_p1  ;;  %152 = sbr.rel (%p689_p4) target bundleno = 36 (0x24), region = 28 }
   0xe   : > { %155 = sbr.rel (!%p51_p3) target bundleno = 36 (0x24), region = 32  ;;  %s157_s23 = sand.u32 (%p51_p3), 1, %s840_s16  }
   0xf   : > { %s737_s24 = sshll.u32 (%p51_p3), %s844_s17, 4  ;;  %s738_s25 = smul.u32 (%p51_p3), 288, %s157_s23 }
  0x10   : > { %s906_s28 = scalar_lea.vmem (%p51_p3), %s1054_s1, %s737_s24 }
  0x11   : > { %v175_v0 = vld [vmem:[%s906_s28] sm:$0xff] (%p51_p3)  ;;  %v177_v1 = vld [vmem:[%s906_s28 + $0x8] sm:$0xff] (%p51_p3)  ;;  %s914_s29 = scalar_lea.vmem (%p51_p3), [#allocation2], %s738_s25 }
  0x12   : > { %v179_v2 = vld [vmem:[%s906_s28 + $0x40] sm:$0xff] (%p51_p3)  ;;  %v181_v3 = vld [vmem:[%s906_s28 + $0x48] sm:$0xff] (%p51_p3)  ;;  %176 = vst [vmem:[%s914_s29] sm:$0xff] (%p51_p3), %v175_v0  ;;  %178 = vst [vmem:[%s914_s29 + $0x8] sm:$0xff] (%p51_p3), %v177_v1 }
  0x13   : > { %v183_v4 = vld [vmem:[%s906_s28 + $0x80] sm:$0xff] (%p51_p3)  ;;  %v185_v5 = vld [vmem:[%s906_s28 + $0x88] sm:$0xff] (%p51_p3)  ;;  %180 = vst [vmem:[%s914_s29 + $0x10] sm:$0xff] (%p51_p3), %v179_v2  ;;  %182 = vst [vmem:[%s914_s29 + $0x18] sm:$0xff] (%p51_p3), %v181_v3 }
  0x14   : > { %184 = vst [vmem:[%s914_s29 + $0x20] sm:$0xff] (%p51_p3), %v183_v4  ;;  %186 = vst [vmem:[%s914_s29 + $0x28] sm:$0xff] (%p51_p3), %v185_v5  ;;  %v187_v6 = vld [vmem:[%s906_s28 + $0xc0] sm:$0xff] (%p51_p3)  ;;  %v189_v7 = vld [vmem:[%s906_s28 + $0xc8] sm:$0xff] (%p51_p3) }
  0x15   : > { %v191_v8 = vld [vmem:[%s906_s28 + $0x100] sm:$0xff]  ;;  %188 = vst [vmem:[%s914_s29 + $0x30] sm:$0xff] %v187_v6  ;;  %190 = vst [vmem:[%s914_s29 + $0x38] sm:$0xff] %v189_v7  ;;  %v193_v9 = vld [vmem:[%s906_s28 + $0x108] sm:$0xff] }
  0x16   : > { %192 = vst [vmem:[%s914_s29 + $0x40] sm:$0xff] %v191_v8  ;;  %v195_v10 = vld [vmem:[%s906_s28 + $0x140] sm:$0xff]  ;;  %v197_v11 = vld [vmem:[%s906_s28 + $0x148] sm:$0xff]  ;;  %194 = vst [vmem:[%s914_s29 + $0x48] sm:$0xff] %v193_v9 }
  0x17   : > { %196 = vst [vmem:[%s914_s29 + $0x50] sm:$0xff] %v195_v10  ;;  %198 = vst [vmem:[%s914_s29 + $0x58] sm:$0xff] %v197_v11  ;;  %v199_v12 = vld [vmem:[%s906_s28 + $0x180] sm:$0xff]  ;;  %v201_v13 = vld [vmem:[%s906_s28 + $0x188] sm:$0xff] }
  0x18   : > { %v203_v14 = vld [vmem:[%s906_s28 + $0x1c0] sm:$0xff]  ;;  %200 = vst [vmem:[%s914_s29 + $0x60] sm:$0xff] %v199_v12  ;;  %202 = vst [vmem:[%s914_s29 + $0x68] sm:$0xff] %v201_v13  ;;  %v205_v15 = vld [vmem:[%s906_s28 + $0x1c8] sm:$0xff] }
  0x19   : > { %204 = vst [vmem:[%s914_s29 + $0x70] sm:$0xff] %v203_v14  ;;  %v207_v16 = vld [vmem:[%s906_s28 + $0x200] sm:$0xff]  ;;  %v209_v17 = vld [vmem:[%s906_s28 + $0x208] sm:$0xff]  ;;  %206 = vst [vmem:[%s914_s29 + $0x78] sm:$0xff] %v205_v15 }
  0x1a   : > { %208 = vst [vmem:[%s914_s29 + $0x80] sm:$0xff] %v207_v16  ;;  %210 = vst [vmem:[%s914_s29 + $0x88] sm:$0xff] %v209_v17  ;;  %v211_v18 = vld [vmem:[%s906_s28 + $0x240] sm:$0xff]  ;;  %v213_v19 = vld [vmem:[%s906_s28 + $0x248] sm:$0xff] }
  0x1b   : > { %v215_v20 = vld [vmem:[%s906_s28 + $0x280] sm:$0xff]  ;;  %212 = vst [vmem:[%s914_s29 + $0x90] sm:$0xff] %v211_v18  ;;  %214 = vst [vmem:[%s914_s29 + $0x98] sm:$0xff] %v213_v19  ;;  %v217_v21 = vld [vmem:[%s906_s28 + $0x288] sm:$0xff] }
  0x1c   : > { %216 = vst [vmem:[%s914_s29 + $0xa0] sm:$0xff] %v215_v20  ;;  %v219_v22 = vld [vmem:[%s906_s28 + $0x2c0] sm:$0xff]  ;;  %v221_v23 = vld [vmem:[%s906_s28 + $0x2c8] sm:$0xff]  ;;  %218 = vst [vmem:[%s914_s29 + $0xa8] sm:$0xff] %v217_v21 }
  0x1d   : > { %220 = vst [vmem:[%s914_s29 + $0xb0] sm:$0xff] %v219_v22  ;;  %222 = vst [vmem:[%s914_s29 + $0xb8] sm:$0xff] %v221_v23  ;;  %v223_v24 = vld [vmem:[%s906_s28 + $0x300] sm:$0xff]  ;;  %v225_v25 = vld [vmem:[%s906_s28 + $0x308] sm:$0xff] }
  0x1e   : > { %v227_v26 = vld [vmem:[%s906_s28 + $0x340] sm:$0xff]  ;;  %224 = vst [vmem:[%s914_s29 + $0xc0] sm:$0xff] %v223_v24  ;;  %226 = vst [vmem:[%s914_s29 + $0xc8] sm:$0xff] %v225_v25  ;;  %v229_v27 = vld [vmem:[%s906_s28 + $0x348] sm:$0xff] }
  0x1f   : > { %228 = vst [vmem:[%s914_s29 + $0xd0] sm:$0xff] %v227_v26  ;;  %v231_v28 = vld [vmem:[%s906_s28 + $0x380] sm:$0xff]  ;;  %v233_v29 = vld [vmem:[%s906_s28 + $0x388] sm:$0xff]  ;;  %230 = vst [vmem:[%s914_s29 + $0xd8] sm:$0xff] %v229_v27 }
  0x20   : > { %232 = vst [vmem:[%s914_s29 + $0xe0] sm:$0xff] %v231_v28  ;;  %234 = vst [vmem:[%s914_s29 + $0xe8] sm:$0xff] %v233_v29  ;;  %v235_v30 = vld [vmem:[%s906_s28 + $0x3c0] sm:$0xff]  ;;  %v237_v31 = vld [vmem:[%s906_s28 + $0x3c8] sm:$0xff] }
  0x21   : > { %v239_v32 = vld [vmem:[%s906_s28 + $0x400] sm:$0xff]  ;;  %236 = vst [vmem:[%s914_s29 + $0xf0] sm:$0xff] %v235_v30  ;;  %238 = vst [vmem:[%s914_s29 + $0xf8] sm:$0xff] %v237_v31  ;;  %v241_v33 = vld [vmem:[%s906_s28 + $0x408] sm:$0xff] }
  0x22   : > { %240 = vst [vmem:[%s914_s29 + $0x100] sm:$0xff] %v239_v32  ;;  %v243_v34 = vld [vmem:[%s906_s28 + $0x440] sm:$0xff]  ;;  %v245_v35 = vld [vmem:[%s906_s28 + $0x448] sm:$0xff]  ;;  %242 = vst [vmem:[%s914_s29 + $0x108] sm:$0xff] %v241_v33 }
  0x23   : > { %244 = vst [vmem:[%s914_s29 + $0x110] sm:$0xff] %v243_v34  ;;  %246 = vst [vmem:[%s914_s29 + $0x118] sm:$0xff] %v245_v35 }
  0x24 PF: > { %p692_p5 = scmp.ge.s32.totalorder %s844_s17, 1  ;;  %p251_p6 = scmp.lt.s32.totalorder %s844_s17, 5 }
  0x26   : > { %p252_p7 = pnand %p692_p5, %p251_p6 }
  0x27   : > { %s258_s30 = sand.u32 (!%p252_p7), 1, %s836_s15   ;;  %v988_v36 = vld [vmem:[%s1053_s0] sm:$0xff] (!%p252_p7)  ;;  %vm514_vm0 = vcmask (!%p252_p7), 130048   ;;  %v846_v39 = vmov (!%p252_p7), 0   ;;  %s693_s13 = sshll.u32 (!%p252_p7), %s686_s18, 2 }
  0x28   : > { %255 = sbr.rel (%p252_p7) target bundleno = 300 (0x12c), region = 55  ;;  %v600_v37 = vld [vmem:[%s1055_s2] sm:$0xff] (!%p252_p7)  ;;  %v696_v38 = vcombine.high (!%p252_p7), %v988_v36, %v988_v36  ;;  %765 = vset.pattern.permute.xlu0 (!%p252_p7), %v846_v39  ;;  %v695_v13 = vcombine.low (!%p252_p7), %v988_v36, %v988_v36  ;;  %p285_p8 = scmp.lt.s32.totalorder (!%p252_p7), %s693_s13, 15 }
  0x29   : > { %s739_s9 = smul.u32 (!%p252_p7), 288, %s258_s30  ;;  %603 = vperm.xlu0 (!%p252_p7), %765, %v600_v37   ;;  %v610_v40 = vld [vmem:[%s1056_s3] sm:$0xff] (!%p252_p7) }
  0x2a   : > { %733 = vmatprep.mubr.msk.bf16.mxu0 (!%p252_p7), %vm514_vm0, %v696_v38  ;;  %734 = vmatprep.mubr.msk.bf16.mxu1 (!%p252_p7), %vm514_vm0, %v696_v38 }
  0x2b   : > { %s998_s12 = scalar_lea.vmem (!%p252_p7), [#allocation2], %s739_s9 }
  0x2c   : > { %v766_v41 = vld [vmem:[%s998_s12 + $0x4] ss:$16 sps:$4 sm:$0xff] (!%p252_p7)   ;;  %v768_v42 = vld [vmem:[%s998_s12 + $0xc] ss:$16 sps:$4 sm:$0xff] (!%p252_p7)   ;;  %v770_v43 = vld [vmem:[%s998_s12] ss:$16 sps:$4 sm:$0xff] (!%p252_p7)  }
  0x2d   : > { %518 = vmatprep.subr.bf16.mxu0 (!%p252_p7), %v766_v41  ;;  %v771_v44 = vld [vmem:[%s998_s12 + $0x8] ss:$16 sps:$4 sm:$0xff] (!%p252_p7)   ;;  %613 = vperm.xlu0 (!%p252_p7), %765, %v610_v40   ;;  %v772_v45 = vld [vmem:[%s998_s12 + $0x24] ss:$16 sps:$4 sm:$0xff] (!%p252_p7)   ;;  %v774_v46 = vld [vmem:[%s998_s12 + $0x2c] ss:$16 sps:$4 sm:$0xff] (!%p252_p7)  }
  0x2e   : > { %559 = vmatprep.subr.bf16.mxu1 (!%p252_p7), %v768_v42  ;;  %519 = vmatpush1.bf16.msra.mxu0 (!%p252_p7), %v770_v43  ;;  %v776_v47 = vld [vmem:[%s998_s12 + $0x20] ss:$16 sps:$4 sm:$0xff] (!%p252_p7)   ;;  %v777_v48 = vld [vmem:[%s998_s12 + $0x28] ss:$16 sps:$4 sm:$0xff] (!%p252_p7)   ;;  %v778_v49 = vld [vmem:[%s998_s12 + $0x44] ss:$16 sps:$4 sm:$0xff] (!%p252_p7)  }
  0x2f   : > { %560 = vmatpush1.bf16.msra.mxu1 %v771_v44  ;;  %520 = vmatprep.subr.bf16.mxu0 %v772_v45  ;;  %v780_v50 = vld [vmem:[%s998_s12 + $0x4c] ss:$16 sps:$4 sm:$0xff]   ;;  %v782_v51 = vld [vmem:[%s998_s12 + $0x40] ss:$16 sps:$4 sm:$0xff]   ;;  %v783_v52 = vld [vmem:[%s998_s12 + $0x48] ss:$16 sps:$4 sm:$0xff]  }
  0x30   : > { %561 = vmatprep.subr.bf16.mxu1 %v774_v46  ;;  %v784_v53 = vld [vmem:[%s998_s12 + $0x64] ss:$16 sps:$4 sm:$0xff]   ;;  %v786_v54 = vld [vmem:[%s998_s12 + $0x6c] ss:$16 sps:$4 sm:$0xff]   ;;  %v788_v55 = vld [vmem:[%s998_s12 + $0x60] ss:$16 sps:$4 sm:$0xff]  }
  0x31   : > { %v789_v56 = vld [vmem:[%s998_s12 + $0x68] ss:$16 sps:$4 sm:$0xff]   ;;  %v790_v57 = vld [vmem:[%s998_s12 + $0x84] ss:$16 sps:$4 sm:$0xff]   ;;  %v792_v58 = vld [vmem:[%s998_s12 + $0x8c] ss:$16 sps:$4 sm:$0xff]  }
  0x32   : > { %521 = vmatpush1.bf16.msra.mxu0 %v776_v47  ;;  %v794_v59 = vld [vmem:[%s998_s12 + $0x80] ss:$16 sps:$4 sm:$0xff]   ;;  %v795_v60 = vld [vmem:[%s998_s12 + $0x88] ss:$16 sps:$4 sm:$0xff]   ;;  %v796_v61 = vld [vmem:[%s998_s12 + $0xa4] ss:$16 sps:$4 sm:$0xff]  }
  0x33   : > { %562 = vmatpush1.bf16.msra.mxu1 %v777_v48  ;;  %522 = vmatprep.subr.bf16.mxu0 %v778_v49  ;;  %v798_v62 = vld [vmem:[%s998_s12 + $0xac] ss:$16 sps:$4 sm:$0xff]   ;;  %v800_v63 = vld [vmem:[%s998_s12 + $0xa0] ss:$16 sps:$4 sm:$0xff]   ;;  %v801_v0 = vld [vmem:[%s998_s12 + $0xa8] ss:$16 sps:$4 sm:$0xff]  }
  0x34   : > { %563 = vmatprep.subr.bf16.mxu1 %v780_v50  ;;  %v802_v1 = vld [vmem:[%s998_s12 + $0xc4] ss:$16 sps:$4 sm:$0xff]   ;;  %v804_v2 = vld [vmem:[%s998_s12 + $0xcc] ss:$16 sps:$4 sm:$0xff]   ;;  %v806_v3 = vld [vmem:[%s998_s12 + $0xc0] ss:$16 sps:$4 sm:$0xff]  }
  0x35   : > { %v807_v4 = vld [vmem:[%s998_s12 + $0xc8] ss:$16 sps:$4 sm:$0xff]   ;;  %v808_v5 = vld [vmem:[%s998_s12 + $0xe4] ss:$16 sps:$4 sm:$0xff]   ;;  %v810_v6 = vld [vmem:[%s998_s12 + $0xec] ss:$16 sps:$4 sm:$0xff]  }
  0x36   : > { %523 = vmatpush1.bf16.msra.mxu0 %v782_v51  ;;  %v812_v7 = vld [vmem:[%s998_s12 + $0xe0] ss:$16 sps:$4 sm:$0xff]   ;;  %v813_v8 = vld [vmem:[%s998_s12 + $0xe8] ss:$16 sps:$4 sm:$0xff]   ;;  %v814_v9 = vld [vmem:[%s998_s12 + $0x104] ss:$16 sps:$4 sm:$0xff]  }
  0x37   : > { %564 = vmatpush1.bf16.msra.mxu1 %v783_v52  ;;  %524 = vmatprep.subr.bf16.mxu0 %v784_v53  ;;  %v816_v10 = vld [vmem:[%s998_s12 + $0x10c] ss:$16 sps:$4 sm:$0xff]   ;;  %v818_v11 = vld [vmem:[%s998_s12 + $0x100] ss:$16 sps:$4 sm:$0xff]   ;;  %v819_v12 = vld [vmem:[%s998_s12 + $0x108] ss:$16 sps:$4 sm:$0xff]  }
  0x38   : > { %565 = vmatprep.subr.bf16.mxu1 %v786_v54  ;;  %s1062_s13 = smov (!%p285_p8, %s693_s13), 15 }
  0x39   : > { %s694_s14 = sshll.u32 %s1062_s13, 3 }
  0x3a   : > { %525 = vmatpush1.bf16.msra.mxu0 %v788_v55  ;;  %s288_s21 = scalar_lea.vmem %s1057_s4, %s694_s14 }
  0x3b   : > { %566 = vmatpush1.bf16.msra.mxu1 %v789_v56  ;;  %526 = vmatprep.subr.bf16.mxu0 %v790_v57 }
  0x3c   : > { %567 = vmatprep.subr.bf16.mxu1 %v792_v58 }
  0x3e   : > { %527 = vmatpush1.bf16.msra.mxu0 %v794_v59 }
  0x3f   : > { %568 = vmatpush1.bf16.msra.mxu1 %v795_v60  ;;  %528 = vmatprep.subr.bf16.mxu0 %v796_v61 }
  0x40   : > { %569 = vmatprep.subr.bf16.mxu1 %v798_v62 }
  0x42   : > { %529 = vmatpush1.bf16.msra.mxu0 %v800_v63 }
  0x43   : > { %570 = vmatpush1.bf16.msra.mxu1 %v801_v0  ;;  %530 = vmatprep.subr.bf16.mxu0 %v802_v1 }
  0x44   : > { %571 = vmatprep.subr.bf16.mxu1 %v804_v2 }
  0x46   : > { %531 = vmatpush1.bf16.msra.mxu0 %v806_v3 }
  0x47   : > { %572 = vmatpush1.bf16.msra.mxu1 %v807_v4  ;;  %532 = vmatprep.subr.bf16.mxu0 %v808_v5 }
  0x48   : > { %573 = vmatprep.subr.bf16.mxu1 %v810_v6 }
  0x4a   : > { %533 = vmatpush1.bf16.msra.mxu0 %v812_v7 }
  0x4b   : > { %574 = vmatpush1.bf16.msra.mxu1 %v813_v8  ;;  %534 = vmatprep.subr.bf16.mxu0 %v814_v9 }
  0x4c   : > { %575 = vmatprep.subr.bf16.mxu1 %v816_v10 }
  0x4e   : > { %535 = vmatpush1.bf16.msra.mxu0 %v818_v11 }
  0x4f   : > { %576 = vmatpush1.bf16.msra.mxu1 %v819_v12 }
  0x51   : > { %551 = vmatmul.mubr.bf16.vlgmr.msra.gmra.mrb[0].mxu0 %v695_v13 }
  0x52   : > { %592 = vmatmul.mubr.bf16.vlgmr.msra.gmra.mrb[0].mxu1 %v695_v13 }
  0xa8   : > { %v604_v14 = vpop.permute.xlu0 %603 }
  0xac   : > { %v614_v15 = vpop.permute.xlu0 %613 }
 0x124   : > { %v552_v16 = vpop.f32.mrb[0].mxu0 }
 0x125   : > { %v593_v17 = vpop.f32.mrb[0].mxu1  ;;  %v606_v18 = vmul.f32 %v604_v14, %v552_v16  ;;  %v554_v20 = vpop.f32.mrb[1].mxu0 }
 0x126   : > { %v608_v19 = vmul.f32 %v604_v14, %v593_v17  ;;  %v595_v21 = vpop.f32.mrb[1].mxu1  ;;  %v607_v22 = vmul.f32 %v604_v14, %v554_v20  ;;  %v556_v24 = vpop.f32.mrb[2].mxu0 }
 0x127   : > { %v609_v23 = vmul.f32 %v604_v14, %v595_v21  ;;  %v597_v25 = vpop.f32.mrb[2].mxu1  ;;  %v616_v26 = vadd.f32 %v614_v15, %v606_v18  ;;  %v557_v28 = vpop.f32.mrb[3].mxu0 }
 0x128   : > { %v618_v27 = vadd.f32 %v614_v15, %v608_v19  ;;  %v598_v29 = vpop.f32.mrb[3].mxu1  ;;  %v617_v30 = vadd.f32 %v614_v15, %v607_v22 }
 0x129   : > { %v619_v31 = vadd.f32 %v614_v15, %v609_v23  ;;  %620 = vst [vmem:[%s288_s21] sm:$0xff] %v616_v26 }
 0x12a   : > { %622 = vst [vmem:[%s288_s21 + $0x10] sm:$0xff] %v618_v27  ;;  %621 = vst [vmem:[%s288_s21 + $0x8] sm:$0xff] %v617_v30 }
 0x12b   : > { %623 = vst [vmem:[%s288_s21 + $0x18] sm:$0xff] %v619_v31 }
 0x12c PF: > { %p11_p9 = scmp.ge.s32.totalorder %s889_s19, 6   ;;  %s1058_s15 = smov %s840_s16 }
 0x12d   : > { %s1059_s16 = smov %s898_s22  ;;  %s1060_s17 = smov %s889_s19 }
 0x12e   :  { %13 = sbr.rel (!%p11_p9) target bundleno = 2 (0x2), region = 94 }

// kernel: turbnet_forward.26
= control target key start
LH: loop header
LB: loop body
LE: loop exit
PB: predicated region body
PF: predicated region fallthrough
CT: control target
= control target key end

     0   :  { %s879_s15 = smov 0   ;;  %s881_s16 = smov 0   ;;  %s1060_s0 = inlined_call_operand.vmem [shape: bf16[4,144], index: 0, kind: input, shape index: {}]   ;;  %s1061_s1 = inlined_call_operand.vmem [shape: bf16[144,8192], index: 1, kind: input, shape index: {}]   ;;  %s1062_s2 = inlined_call_operand.vmem [shape: f32[4,1], index: 2, kind: input, shape index: {}]   ;;  %s1063_s3 = inlined_call_operand.vmem [shape: f32[4,1], index: 3, kind: input, shape index: {}]   ;;  %s1064_s4 = inlined_call_operand.vmem [shape: f32[4,8192], index: 4, kind: output, shape index: {}]  }
   0x1   :  { %s883_s17 = smov 0  }
   0x2 LB: > { %s696_s18 = sadd.s32 4294967295, %s851_s17   ;;  %s896_s19 = sadd.s32 1, %s851_s17   ;;  %s851_s17 = sphi %s883_s17, %s1067_s17   ;;  %s847_s16 = sphi %s881_s16, %s1066_s16   ;;  %s843_s15 = sphi %s879_s15, %s1065_s15  }
   0x3   : > { %s39_s20 = ssub.s32 %s851_s17, %s896_s19  ;;  %s42_s21 = sadd.s32 1, %s847_s16 }
   0x4   : > { %p40_p0 = scmp.eq.s32.totalorder %s39_s20, 0  ;;  %p49_p1 = scmp.ne.s32.totalorder %s847_s16, %s843_s15 }
   0x5   : > { %p50_p2 = scmp.eq.s32.totalorder %s851_s17, 0  ;;  %p699_p4 = scmp.ge.s32.totalorder %s851_s17, 16 }
   0x6   : > { %s905_s22 = scalar_select %p40_p0, %s847_s16, %s42_s21  }
   0x7   : > { %p51_p3 = por %p50_p2, %p49_p1  ;;  %152 = sbr.rel (%p699_p4) target bundleno = 36 (0x24), region = 28 }
   0xe   : > { %155 = sbr.rel (!%p51_p3) target bundleno = 36 (0x24), region = 32  ;;  %s157_s23 = sand.u32 (%p51_p3), 1, %s847_s16  }
   0xf   : > { %s746_s24 = sshll.u32 (%p51_p3), %s851_s17, 4  ;;  %s747_s25 = smul.u32 (%p51_p3), 288, %s157_s23 }
  0x10   : > { %s913_s28 = scalar_lea.vmem (%p51_p3), %s1061_s1, %s746_s24 }
  0x11   : > { %v175_v0 = vld [vmem:[%s913_s28] sm:$0xff] (%p51_p3)  ;;  %v177_v1 = vld [vmem:[%s913_s28 + $0x8] sm:$0xff] (%p51_p3)  ;;  %s921_s29 = scalar_lea.vmem (%p51_p3), [#allocation2], %s747_s25 }
  0x12   : > { %v179_v2 = vld [vmem:[%s913_s28 + $0x100] sm:$0xff] (%p51_p3)  ;;  %v181_v3 = vld [vmem:[%s913_s28 + $0x108] sm:$0xff] (%p51_p3)  ;;  %176 = vst [vmem:[%s921_s29] sm:$0xff] (%p51_p3), %v175_v0  ;;  %178 = vst [vmem:[%s921_s29 + $0x8] sm:$0xff] (%p51_p3), %v177_v1 }
  0x13   : > { %v183_v4 = vld [vmem:[%s913_s28 + $0x200] sm:$0xff] (%p51_p3)  ;;  %v185_v5 = vld [vmem:[%s913_s28 + $0x208] sm:$0xff] (%p51_p3)  ;;  %180 = vst [vmem:[%s921_s29 + $0x10] sm:$0xff] (%p51_p3), %v179_v2  ;;  %182 = vst [vmem:[%s921_s29 + $0x18] sm:$0xff] (%p51_p3), %v181_v3 }
  0x14   : > { %184 = vst [vmem:[%s921_s29 + $0x20] sm:$0xff] (%p51_p3), %v183_v4  ;;  %186 = vst [vmem:[%s921_s29 + $0x28] sm:$0xff] (%p51_p3), %v185_v5  ;;  %v187_v6 = vld [vmem:[%s913_s28 + $0x300] sm:$0xff] (%p51_p3)  ;;  %v189_v7 = vld [vmem:[%s913_s28 + $0x308] sm:$0xff] (%p51_p3) }
  0x15   : > { %v191_v8 = vld [vmem:[%s913_s28 + $0x400] sm:$0xff]  ;;  %188 = vst [vmem:[%s921_s29 + $0x30] sm:$0xff] %v187_v6  ;;  %190 = vst [vmem:[%s921_s29 + $0x38] sm:$0xff] %v189_v7  ;;  %v193_v9 = vld [vmem:[%s913_s28 + $0x408] sm:$0xff] }
  0x16   : > { %192 = vst [vmem:[%s921_s29 + $0x40] sm:$0xff] %v191_v8  ;;  %v195_v10 = vld [vmem:[%s913_s28 + $0x500] sm:$0xff]  ;;  %v197_v11 = vld [vmem:[%s913_s28 + $0x508] sm:$0xff]  ;;  %194 = vst [vmem:[%s921_s29 + $0x48] sm:$0xff] %v193_v9 }
  0x17   : > { %196 = vst [vmem:[%s921_s29 + $0x50] sm:$0xff] %v195_v10  ;;  %198 = vst [vmem:[%s921_s29 + $0x58] sm:$0xff] %v197_v11  ;;  %v199_v12 = vld [vmem:[%s913_s28 + $0x600] sm:$0xff]  ;;  %v201_v13 = vld [vmem:[%s913_s28 + $0x608] sm:$0xff] }
  0x18   : > { %v203_v14 = vld [vmem:[%s913_s28 + $0x700] sm:$0xff]  ;;  %200 = vst [vmem:[%s921_s29 + $0x60] sm:$0xff] %v199_v12  ;;  %202 = vst [vmem:[%s921_s29 + $0x68] sm:$0xff] %v201_v13  ;;  %v205_v15 = vld [vmem:[%s913_s28 + $0x708] sm:$0xff] }
  0x19   : > { %204 = vst [vmem:[%s921_s29 + $0x70] sm:$0xff] %v203_v14  ;;  %v207_v16 = vld [vmem:[%s913_s28 + $0x800] sm:$0xff]  ;;  %v209_v17 = vld [vmem:[%s913_s28 + $0x808] sm:$0xff]  ;;  %206 = vst [vmem:[%s921_s29 + $0x78] sm:$0xff] %v205_v15 }
  0x1a   : > { %208 = vst [vmem:[%s921_s29 + $0x80] sm:$0xff] %v207_v16  ;;  %210 = vst [vmem:[%s921_s29 + $0x88] sm:$0xff] %v209_v17  ;;  %v211_v18 = vld [vmem:[%s913_s28 + $0x900] sm:$0xff]  ;;  %v213_v19 = vld [vmem:[%s913_s28 + $0x908] sm:$0xff] }
  0x1b   : > { %v215_v20 = vld [vmem:[%s913_s28 + $0xa00] sm:$0xff]  ;;  %212 = vst [vmem:[%s921_s29 + $0x90] sm:$0xff] %v211_v18  ;;  %214 = vst [vmem:[%s921_s29 + $0x98] sm:$0xff] %v213_v19  ;;  %v217_v21 = vld [vmem:[%s913_s28 + $0xa08] sm:$0xff] }
  0x1c   : > { %216 = vst [vmem:[%s921_s29 + $0xa0] sm:$0xff] %v215_v20  ;;  %v219_v22 = vld [vmem:[%s913_s28 + $0xb00] sm:$0xff]  ;;  %v221_v23 = vld [vmem:[%s913_s28 + $0xb08] sm:$0xff]  ;;  %218 = vst [vmem:[%s921_s29 + $0xa8] sm:$0xff] %v217_v21 }
  0x1d   : > { %220 = vst [vmem:[%s921_s29 + $0xb0] sm:$0xff] %v219_v22  ;;  %222 = vst [vmem:[%s921_s29 + $0xb8] sm:$0xff] %v221_v23  ;;  %v223_v24 = vld [vmem:[%s913_s28 + $0xc00] sm:$0xff]  ;;  %v225_v25 = vld [vmem:[%s913_s28 + $0xc08] sm:$0xff] }
  0x1e   : > { %v227_v26 = vld [vmem:[%s913_s28 + $0xd00] sm:$0xff]  ;;  %224 = vst [vmem:[%s921_s29 + $0xc0] sm:$0xff] %v223_v24  ;;  %226 = vst [vmem:[%s921_s29 + $0xc8] sm:$0xff] %v225_v25  ;;  %v229_v27 = vld [vmem:[%s913_s28 + $0xd08] sm:$0xff] }
  0x1f   : > { %228 = vst [vmem:[%s921_s29 + $0xd0] sm:$0xff] %v227_v26  ;;  %v231_v28 = vld [vmem:[%s913_s28 + $0xe00] sm:$0xff]  ;;  %v233_v29 = vld [vmem:[%s913_s28 + $0xe08] sm:$0xff]  ;;  %230 = vst [vmem:[%s921_s29 + $0xd8] sm:$0xff] %v229_v27 }
  0x20   : > { %232 = vst [vmem:[%s921_s29 + $0xe0] sm:$0xff] %v231_v28  ;;  %234 = vst [vmem:[%s921_s29 + $0xe8] sm:$0xff] %v233_v29  ;;  %v235_v30 = vld [vmem:[%s913_s28 + $0xf00] sm:$0xff]  ;;  %v237_v31 = vld [vmem:[%s913_s28 + $0xf08] sm:$0xff] }
  0x21   : > { %v239_v32 = vld [vmem:[%s913_s28 + $0x1000] sm:$0xff]  ;;  %236 = vst [vmem:[%s921_s29 + $0xf0] sm:$0xff] %v235_v30  ;;  %238 = vst [vmem:[%s921_s29 + $0xf8] sm:$0xff] %v237_v31  ;;  %v241_v33 = vld [vmem:[%s913_s28 + $0x1008] sm:$0xff] }
  0x22   : > { %240 = vst [vmem:[%s921_s29 + $0x100] sm:$0xff] %v239_v32  ;;  %v243_v34 = vld [vmem:[%s913_s28 + $0x1100] sm:$0xff]  ;;  %v245_v35 = vld [vmem:[%s913_s28 + $0x1108] sm:$0xff]  ;;  %242 = vst [vmem:[%s921_s29 + $0x108] sm:$0xff] %v241_v33 }
  0x23   : > { %244 = vst [vmem:[%s921_s29 + $0x110] sm:$0xff] %v243_v34  ;;  %246 = vst [vmem:[%s921_s29 + $0x118] sm:$0xff] %v245_v35 }
  0x24 PF: > { %p702_p5 = scmp.ge.s32.totalorder %s851_s17, 1  ;;  %p251_p6 = scmp.lt.s32.totalorder %s851_s17, 17 }
  0x26   : > { %p252_p7 = pnand %p702_p5, %p251_p6 }
  0x27   : > { %s258_s30 = sand.u32 (!%p252_p7), 1, %s843_s15   ;;  %v995_v36 = vld.sshfl [vmem:[%s1060_s0] sm:$0x33 pattern:$0x76325410] (!%p252_p7)  ;;  %vm518_vm0 = vcmask (!%p252_p7), 130048  }
  0x28   : > { %255 = sbr.rel (%p252_p7) target bundleno = 301 (0x12d), region = 55  ;;  %v336_v37 = vcombine.high (!%p252_p7), %v995_v36, %v995_v36  ;;  %v604_v38 = vld [vmem:[%s1062_s2] sm:$0xf] (!%p252_p7)  ;;  %v853_v39 = vmov (!%p252_p7), 0   ;;  %s703_s13 = sshll.u32 (!%p252_p7), %s696_s18, 2 }
  0x29   : > { %s748_s7 = smul.u32 (!%p252_p7), 288, %s258_s30  ;;  %774 = vset.pattern.permute.xlu0 (!%p252_p7), %v853_v39  ;;  %v614_v41 = vld [vmem:[%s1063_s3] sm:$0xf] (!%p252_p7)  ;;  %p285_p8 = scmp.lt.s32.totalorder (!%p252_p7), %s703_s13, 63 }
  0x2a   : > { %742 = vmatprep.mubr.msk.bf16.mxu0 (!%p252_p7), %vm518_vm0, %v336_v37  ;;  %743 = vmatprep.mubr.msk.bf16.mxu1 (!%p252_p7), %vm518_vm0, %v336_v37 }
  0x2b   : > { %s1002_s10 = scalar_lea.vmem (!%p252_p7), [#allocation2], %s748_s7  ;;  %607 = vperm.xlu0 (!%p252_p7), %774, %v604_v38  }
  0x2c   : > { %v775_v40 = vld [vmem:[%s1002_s10 + $0x4] ss:$16 sps:$4 sm:$0xff] (!%p252_p7)   ;;  %v777_v42 = vld [vmem:[%s1002_s10 + $0xc] ss:$16 sps:$4 sm:$0xff] (!%p252_p7)   ;;  %v779_v43 = vld [vmem:[%s1002_s10] ss:$16 sps:$4 sm:$0xff] (!%p252_p7)  }
  0x2d   : > { %522 = vmatprep.subr.bf16.mxu0 (!%p252_p7), %v775_v40  ;;  %v780_v44 = vld [vmem:[%s1002_s10 + $0x8] ss:$16 sps:$4 sm:$0xff] (!%p252_p7)   ;;  %563 = vmatprep.subr.bf16.mxu1 (!%p252_p7), %v777_v42  ;;  %v781_v45 = vld [vmem:[%s1002_s10 + $0x24] ss:$16 sps:$4 sm:$0xff] (!%p252_p7)   ;;  %v783_v46 = vld [vmem:[%s1002_s10 + $0x2c] ss:$16 sps:$4 sm:$0xff] (!%p252_p7)  }
  0x2e   : > { %523 = vmatpush1.bf16.msra.mxu0 (!%p252_p7), %v779_v43  ;;  %564 = vmatpush1.bf16.msra.mxu1 (!%p252_p7), %v780_v44  ;;  %v785_v47 = vld [vmem:[%s1002_s10 + $0x20] ss:$16 sps:$4 sm:$0xff] (!%p252_p7)   ;;  %v786_v48 = vld [vmem:[%s1002_s10 + $0x28] ss:$16 sps:$4 sm:$0xff] (!%p252_p7)   ;;  %v787_v49 = vld [vmem:[%s1002_s10 + $0x44] ss:$16 sps:$4 sm:$0xff] (!%p252_p7)  }
  0x2f   : > { %524 = vmatprep.subr.bf16.mxu0 %v781_v45  ;;  %617 = vperm.xlu0 %774, %v614_v41   ;;  %v789_v50 = vld [vmem:[%s1002_s10 + $0x4c] ss:$16 sps:$4 sm:$0xff]   ;;  %v791_v51 = vld [vmem:[%s1002_s10 + $0x40] ss:$16 sps:$4 sm:$0xff]   ;;  %v792_v52 = vld [vmem:[%s1002_s10 + $0x48] ss:$16 sps:$4 sm:$0xff]  }
  0x30   : > { %565 = vmatprep.subr.bf16.mxu1 %v783_v46  ;;  %v793_v53 = vld [vmem:[%s1002_s10 + $0x64] ss:$16 sps:$4 sm:$0xff]   ;;  %v795_v54 = vld [vmem:[%s1002_s10 + $0x6c] ss:$16 sps:$4 sm:$0xff]   ;;  %v797_v55 = vld [vmem:[%s1002_s10 + $0x60] ss:$16 sps:$4 sm:$0xff]  }
  0x31   : > { %v798_v56 = vld [vmem:[%s1002_s10 + $0x68] ss:$16 sps:$4 sm:$0xff]   ;;  %v799_v57 = vld [vmem:[%s1002_s10 + $0x84] ss:$16 sps:$4 sm:$0xff]   ;;  %v801_v58 = vld [vmem:[%s1002_s10 + $0x8c] ss:$16 sps:$4 sm:$0xff]  }
  0x32   : > { %525 = vmatpush1.bf16.msra.mxu0 %v785_v47  ;;  %566 = vmatpush1.bf16.msra.mxu1 %v786_v48  ;;  %v803_v59 = vld [vmem:[%s1002_s10 + $0x80] ss:$16 sps:$4 sm:$0xff]   ;;  %v804_v60 = vld [vmem:[%s1002_s10 + $0x88] ss:$16 sps:$4 sm:$0xff]   ;;  %v805_v61 = vld [vmem:[%s1002_s10 + $0xa4] ss:$16 sps:$4 sm:$0xff]  }
  0x33   : > { %526 = vmatprep.subr.bf16.mxu0 %v787_v49  ;;  %567 = vmatprep.subr.bf16.mxu1 %v789_v50  ;;  %v807_v62 = vld [vmem:[%s1002_s10 + $0xac] ss:$16 sps:$4 sm:$0xff]   ;;  %v809_v63 = vld [vmem:[%s1002_s10 + $0xa0] ss:$16 sps:$4 sm:$0xff]   ;;  %v810_v0 = vld [vmem:[%s1002_s10 + $0xa8] ss:$16 sps:$4 sm:$0xff]  }
  0x34   : > { %v811_v1 = vld [vmem:[%s1002_s10 + $0xc4] ss:$16 sps:$4 sm:$0xff]   ;;  %v813_v2 = vld [vmem:[%s1002_s10 + $0xcc] ss:$16 sps:$4 sm:$0xff]   ;;  %v815_v3 = vld [vmem:[%s1002_s10 + $0xc0] ss:$16 sps:$4 sm:$0xff]  }
  0x35   : > { %v816_v4 = vld [vmem:[%s1002_s10 + $0xc8] ss:$16 sps:$4 sm:$0xff]   ;;  %v817_v5 = vld [vmem:[%s1002_s10 + $0xe4] ss:$16 sps:$4 sm:$0xff]   ;;  %v819_v6 = vld [vmem:[%s1002_s10 + $0xec] ss:$16 sps:$4 sm:$0xff]  }
  0x36   : > { %527 = vmatpush1.bf16.msra.mxu0 %v791_v51  ;;  %568 = vmatpush1.bf16.msra.mxu1 %v792_v52  ;;  %v821_v7 = vld [vmem:[%s1002_s10 + $0xe0] ss:$16 sps:$4 sm:$0xff]   ;;  %v822_v8 = vld [vmem:[%s1002_s10 + $0xe8] ss:$16 sps:$4 sm:$0xff]   ;;  %v823_v9 = vld [vmem:[%s1002_s10 + $0x104] ss:$16 sps:$4 sm:$0xff]  }
  0x37   : > { %528 = vmatprep.subr.bf16.mxu0 %v793_v53  ;;  %569 = vmatprep.subr.bf16.mxu1 %v795_v54  ;;  %v825_v10 = vld [vmem:[%s1002_s10 + $0x10c] ss:$16 sps:$4 sm:$0xff]   ;;  %v827_v11 = vld [vmem:[%s1002_s10 + $0x100] ss:$16 sps:$4 sm:$0xff]   ;;  %v828_v12 = vld [vmem:[%s1002_s10 + $0x108] ss:$16 sps:$4 sm:$0xff]  }
  0x38   : > { %s1069_s13 = smov (!%p285_p8, %s703_s13), 63 }
  0x39   : > { %s704_s14 = sshll.u32 %s1069_s13, 2 }
  0x3a   : > { %529 = vmatpush1.bf16.msra.mxu0 %v797_v55  ;;  %570 = vmatpush1.bf16.msra.mxu1 %v798_v56  ;;  %s288_s18 = scalar_lea.vmem %s1064_s4, %s704_s14 }
  0x3b   : > { %530 = vmatprep.subr.bf16.mxu0 %v799_v57  ;;  %571 = vmatprep.subr.bf16.mxu1 %v801_v58 }
  0x3e   : > { %531 = vmatpush1.bf16.msra.mxu0 %v803_v59  ;;  %572 = vmatpush1.bf16.msra.mxu1 %v804_v60 }
  0x3f   : > { %532 = vmatprep.subr.bf16.mxu0 %v805_v61  ;;  %573 = vmatprep.subr.bf16.mxu1 %v807_v62 }
  0x42   : > { %533 = vmatpush1.bf16.msra.mxu0 %v809_v63  ;;  %574 = vmatpush1.bf16.msra.mxu1 %v810_v0 }
  0x43   : > { %534 = vmatprep.subr.bf16.mxu0 %v811_v1  ;;  %575 = vmatprep.subr.bf16.mxu1 %v813_v2 }
  0x46   : > { %535 = vmatpush1.bf16.msra.mxu0 %v815_v3  ;;  %576 = vmatpush1.bf16.msra.mxu1 %v816_v4 }
  0x47   : > { %536 = vmatprep.subr.bf16.mxu0 %v817_v5  ;;  %577 = vmatprep.subr.bf16.mxu1 %v819_v6 }
  0x4a   : > { %537 = vmatpush1.bf16.msra.mxu0 %v821_v7  ;;  %578 = vmatpush1.bf16.msra.mxu1 %v822_v8 }
  0x4b   : > { %538 = vmatprep.subr.bf16.mxu0 %v823_v9  ;;  %579 = vmatprep.subr.bf16.mxu1 %v825_v10 }
  0x4e   : > { %539 = vmatpush1.bf16.msra.mxu0 %v827_v11  ;;  %580 = vmatpush1.bf16.msra.mxu1 %v828_v12 }
  0x51   : > { %555 = vmatmul.mubr.bf16.vlgmr.msra.gmra.mrb[0].mxu0 %v995_v36  ;;  %596 = vmatmul.mubr.bf16.vlgmr.msra.gmra.mrb[0].mxu1 %v995_v36 }
  0xaa   : > { %v608_v13 = vpop.permute.xlu0 %607 }
  0xae   : > { %v618_v14 = vpop.permute.xlu0 %617 }
 0x124   : > { %v556_v15 = vpop.f32.mrb[0].mxu0  ;;  %v597_v16 = vpop.f32.mrb[0].mxu1 }
 0x125   : > { %v610_v17 = vmul.f32 %v608_v13, %v556_v15  ;;  %v612_v18 = vmul.f32 %v608_v13, %v597_v16  ;;  %v558_v19 = vpop.f32.mrb[1].mxu0  ;;  %v599_v20 = vpop.f32.mrb[1].mxu1 }
 0x126   : > { %v611_v21 = vmul.f32 %v608_v13, %v558_v19  ;;  %v613_v22 = vmul.f32 %v608_v13, %v599_v20  ;;  %v560_v23 = vpop.f32.mrb[2].mxu0  ;;  %v601_v24 = vpop.f32.mrb[2].mxu1 }
 0x127   : > { %v620_v25 = vadd.f32 %v618_v14, %v610_v17  ;;  %v622_v26 = vadd.f32 %v618_v14, %v612_v18  ;;  %v561_v27 = vpop.f32.mrb[3].mxu0  ;;  %v602_v28 = vpop.f32.mrb[3].mxu1 }
 0x128   : > { %v621_v29 = vadd.f32 %v618_v14, %v611_v21  ;;  %v623_v30 = vadd.f32 %v618_v14, %v613_v22 }
 0x12a   : > { %v628_v31 = vcombine.low %v620_v25, %v621_v29  ;;  %v629_v32 = vcombine.low %v622_v26, %v623_v30 }
 0x12c   : > { %632 = vst [vmem:[%s288_s18] sm:$0xff] %v628_v31  ;;  %633 = vst [vmem:[%s288_s18 + $0x8] sm:$0xff] %v629_v32 }
 0x12d PF: > { %p11_p9 = scmp.ge.s32.totalorder %s896_s19, 18   ;;  %s1065_s15 = smov %s847_s16 }
 0x12e   : > { %s1066_s16 = smov %s905_s22  ;;  %s1067_s17 = smov %s896_s19 }
 0x12f   :  { %13 = sbr.rel (!%p11_p9) target bundleno = 2 (0x2), region = 94 }

// kernel: turbnet_forward.27
= control target key start
LH: loop header
LB: loop body
LE: loop exit
PB: predicated region body
PF: predicated region fallthrough
CT: control target
= control target key end

     0   :  { %s633_s15 = smov 0   ;;  %s635_s16 = smov 0   ;;  %s730_s0 = inlined_call_operand.vmem [shape: bf16[12,32], index: 0, kind: input, shape index: {}]   ;;  %s731_s1 = inlined_call_operand.vmem [shape: bf16[32,8704], index: 1, kind: input, shape index: {}]   ;;  %s732_s2 = inlined_call_operand.vmem [shape: f32[12,1], index: 2, kind: input, shape index: {}]   ;;  %s733_s3 = inlined_call_operand.vmem [shape: f32[12,1], index: 3, kind: input, shape index: {}]   ;;  %s734_s4 = inlined_call_operand.vmem [shape: f32[12,8704], index: 4, kind: output, shape index: {}]  }
   0x1   :  { %s637_s17 = smov 0  }
   0x2 LB: > { %s527_s18 = sadd.s32 4294967295, %s605_s17   ;;  %s650_s19 = sadd.s32 1, %s605_s17   ;;  %s605_s17 = sphi %s637_s17, %s738_s17   ;;  %s601_s16 = sphi %s635_s16, %s737_s16   ;;  %s597_s15 = sphi %s633_s15, %s736_s15  }
   0x3   : > { %s39_s20 = ssub.s32 %s605_s17, %s650_s19  ;;  %s42_s21 = sadd.s32 1, %s601_s16 }
   0x4   : > { %p40_p0 = scmp.eq.s32.totalorder %s39_s20, 0  ;;  %p49_p1 = scmp.ne.s32.totalorder %s601_s16, %s597_s15 }
   0x5   : > { %p50_p2 = scmp.eq.s32.totalorder %s605_s17, 0  ;;  %p121_p3 = scmp.eq.s32.totalorder %s527_s18, 16 }
   0x6   : > { %s661_s22 = scalar_select %p40_p0, %s601_s16, %s42_s21  }
   0x7   : > { %p51_p4 = por %p50_p2, %p49_p1  ;;  %p663_p5 = por %p121_p3, %p49_p1 }
   0x8   : > { %p530_p6 = scmp.ge.s32.totalorder %s605_s17, 17 }
   0xa   : > { %152 = sbr.rel (%p530_p6) target bundleno = 25 (0x19), region = 28 }
  0x11   : > { %155 = sbr.rel (!%p51_p4) target bundleno = 25 (0x19), region = 32  ;;  %s157_s24 = sand.u32 (%p51_p4), 1, %s601_s16  }
  0x12   : > { %s553_s25 = sshll.u32 (%p51_p4), %s605_s17, 4  ;;  %s531_s26 = sshll.u32 (%p51_p4), %s157_s24, 6 }
  0x13   : > { %s162_s29 = scalar_lea.vmem (%p51_p4), %s731_s1, %s553_s25  ;;  %s159_s30 = scalar_lea.vmem (%p51_p4), [#allocation2], %s531_s26 }
  0x14   : > { %v175_v0 = vld [vmem:[%s162_s29] sm:$0xff] (%p51_p4)  ;;  %v177_v1 = vld [vmem:[%s162_s29 + $0x8] sm:$0xff] (%p51_p4)  ;;  %v179_v2 = vld [vmem:[%s162_s29 + $0x110] sm:$0xff] (%p51_p4) }
  0x15   : > { %176 = vst [vmem:[%s159_s30] sm:$0xff] (%p51_p4), %v175_v0  ;;  %178 = vst [vmem:[%s159_s30 + $0x8] sm:$0xff] (%p51_p4), %v177_v1  ;;  %v181_v3 = vld [vmem:[%s162_s29 + $0x118] sm:$0xff] (%p51_p4)  ;;  %v183_v4 = vld [vmem:[%s162_s29 + $0x220] sm:$0xff] (%p51_p4) }
  0x16   : > { %180 = vst [vmem:[%s159_s30 + $0x10] sm:$0xff] (%p51_p4), %v179_v2  ;;  %v185_v5 = vld [vmem:[%s162_s29 + $0x228] sm:$0xff] (%p51_p4)  ;;  %182 = vst [vmem:[%s159_s30 + $0x18] sm:$0xff] (%p51_p4), %v181_v3  ;;  %v187_v6 = vld [vmem:[%s162_s29 + $0x330] sm:$0xff] (%p51_p4) }
  0x17   : > { %184 = vst [vmem:[%s159_s30 + $0x20] sm:$0xff] (%p51_p4), %v183_v4  ;;  %186 = vst [vmem:[%s159_s30 + $0x28] sm:$0xff] (%p51_p4), %v185_v5  ;;  %v189_v7 = vld [vmem:[%s162_s29 + $0x338] sm:$0xff] (%p51_p4) }
  0x18   : > { %188 = vst [vmem:[%s159_s30 + $0x30] sm:$0xff] %v187_v6  ;;  %190 = vst [vmem:[%s159_s30 + $0x38] sm:$0xff] %v189_v7 }
  0x19 PF: > { %p534_p7 = scmp.ge.s32.totalorder %s605_s17, 1  ;;  %p195_p8 = scmp.lt.s32.totalorder %s605_s17, 18 }
  0x1b   : > { %p196_p9 = pnand %p534_p7, %p195_p8 }
  0x1c   : > { %s202_s5 = sand.u32 (!%p196_p9), 1, %s597_s15   ;;  %v607_v8 = vmov (!%p196_p9), 0   ;;  %v382_v9 = vld [vmem:[%s732_s2] sm:$0xff] (!%p196_p9)  ;;  %v383_v11 = vld [vmem:[%s732_s2 + $0x8] sm:$0xf] (!%p196_p9)  ;;  %vm292_vm0 = vcmask (!%p196_p9), 261120  }
  0x1d   : > { %199 = sbr.rel (%p196_p9) target bundleno = 273 (0x111), region = 55  ;;  %s676_s6 = sshll.u32 (!%p196_p9), %s202_s5, 6  ;;  %328 = vmatprep.mubr.bf16.mxu0 (!%p196_p9), %v607_v8  ;;  %371 = vmatprep.mubr.bf16.mxu1 (!%p196_p9), %v607_v8  ;;  %v402_v10 = vld [vmem:[%s733_s3] sm:$0xff] (!%p196_p9)  ;;  %v403_v26 = vld [vmem:[%s733_s3 + $0x8] sm:$0xf] (!%p196_p9) }
  0x1e   : > { %580 = vset.pattern.permute.xlu0 (!%p196_p9), %v607_v8  ;;  %581 = vset.pattern.permute.xlu1 (!%p196_p9), %v607_v8  ;;  %s204_s13 = scalar_lea.vmem (!%p196_p9), [#allocation2], %s676_s6  ;;  %v582_v37 = vld [vmem:[%s730_s0] sm:$0x3f] (!%p196_p9)   ;;  %s695_s24 = scalar_lea.vmem (!%p196_p9), [#allocation3], %s676_s6 }
  0x1f   : > { %v229_v12 = vld [vmem:[%s204_s13] sm:$0xff] (!%p196_p9)  ;;  %v231_v13 = vld [vmem:[%s204_s13 + $0x10] sm:$0xff] (!%p196_p9)  ;;  %v230_v14 = vld [vmem:[%s204_s13 + $0x8] sm:$0xff] (!%p196_p9)  ;;  %386 = vperm.xlu0 (!%p196_p9), %580, %v382_v9   ;;  %406 = vperm.xlu1 (!%p196_p9), %581, %v402_v10  }
  0x20   : > { %v237_v15 = vmax.bf16 (!%p196_p9), %v607_v8, %v229_v12  ;;  %v239_v16 = vmax.bf16 (!%p196_p9), %v607_v8, %v231_v13  ;;  %v232_v17 = vld [vmem:[%s204_s13 + $0x18] sm:$0xff] (!%p196_p9)  ;;  %v238_v18 = vmax.bf16 (!%p196_p9), %v607_v8, %v230_v14  ;;  %v233_v19 = vld [vmem:[%s204_s13 + $0x20] sm:$0xff] (!%p196_p9)  ;;  %v235_v20 = vld [vmem:[%s204_s13 + $0x30] sm:$0xff] (!%p196_p9) }
  0x21   : > { %v240_v21 = vmax.bf16 (!%p196_p9), %v607_v8, %v232_v17  ;;  %v241_v22 = vmax.bf16 (!%p196_p9), %v607_v8, %v233_v19  ;;  %v243_v23 = vmax.bf16 (!%p196_p9), %v607_v8, %v235_v20  ;;  %v234_v24 = vld [vmem:[%s204_s13 + $0x28] sm:$0xff] (!%p196_p9)  ;;  %v236_v25 = vld [vmem:[%s204_s13 + $0x38] sm:$0xff] (!%p196_p9) }
  0x22   : > { %v539_v27 = vcombine.high (!%p196_p9), %v237_v15, %v239_v16  ;;  %v538_v28 = vcombine.low (!%p196_p9), %v237_v15, %v239_v16  ;;  %v242_v29 = vmax.bf16 (!%p196_p9), %v607_v8, %v234_v24  ;;  %v244_v30 = vmax.bf16 (!%p196_p9), %v607_v8, %v236_v25 }
  0x23   : > { %v541_v31 = vcombine.high (!%p196_p9), %v238_v18, %v240_v21  ;;  %v540_v32 = vcombine.low (!%p196_p9), %v238_v18, %v240_v21  ;;  %v543_v33 = vcombine.high (!%p196_p9), %v241_v22, %v243_v23  ;;  %391 = vperm.xlu0 (!%p196_p9), %580, %v383_v11   ;;  %411 = vperm.xlu1 (!%p196_p9), %581, %v403_v26  }
  0x24   : > { %296 = vmatprep.subr.bf16.mxu0 %v539_v27  ;;  %v545_v34 = vcombine.high %v242_v29, %v244_v30  ;;  %v542_v35 = vcombine.low %v241_v22, %v243_v23  ;;  %v544_v36 = vcombine.low %v242_v29, %v244_v30  ;;  %s554_s25 = sshll.u32 (%p663_p5), %s527_s18, 5 }
  0x25   : > { %339 = vmatprep.subr.bf16.mxu1 %v541_v31  ;;  %297 = vmatpush1.bf16.msra.mxu0 %v538_v28  ;;  %s439_s28 = scalar_lea.vmem (%p663_p5), %s734_s4, %s554_s25 }
  0x26   : > { %340 = vmatpush1.bf16.msra.mxu1 %v540_v32  ;;  %298 = vmatprep.subr.bf16.mxu0 %v543_v33 }
  0x27   : > { %341 = vmatprep.subr.bf16.mxu1 %v545_v34 }
  0x29   : > { %299 = vmatpush1.bf16.msra.mxu0 %v542_v35 }
  0x2a   : > { %342 = vmatpush1.bf16.msra.mxu1 %v544_v36 }
  0x2c   : > { %546 = vmatmul.mubr.msk.bf16.vlgmr.msra.gmra.mrb[0].mxu0 %vm292_vm0, %v582_v37 }
  0x2d   : > { %547 = vmatmul.mubr.msk.bf16.vlgmr.msra.gmra.mrb[0].mxu1 %vm292_vm0, %v582_v37 }
  0x9e   : > { %v387_v38 = vpop.permute.xlu0 %386  ;;  %v407_v39 = vpop.permute.xlu1 %406 }
  0xa2   : > { %v392_v40 = vpop.permute.xlu0 %391  ;;  %v412_v55 = vpop.permute.xlu1 %411 }
  0xff   : > { %v330_v41 = vpop.f32.mrb[0].mxu0 }
 0x100   : > { %v394_v42 = vmul.f32 %v387_v38, %v330_v41  ;;  %v373_v43 = vpop.f32.mrb[0].mxu1  ;;  %v332_v44 = vpop.f32.mrb[1].mxu0 }
 0x101   : > { %v396_v45 = vmul.f32 %v387_v38, %v373_v43  ;;  %v395_v46 = vmul.f32 %v387_v38, %v332_v44  ;;  %v375_v47 = vpop.f32.mrb[1].mxu1  ;;  %v334_v48 = vpop.f32.mrb[2].mxu0 }
 0x102   : > { %v414_v49 = vadd.f32 %v407_v39, %v394_v42  ;;  %v397_v50 = vmul.f32 %v387_v38, %v375_v47  ;;  %v398_v51 = vmul.f32 %v392_v40, %v334_v48  ;;  %v377_v52 = vpop.f32.mrb[2].mxu1  ;;  %v336_v53 = vpop.f32.mrb[3].mxu0  ;;  %436 = sbr.rel (!%p663_p5) target bundleno = 273 (0x111), region = 63 }
 0x103   : > { %v416_v54 = vadd.f32 %v407_v39, %v396_v45  ;;  %v415_v56 = vadd.f32 %v407_v39, %v395_v46  ;;  %v400_v57 = vmul.f32 %v392_v40, %v377_v52  ;;  %v399_v58 = vmul.f32 %v392_v40, %v336_v53  ;;  %v379_v59 = vpop.f32.mrb[3].mxu1 }
 0x104   : > { %422 = vst [vmem:[%s695_s24] sm:$0xff] %v414_v49  ;;  %v417_v60 = vadd.f32 %v407_v39, %v397_v50  ;;  %v418_v61 = vadd.f32 %v412_v55, %v398_v51  ;;  %v401_v62 = vmul.f32 %v392_v40, %v379_v59 }
 0x105   : > { %424 = vst [vmem:[%s695_s24 + $0x10] sm:$0xff] %v416_v54  ;;  %423 = vst [vmem:[%s695_s24 + $0x8] sm:$0xff] %v415_v56  ;;  %v420_v63 = vadd.f32 %v412_v55, %v400_v57  ;;  %v419_v0 = vadd.f32 %v412_v55, %v399_v58 }
 0x106   : > { %425 = vst [vmem:[%s695_s24 + $0x18] sm:$0xff] %v417_v60  ;;  %426 = vst [vmem:[%s695_s24 + $0x20] sm:$0xf] %v418_v61  ;;  %v421_v1 = vadd.f32 %v412_v55, %v401_v62 }
 0x107   : > { %428 = vst [vmem:[%s695_s24 + $0x30] sm:$0xf] %v420_v63  ;;  %427 = vst [vmem:[%s695_s24 + $0x28] sm:$0xf] %v419_v0 }
 0x108   : > { %429 = vst [vmem:[%s695_s24 + $0x38] sm:$0xf] %v421_v1 }
 0x10b   : > { %v452_v2 = vld [vmem:[%s695_s24] sm:$0xff] }
 0x10c   : > { %v454_v3 = vld [vmem:[%s695_s24 + $0x8] sm:$0xff]  ;;  %v456_v4 = vld [vmem:[%s695_s24 + $0x10] sm:$0xff]  ;;  %453 = vst [vmem:[%s439_s28] sm:$0xff] %v452_v2 }
 0x10d   : > { %v458_v5 = vld [vmem:[%s695_s24 + $0x18] sm:$0xff]  ;;  %v460_v6 = vld [vmem:[%s695_s24 + $0x20] sm:$0xff]  ;;  %455 = vst [vmem:[%s439_s28 + $0x8] sm:$0xff] %v454_v3  ;;  %457 = vst [vmem:[%s439_s28 + $0x10] sm:$0xff] %v456_v4 }
 0x10e   : > { %v462_v7 = vld [vmem:[%s695_s24 + $0x28] sm:$0xff]  ;;  %459 = vst [vmem:[%s439_s28 + $0x18] sm:$0xff] %v458_v5  ;;  %461 = vst [vmem:[%s439_s28 + $0x220] sm:$0xff] %v460_v6  ;;  %v464_v8 = vld [vmem:[%s695_s24 + $0x30] sm:$0xff] }
 0x10f   : > { %463 = vst [vmem:[%s439_s28 + $0x228] sm:$0xff] %v462_v7  ;;  %v466_v9 = vld [vmem:[%s695_s24 + $0x38] sm:$0xff]  ;;  %465 = vst [vmem:[%s439_s28 + $0x230] sm:$0xff] %v464_v8 }
 0x110   : > { %467 = vst [vmem:[%s439_s28 + $0x238] sm:$0xff] %v466_v9 }
 0x111 PF: > { %p11_p10 = scmp.ge.s32.totalorder %s650_s19, 19   ;;  %s736_s15 = smov %s601_s16 }
 0x112   : > { %s737_s16 = smov %s661_s22  ;;  %s738_s17 = smov %s650_s19 }
 0x113   :  { %13 = sbr.rel (!%p11_p10) target bundleno = 2 (0x2), region = 117 }

</bundles_post_ra>
